<compile_context>
chip_gen: v7x
topology: tpu7x:2x2x1
jax: 0.10.0
libtpu: 0.0.40
codegen_flags: <defaults>
</compile_context>

<pallas_src>
import functools

import jax
import jax.numpy as jnp
import numpy as np
from jax.experimental import pallas as pl
from jax.experimental.pallas import tpu as pltpu


def _residual_stack_kernel(x_ref, w1_ref, w2_ref, o_ref, act_ref, *, H, W, C, Ch, L):
    # x_ref : (1, H, W, C)      bf16  raw input image (NHWC)
    # w1_ref: (L, 9*C, Ch)      bf16  im2col-packed 3x3 conv weights, tap index dy*3+dx
    # w2_ref: (L, Ch, C)        bf16  1x1 conv weights
    # o_ref : (1, H, W, C)      f32   ReLU(stack output)
    # act_ref: (H+2, W+2, C)    f32   zero-padded running activation (VMEM scratch)
    HW = H * W

    # Zero halo + place the raw input in the interior (padding handled in-kernel).
    act_ref[...] = jnp.zeros_like(act_ref)
    act_ref[1:H + 1, 1:W + 1, :] = x_ref[0].astype(jnp.float32)

    for l in range(L):  # layers are fused; static unrolled loop
        xp = act_ref[...]                                   # (H+2, W+2, C) f32, un-ReLU'd
        xr = jnp.maximum(xp, 0.0)                           # ReLU; halo stays 0 (= pad of ReLU(x))

        # im2col: one (HW, 9*C) slab, tap order dy*3+dx (matches w1 packing).
        cols = [
            xr[dy:dy + H, dx:dx + W, :].reshape(HW, C)
            for dy in range(3) for dx in range(3)
        ]
        slab = jnp.concatenate(cols, axis=1).astype(jnp.bfloat16)        # (HW, 9C)

        h = jnp.dot(slab, w1_ref[l], preferred_element_type=jnp.float32)  # (HW, Ch) f32
        h = jnp.maximum(h, 0.0).astype(jnp.bfloat16)
        y = jnp.dot(h, w2_ref[l], preferred_element_type=jnp.float32)     # (HW, C) f32

        # Residual add uses the un-ReLU'd activation (interior of the padded scratch).
        res = xp[1:H + 1, 1:W + 1, :].reshape(HW, C)
        act_ref[1:H + 1, 1:W + 1, :] = (res + y).reshape(H, W, C)

    # Final ReLU of the stack.
    o_ref[0] = jnp.maximum(act_ref[1:H + 1, 1:W + 1, :], 0.0).astype(o_ref.dtype)


def residual_stack_forward(x_nchw, w1_list, w2_list):
    """x_nchw: (B, C, H, W) f32; w1_list[l]: (Ch, C, 3, 3); w2_list[l]: (C, Ch, 1, 1)."""
    B, C, H, W = x_nchw.shape
    L = len(w1_list)
    Ch = w1_list[0].shape[0]
    assert all(w.shape == (Ch, C, 3, 3) for w in w1_list)
    assert all(w.shape == (C, Ch, 1, 1) for w in w2_list), \
        "residual add requires num_hiddens == in_channels"

    # NCHW -> NHWC once for the whole stack; bf16 activations halve DMA bytes.
    x = jnp.transpose(x_nchw, (0, 2, 3, 1)).astype(jnp.bfloat16)

    # (Ch, C, 3, 3) -> (9*C, Ch): row index = (dy*3+dx)*C + c  (matches in-kernel im2col).
    w1 = jnp.stack(
        [jnp.transpose(w, (2, 3, 1, 0)).reshape(9 * C, Ch) for w in w1_list]
    ).astype(jnp.bfloat16)                                   # (L, 9C, Ch)
    # (C, Ch, 1, 1) -> (Ch, C)
    w2 = jnp.stack(
        [jnp.transpose(w[:, :, 0, 0], (1, 0)) for w in w2_list]
    ).astype(jnp.bfloat16)                                   # (L, Ch, C)

    kernel = functools.partial(_residual_stack_kernel, H=H, W=W, C=C, Ch=Ch, L=L)

    out_nhwc = pl.pallas_call(
        kernel,
        out_shape=jax.ShapeDtypeStruct((B, H, W, C), jnp.float32),
        grid_spec=pltpu.PrefetchScalarGridSpec(
            num_scalar_prefetch=0,
            grid=(B,),
            in_specs=[
                pl.BlockSpec((1, H, W, C), lambda b: (b, 0, 0, 0)),
                pl.BlockSpec((L, 9 * C, Ch), lambda b: (0, 0, 0)),   # weights stay resident
                pl.BlockSpec((L, Ch, C), lambda b: (0, 0, 0)),
            ],
            out_specs=pl.BlockSpec((1, H, W, C), lambda b: (b, 0, 0, 0)),
            scratch_shapes=[pltpu.VMEM((H + 2, W + 2, C), jnp.float32)],
        ),
        compiler_params=pltpu.CompilerParams(
            dimension_semantics=("parallel",),        # v7x: shard batch across both TCs
            vmem_limit_bytes=32 * 1024 * 1024,        # raise for larger images on v5e/v6e
        ),
    )(x, w1, w2)

    # NHWC -> NCHW
    return jnp.transpose(out_nhwc, (0, 3, 1, 2))


def _reference(x_nchw, w1_list, w2_list):
    """Pure-JAX f32 reference replicating the PyTorch ResidualStack forward."""
    h = x_nchw
    for w1, w2 in zip(w1_list, w2_list):
        dn1 = jax.lax.conv_dimension_numbers(h.shape, w1.shape, ("NCHW", "OIHW", "NCHW"))
        t = jnp.maximum(h, 0.0)
        t = jax.lax.conv_general_dilated(t, w1, (1, 1), ((1, 1), (1, 1)),
                                         dimension_numbers=dn1)
        t = jnp.maximum(t, 0.0)
        dn2 = jax.lax.conv_dimension_numbers(t.shape, w2.shape, ("NCHW", "OIHW", "NCHW"))
        t = jax.lax.conv_general_dilated(t, w2, (1, 1), ((0, 0), (0, 0)),
                                         dimension_numbers=dn2)
        h = h + t
    return jnp.maximum(h, 0.0)


if __name__ == "__main__":
    B, C, H, W = 2, 4, 16, 16          # in_channels = num_hiddens = 4
    Ch = 8                             # num_residual_hiddens
    L = 2                              # num_residual_layers

    key = jax.random.PRNGKey(0)
    keys = jax.random.split(key, 1 + 2 * L)
    x = jax.random.normal(keys[0], (B, C, H, W), dtype=jnp.float32)
    w1_list = [jax.random.normal(keys[1 + 2 * l], (Ch, C, 3, 3), dtype=jnp.float32)
               * (2.0 / (C * 9)) ** 0.5 for l in range(L)]
    w2_list = [jax.random.normal(keys[2 + 2 * l], (C, Ch, 1, 1), dtype=jnp.float32)
               * (2.0 / Ch) ** 0.5 for l in range(L)]

    out = residual_stack_forward(x, w1_list, w2_list)
    out = jax.block_until_ready(out)

    ref = _reference(x, w1_list, w2_list)
    # bf16 MXU operands / bf16 input activations -> loosened tolerance vs the f32 reference.
    np.testing.assert_allclose(np.asarray(out), np.asarray(ref), rtol=2e-2, atol=2e-2)

    print("KERNEL_OK")
</pallas_src>

<mosaic_0001>
module attributes {stable_mosaic.version = 11 : i64} {
  func.func @_residual_stack_kernel(%arg0: i32, %arg1: memref<1x16x16x4xbf16, #tpu.memory_space<vmem>>, %arg2: memref<2x36x8xbf16, #tpu.memory_space<vmem>>, %arg3: memref<2x8x4xbf16, #tpu.memory_space<vmem>>, %arg4: memref<1x16x16x4xf32, #tpu.memory_space<vmem>>, %arg5: memref<18x18x4xf32, #tpu.memory_space<vmem>>) attributes {dimension_semantics = [#tpu.dimension_semantics<parallel>], iteration_bounds = array<i64: 2>, scalar_prefetch = 0 : i64, scratch_operands = 1 : i64, tpu.core_type = #tpu.core_type<tc>, window_params = [{transform_indices = @transform_0, window_bounds = array<i64: 1, 16, 16, 4>}, {pipeline_mode = #tpu.pipeline_mode<synchronous>, transform_indices = @transform_1, window_bounds = array<i64: 2, 36, 8>}, {pipeline_mode = #tpu.pipeline_mode<synchronous>, transform_indices = @transform_2, window_bounds = array<i64: 2, 8, 4>}, {transform_indices = @transform_3, window_bounds = array<i64: 1, 16, 16, 4>}]} {
    %cst = arith.constant 0.000000e+00 : f32
    %0 = vector.broadcast %cst : f32 to vector<18x18x4xf32>
    %c0 = arith.constant 0 : index
    %c0_0 = arith.constant 0 : index
    %c0_1 = arith.constant 0 : index
    %1 = vector.load %arg5[%c0, %c0_0, %c0_1] : memref<18x18x4xf32, #tpu.memory_space<vmem>>, vector<18x18x4xf32>
    tpu.vector_store %arg5[%c0, %c0_0, %c0_1], %0 {strides = array<i32>} : memref<18x18x4xf32, #tpu.memory_space<vmem>>, vector<18x18x4xf32>,
    %c0_2 = arith.constant 0 : index
    %c0_3 = arith.constant 0 : index
    %c0_4 = arith.constant 0 : index
    %c0_5 = arith.constant 0 : index
    %2 = vector.load %arg1[%c0_2, %c0_3, %c0_4, %c0_5] : memref<1x16x16x4xbf16, #tpu.memory_space<vmem>>, vector<1x16x16x4xbf16>
    %3 = vector.shape_cast %2 : vector<1x16x16x4xbf16> to vector<16x16x4xbf16>
    %4 = arith.extf %3 : vector<16x16x4xbf16> to vector<16x16x4xf32>
    %c1 = arith.constant 1 : index
    %c1_6 = arith.constant 1 : index
    %c0_7 = arith.constant 0 : index
    %5 = vector.load %arg5[%c1, %c1_6, %c0_7] : memref<18x18x4xf32, #tpu.memory_space<vmem>>, vector<16x16x4xf32>
    tpu.vector_store %arg5[%c1, %c1_6, %c0_7], %4 {strides = array<i32>} : memref<18x18x4xf32, #tpu.memory_space<vmem>>, vector<16x16x4xf32>,
    %c0_8 = arith.constant 0 : index
    %c0_9 = arith.constant 0 : index
    %c0_10 = arith.constant 0 : index
    %6 = vector.load %arg5[%c0_8, %c0_9, %c0_10] : memref<18x18x4xf32, #tpu.memory_space<vmem>>, vector<18x18x4xf32>
    %cst_11 = arith.constant 0.000000e+00 : f32
    %7 = vector.broadcast %cst_11 : f32 to vector<18x18x4xf32>
    %8 = arith.maximumf %6, %7 : vector<18x18x4xf32>
    %9 = vector.extract_strided_slice %8 {offsets = [0, 0, 0], sizes = [16, 16, 4], strides = [1, 1, 1]} : vector<18x18x4xf32> to vector<16x16x4xf32>
    %10 = vector.shape_cast %9 : vector<16x16x4xf32> to vector<256x4xf32>
    %11 = vector.extract_strided_slice %8 {offsets = [0, 1, 0], sizes = [16, 16, 4], strides = [1, 1, 1]} : vector<18x18x4xf32> to vector<16x16x4xf32>
    %12 = vector.shape_cast %11 : vector<16x16x4xf32> to vector<256x4xf32>
    %13 = vector.extract_strided_slice %8 {offsets = [0, 2, 0], sizes = [16, 16, 4], strides = [1, 1, 1]} : vector<18x18x4xf32> to vector<16x16x4xf32>
    %14 = vector.shape_cast %13 : vector<16x16x4xf32> to vector<256x4xf32>
    %15 = vector.extract_strided_slice %8 {offsets = [1, 0, 0], sizes = [16, 16, 4], strides = [1, 1, 1]} : vector<18x18x4xf32> to vector<16x16x4xf32>
    %16 = vector.shape_cast %15 : vector<16x16x4xf32> to vector<256x4xf32>
    %17 = vector.extract_strided_slice %8 {offsets = [1, 1, 0], sizes = [16, 16, 4], strides = [1, 1, 1]} : vector<18x18x4xf32> to vector<16x16x4xf32>
    %18 = vector.shape_cast %17 : vector<16x16x4xf32> to vector<256x4xf32>
    %19 = vector.extract_strided_slice %8 {offsets = [1, 2, 0], sizes = [16, 16, 4], strides = [1, 1, 1]} : vector<18x18x4xf32> to vector<16x16x4xf32>
    %20 = vector.shape_cast %19 : vector<16x16x4xf32> to vector<256x4xf32>
    %21 = vector.extract_strided_slice %8 {offsets = [2, 0, 0], sizes = [16, 16, 4], strides = [1, 1, 1]} : vector<18x18x4xf32> to vector<16x16x4xf32>
    %22 = vector.shape_cast %21 : vector<16x16x4xf32> to vector<256x4xf32>
    %23 = vector.extract_strided_slice %8 {offsets = [2, 1, 0], sizes = [16, 16, 4], strides = [1, 1, 1]} : vector<18x18x4xf32> to vector<16x16x4xf32>
    %24 = vector.shape_cast %23 : vector<16x16x4xf32> to vector<256x4xf32>
    %25 = vector.extract_strided_slice %8 {offsets = [2, 2, 0], sizes = [16, 16, 4], strides = [1, 1, 1]} : vector<18x18x4xf32> to vector<16x16x4xf32>
    %26 = vector.shape_cast %25 : vector<16x16x4xf32> to vector<256x4xf32>
    %27 = tpu.concatenate %10, %12, %14, %16, %18, %20, %22, %24, %26 in 1 : vector<256x4xf32>, vector<256x4xf32>, vector<256x4xf32>, vector<256x4xf32>, vector<256x4xf32>, vector<256x4xf32>, vector<256x4xf32>, vector<256x4xf32>, vector<256x4xf32> -> vector<256x36xf32>
    %28 = arith.truncf %27 : vector<256x36xf32> to vector<256x36xbf16>
    %c0_12 = arith.constant 0 : index
    %c0_13 = arith.constant 0 : index
    %c0_14 = arith.constant 0 : index
    %29 = vector.load %arg2[%c0_12, %c0_13, %c0_14] : memref<2x36x8xbf16, #tpu.memory_space<vmem>>, vector<1x36x8xbf16>
    %30 = vector.shape_cast %29 : vector<1x36x8xbf16> to vector<36x8xbf16>
    %cst_15 = arith.constant dense<0.000000e+00> : vector<256x8xf32>
    %31 = tpu.matmul %28, %30, %cst_15 {dimension_numbers = #tpu.dot_dimension_numbers<[1], [0], [0], [1], [0, 0, 1, 1], [], []>} : vector<256x36xbf16>, vector<36x8xbf16>, vector<256x8xf32> -> vector<256x8xf32>
    %cst_16 = arith.constant 0.000000e+00 : f32
    %32 = vector.broadcast %cst_16 : f32 to vector<256x8xf32>
    %33 = arith.maximumf %31, %32 : vector<256x8xf32>
    %34 = arith.truncf %33 : vector<256x8xf32> to vector<256x8xbf16>
    %c0_17 = arith.constant 0 : index
    %c0_18 = arith.constant 0 : index
    %c0_19 = arith.constant 0 : index
    %35 = vector.load %arg3[%c0_17, %c0_18, %c0_19] : memref<2x8x4xbf16, #tpu.memory_space<vmem>>, vector<1x8x4xbf16>
    %36 = vector.shape_cast %35 : vector<1x8x4xbf16> to vector<8x4xbf16>
    %cst_20 = arith.constant dense<0.000000e+00> : vector<256x4xf32>
    %37 = tpu.matmul %34, %36, %cst_20 {dimension_numbers = #tpu.dot_dimension_numbers<[1], [0], [0], [1], [0, 0, 1, 1], [], []>} : vector<256x8xbf16>, vector<8x4xbf16>, vector<256x4xf32> -> vector<256x4xf32>
    %38 = vector.extract_strided_slice %6 {offsets = [1, 1, 0], sizes = [16, 16, 4], strides = [1, 1, 1]} : vector<18x18x4xf32> to vector<16x16x4xf32>
    %39 = vector.shape_cast %38 : vector<16x16x4xf32> to vector<256x4xf32>
    %40 = arith.addf %39, %37 : vector<256x4xf32>
    %41 = vector.shape_cast %40 : vector<256x4xf32> to vector<16x16x4xf32>
    %c1_21 = arith.constant 1 : index
    %c1_22 = arith.constant 1 : index
    %c0_23 = arith.constant 0 : index
    %42 = vector.load %arg5[%c1_21, %c1_22, %c0_23] : memref<18x18x4xf32, #tpu.memory_space<vmem>>, vector<16x16x4xf32>
    tpu.vector_store %arg5[%c1_21, %c1_22, %c0_23], %41 {strides = array<i32>} : memref<18x18x4xf32, #tpu.memory_space<vmem>>, vector<16x16x4xf32>,
    %c0_24 = arith.constant 0 : index
    %c0_25 = arith.constant 0 : index
    %c0_26 = arith.constant 0 : index
    %43 = vector.load %arg5[%c0_24, %c0_25, %c0_26] : memref<18x18x4xf32, #tpu.memory_space<vmem>>, vector<18x18x4xf32>
    %cst_27 = arith.constant 0.000000e+00 : f32
    %44 = vector.broadcast %cst_27 : f32 to vector<18x18x4xf32>
    %45 = arith.maximumf %43, %44 : vector<18x18x4xf32>
    %46 = vector.extract_strided_slice %45 {offsets = [0, 0, 0], sizes = [16, 16, 4], strides = [1, 1, 1]} : vector<18x18x4xf32> to vector<16x16x4xf32>
    %47 = vector.shape_cast %46 : vector<16x16x4xf32> to vector<256x4xf32>
    %48 = vector.extract_strided_slice %45 {offsets = [0, 1, 0], sizes = [16, 16, 4], strides = [1, 1, 1]} : vector<18x18x4xf32> to vector<16x16x4xf32>
    %49 = vector.shape_cast %48 : vector<16x16x4xf32> to vector<256x4xf32>
    %50 = vector.extract_strided_slice %45 {offsets = [0, 2, 0], sizes = [16, 16, 4], strides = [1, 1, 1]} : vector<18x18x4xf32> to vector<16x16x4xf32>
    %51 = vector.shape_cast %50 : vector<16x16x4xf32> to vector<256x4xf32>
    %52 = vector.extract_strided_slice %45 {offsets = [1, 0, 0], sizes = [16, 16, 4], strides = [1, 1, 1]} : vector<18x18x4xf32> to vector<16x16x4xf32>
    %53 = vector.shape_cast %52 : vector<16x16x4xf32> to vector<256x4xf32>
    %54 = vector.extract_strided_slice %45 {offsets = [1, 1, 0], sizes = [16, 16, 4], strides = [1, 1, 1]} : vector<18x18x4xf32> to vector<16x16x4xf32>
    %55 = vector.shape_cast %54 : vector<16x16x4xf32> to vector<256x4xf32>
    %56 = vector.extract_strided_slice %45 {offsets = [1, 2, 0], sizes = [16, 16, 4], strides = [1, 1, 1]} : vector<18x18x4xf32> to vector<16x16x4xf32>
    %57 = vector.shape_cast %56 : vector<16x16x4xf32> to vector<256x4xf32>
    %58 = vector.extract_strided_slice %45 {offsets = [2, 0, 0], sizes = [16, 16, 4], strides = [1, 1, 1]} : vector<18x18x4xf32> to vector<16x16x4xf32>
    %59 = vector.shape_cast %58 : vector<16x16x4xf32> to vector<256x4xf32>
    %60 = vector.extract_strided_slice %45 {offsets = [2, 1, 0], sizes = [16, 16, 4], strides = [1, 1, 1]} : vector<18x18x4xf32> to vector<16x16x4xf32>
    %61 = vector.shape_cast %60 : vector<16x16x4xf32> to vector<256x4xf32>
    %62 = vector.extract_strided_slice %45 {offsets = [2, 2, 0], sizes = [16, 16, 4], strides = [1, 1, 1]} : vector<18x18x4xf32> to vector<16x16x4xf32>
    %63 = vector.shape_cast %62 : vector<16x16x4xf32> to vector<256x4xf32>
    %64 = tpu.concatenate %47, %49, %51, %53, %55, %57, %59, %61, %63 in 1 : vector<256x4xf32>, vector<256x4xf32>, vector<256x4xf32>, vector<256x4xf32>, vector<256x4xf32>, vector<256x4xf32>, vector<256x4xf32>, vector<256x4xf32>, vector<256x4xf32> -> vector<256x36xf32>
    %65 = arith.truncf %64 : vector<256x36xf32> to vector<256x36xbf16>
    %c1_28 = arith.constant 1 : index
    %c0_29 = arith.constant 0 : index
    %c0_30 = arith.constant 0 : index
    %66 = vector.load %arg2[%c1_28, %c0_29, %c0_30] : memref<2x36x8xbf16, #tpu.memory_space<vmem>>, vector<1x36x8xbf16>
    %67 = vector.shape_cast %66 : vector<1x36x8xbf16> to vector<36x8xbf16>
    %cst_31 = arith.constant dense<0.000000e+00> : vector<256x8xf32>
    %68 = tpu.matmul %65, %67, %cst_31 {dimension_numbers = #tpu.dot_dimension_numbers<[1], [0], [0], [1], [0, 0, 1, 1], [], []>} : vector<256x36xbf16>, vector<36x8xbf16>, vector<256x8xf32> -> vector<256x8xf32>
    %cst_32 = arith.constant 0.000000e+00 : f32
    %69 = vector.broadcast %cst_32 : f32 to vector<256x8xf32>
    %70 = arith.maximumf %68, %69 : vector<256x8xf32>
    %71 = arith.truncf %70 : vector<256x8xf32> to vector<256x8xbf16>
    %c1_33 = arith.constant 1 : index
    %c0_34 = arith.constant 0 : index
    %c0_35 = arith.constant 0 : index
    %72 = vector.load %arg3[%c1_33, %c0_34, %c0_35] : memref<2x8x4xbf16, #tpu.memory_space<vmem>>, vector<1x8x4xbf16>
    %73 = vector.shape_cast %72 : vector<1x8x4xbf16> to vector<8x4xbf16>
    %cst_36 = arith.constant dense<0.000000e+00> : vector<256x4xf32>
    %74 = tpu.matmul %71, %73, %cst_36 {dimension_numbers = #tpu.dot_dimension_numbers<[1], [0], [0], [1], [0, 0, 1, 1], [], []>} : vector<256x8xbf16>, vector<8x4xbf16>, vector<256x4xf32> -> vector<256x4xf32>
    %75 = vector.extract_strided_slice %43 {offsets = [1, 1, 0], sizes = [16, 16, 4], strides = [1, 1, 1]} : vector<18x18x4xf32> to vector<16x16x4xf32>
    %76 = vector.shape_cast %75 : vector<16x16x4xf32> to vector<256x4xf32>
    %77 = arith.addf %76, %74 : vector<256x4xf32>
    %78 = vector.shape_cast %77 : vector<256x4xf32> to vector<16x16x4xf32>
    %c1_37 = arith.constant 1 : index
    %c1_38 = arith.constant 1 : index
    %c0_39 = arith.constant 0 : index
    %79 = vector.load %arg5[%c1_37, %c1_38, %c0_39] : memref<18x18x4xf32, #tpu.memory_space<vmem>>, vector<16x16x4xf32>
    tpu.vector_store %arg5[%c1_37, %c1_38, %c0_39], %78 {strides = array<i32>} : memref<18x18x4xf32, #tpu.memory_space<vmem>>, vector<16x16x4xf32>,
    %c1_40 = arith.constant 1 : index
    %c1_41 = arith.constant 1 : index
    %c0_42 = arith.constant 0 : index
    %80 = vector.load %arg5[%c1_40, %c1_41, %c0_42] : memref<18x18x4xf32, #tpu.memory_space<vmem>>, vector<16x16x4xf32>
    %cst_43 = arith.constant 0.000000e+00 : f32
    %81 = vector.broadcast %cst_43 : f32 to vector<16x16x4xf32>
    %82 = arith.maximumf %80, %81 : vector<16x16x4xf32>
    %c0_44 = arith.constant 0 : index
    %c0_45 = arith.constant 0 : index
    %c0_46 = arith.constant 0 : index
    %c0_47 = arith.constant 0 : index
    %83 = vector.load %arg4[%c0_44, %c0_45, %c0_46, %c0_47] : memref<1x16x16x4xf32, #tpu.memory_space<vmem>>, vector<1x16x16x4xf32>
    %84 = vector.shape_cast %83 : vector<1x16x16x4xf32> to vector<16x16x4xf32>
    %85 = vector.shape_cast %82 : vector<16x16x4xf32> to vector<1x16x16x4xf32>
    tpu.vector_store %arg4[%c0_44, %c0_45, %c0_46, %c0_47], %85 {strides = array<i32>} : memref<1x16x16x4xf32, #tpu.memory_space<vmem>>, vector<1x16x16x4xf32>,
    return
  }
  func.func @transform_0(%arg0: i32) -> (i32, i32, i32, i32) {
    %c0_i32 = arith.constant 0 : i32
    %c0_i32_0 = arith.constant 0 : i32
    %c0_i32_1 = arith.constant 0 : i32
    %c0_i32_2 = arith.constant 0 : i32
    return %arg0, %c0_i32, %c0_i32_0, %c0_i32_1 : i32, i32, i32, i32
  }
  func.func @transform_1(%arg0: i32) -> (i32, i32, i32) {
    %c0_i32 = arith.constant 0 : i32
    %c0_i32_0 = arith.constant 0 : i32
    %c0_i32_1 = arith.constant 0 : i32
    %c0_i32_2 = arith.constant 0 : i32
    return %c0_i32, %c0_i32_0, %c0_i32_1 : i32, i32, i32
  }
  func.func @transform_2(%arg0: i32) -> (i32, i32, i32) {
    %c0_i32 = arith.constant 0 : i32
    %c0_i32_0 = arith.constant 0 : i32
    %c0_i32_1 = arith.constant 0 : i32
    %c0_i32_2 = arith.constant 0 : i32
    return %c0_i32, %c0_i32_0, %c0_i32_1 : i32, i32, i32
  }
  func.func @transform_3(%arg0: i32) -> (i32, i32, i32, i32) {
    %c0_i32 = arith.constant 0 : i32
    %c0_i32_0 = arith.constant 0 : i32
    %c0_i32_1 = arith.constant 0 : i32
    %c0_i32_2 = arith.constant 0 : i32
    return %arg0, %c0_i32, %c0_i32_0, %c0_i32_1 : i32, i32, i32, i32
  }
}

</mosaic_0001>

<bundles_post_ra>
// kernel: tpu_custom_call.1
= control target key start
LH: loop header
LB: loop body
LE: loop exit
PB: predicated region body
PF: predicated region fallthrough
CT: control target
= control target key end

     0   :  { %s6512_s12 = smov 0   ;;  %s8935_s0 = inlined_call_operand.vmem [shape: bf16[2,16,16,4], index: 0, kind: input, shape index: {}]   ;;  %s8936_s1 = inlined_call_operand.vmem [shape: bf16[2,36,8], index: 1, kind: input, shape index: {}]   ;;  %s8937_s2 = inlined_call_operand.vmem [shape: bf16[2,8,4], index: 2, kind: input, shape index: {}]   ;;  %s8938_s3 = inlined_call_operand.vmem [shape: f32[2,16,16,4], index: 3, kind: output, shape index: {}]  }
   0x1 LB: > { %s4688_s13 = sadd.s32 4294967295, %s6481_s12   ;;  %p4692_p0 = scmp.ge.s32.totalorder %s6481_s12, 1  ;;  %s6481_s12 = sphi %s6512_s12, %s13_s12  }
   0x2   : > { %p137_p1 = scmp.lt.s32.totalorder %s6481_s12, 3 }
   0x4   : > { %p138_p2 = pnand %p4692_p0, %p137_p1 }
   0x6   : > { %141 = sbr.rel (%p138_p2) target bundleno = 1474 (0x5c2), region = 32 }
   0xd   : > { %vm172_vm0 = vcmask 31744   ;;  %vm175_vm1 = vcmask 25600   ;;  %v6483_v0 = vmov 0.0   ;;  %p161_p3 = scmp.lt.s32.totalorder %s4688_s13, 1  ;;  %vm562_vm2 = vcmask 1045504   ;;  %s6484_s18 = smov 8  }
   0xe   : > { %173 = vst.msk [vmem:[#allocation2] sm:$0xff] %vm172_vm0, %v6483_v0  ;;  %174 = vst.msk [vmem:[#allocation2 + $0x8] sm:$0xff] %vm172_vm0, %v6483_v0  ;;  %vm481_vm3 = vcmask 1046528   ;;  %s6485_s19 = smov 4   ;;  %s6486_s20 = smov 12   ;;  %vm1785_vm4 = vcmask 1041408  }
   0xf   : > { %176 = vst.msk [vmem:[#allocation2 + $0x10] sm:$0x3] %vm175_vm1, %v6483_v0  ;;  %179 = vst.msk [vmem:[#allocation2 + $0x28] sm:$0x3] %vm175_vm1, %v6483_v0  ;;  %s8960_s13 = smov (!%p161_p3, %s4688_s13), 1  ;;  %s6487_s21 = smov 24  }
  0x10   : > { %177 = vst.msk [vmem:[#allocation2 + $0x18] sm:$0xff] %vm172_vm0, %v6483_v0  ;;  %178 = vst.msk [vmem:[#allocation2 + $0x20] sm:$0xff] %vm172_vm0, %v6483_v0  ;;  %s4775_s14 = sshll.u32 %s8960_s13, 7  ;;  %s6488_s26 = smov 16   ;;  %vm1469_vm5 = vcmask 64512   ;;  %vm1502_vm6 = vcmask 97280  }
  0x11   : > { %180 = vst.msk [vmem:[#allocation2 + $0x30] sm:$0xff] %vm172_vm0, %v6483_v0  ;;  %181 = vst.msk [vmem:[#allocation2 + $0x38] sm:$0xff] %vm172_vm0, %v6483_v0  ;;  %s6584_s17 = scalar_lea.vmem %s8935_s0, %s4775_s14  ;;  %s6489_s27 = smov 20   ;;  %vm1535_vm7 = vcmask 130048   ;;  %vm1568_vm8 = vcmask 162816   ;;  %vm1601_vm9 = vcmask 195584  }
  0x12   : > { %182 = vst.msk [vmem:[#allocation2 + $0x40] sm:$0x3] %vm175_vm1, %v6483_v0  ;;  %185 = vst.msk [vmem:[#allocation2 + $0x58] sm:$0x3] %vm175_vm1, %v6483_v0  ;;  %v4841_v1 = vld [vmem:[%s6584_s17 + $0x8] sm:$0xff]   ;;  %v4778_v2 = vld [vmem:[%s6584_s17] sm:$0xff]  }
  0x13   : > { %183 = vst.msk [vmem:[#allocation2 + $0x48] sm:$0xff] %vm172_vm0, %v6483_v0  ;;  %184 = vst.msk [vmem:[#allocation2 + $0x50] sm:$0xff] %vm172_vm0, %v6483_v0  ;;  %v4842_v3 = vld [vmem:[%s6584_s17 + $0x10] sm:$0xff]   ;;  %v4783_v7 = vunpack.c.l.bf16 %v4841_v1  ;;  %v4784_v8 = vunpack.c.h.bf16 %v4841_v1  ;;  %v4779_v9 = vunpack.c.l.bf16 %v4778_v2  ;;  %v4780_v10 = vunpack.c.h.bf16 %v4778_v2  ;;  %v4843_v15 = vld [vmem:[%s6584_s17 + $0x18] sm:$0xff]   ;;  %s6490_s28 = smov 28   ;;  %s6491_s29 = smov 32  }
  0x14   : > { %186 = vst.msk [vmem:[#allocation2 + $0x60] sm:$0xff] %vm172_vm0, %v6483_v0  ;;  %187 = vst.msk [vmem:[#allocation2 + $0x68] sm:$0xff] %vm172_vm0, %v6483_v0  ;;  %v4787_v14 = vunpack.c.l.bf16 %v4842_v3  ;;  %v4844_v16 = vld [vmem:[%s6584_s17 + $0x20] sm:$0xff]   ;;  %v4845_v17 = vld [vmem:[%s6584_s17 + $0x28] sm:$0xff]   ;;  %v4788_v18 = vunpack.c.h.bf16 %v4842_v3  ;;  %v4791_v19 = vunpack.c.l.bf16 %v4843_v15  ;;  %v4792_v20 = vunpack.c.h.bf16 %v4843_v15 }
  0x15   : > { %188 = vst.msk [vmem:[#allocation2 + $0x70] sm:$0x3] %vm175_vm1, %v6483_v0  ;;  %191 = vst.msk [vmem:[#allocation2 + $0x88] sm:$0x3] %vm175_vm1, %v6483_v0  ;;  %v325_v4 = vld [vmem:[#allocation2] sm:$0xff]  ;;  %v326_v5 = vld [vmem:[#allocation2 + $0x8] sm:$0xff]  ;;  %v4795_v21 = vunpack.c.l.bf16 %v4844_v16  ;;  %v4796_v29 = vunpack.c.h.bf16 %v4844_v16  ;;  %v4799_v30 = vunpack.c.l.bf16 %v4845_v17  ;;  %v4800_v35 = vunpack.c.h.bf16 %v4845_v17 }
  0x16   : > { %189 = vst.msk [vmem:[#allocation2 + $0x78] sm:$0xff] %vm172_vm0, %v6483_v0  ;;  %190 = vst.msk [vmem:[#allocation2 + $0x80] sm:$0xff] %vm172_vm0, %v6483_v0  ;;  %v327_v6 = vld [vmem:[#allocation2 + $0x10] sm:$0x3]  ;;  %v6589_v11 = vmax.f32 %v325_v4, 0.0  ;;  %v6591_v12 = vmax.f32 %v326_v5, 0.0 }
  0x17   : > { %192 = vst.msk [vmem:[#allocation2 + $0x90] sm:$0xff] %vm172_vm0, %v6483_v0  ;;  %193 = vst.msk [vmem:[#allocation2 + $0x98] sm:$0xff] %vm172_vm0, %v6483_v0  ;;  %v381_v13 = vmax.f32 %v327_v6, 0.0  ;;  %v4846_v22 = vld [vmem:[%s6584_s17 + $0x30] sm:$0xff]   ;;  %v4847_v31 = vld [vmem:[%s6584_s17 + $0x38] sm:$0xff]   ;;  %vm1634_vm10 = vcmask 228352  }
  0x18   : > { %194 = vst.msk [vmem:[#allocation2 + $0xa0] sm:$0x3] %vm175_vm1, %v6483_v0  ;;  %197 = vst.msk [vmem:[#allocation2 + $0xb8] sm:$0x3] %vm175_vm1, %v6483_v0  ;;  %v563_v23 = vrot.slane %v6589_v11, 2  ;;  %v564_v24 = vrot.slane %v6591_v12, 2  ;;  %v4803_v36 = vunpack.c.l.bf16 %v4846_v22  ;;  %v4804_v41 = vunpack.c.h.bf16 %v4846_v22 }
  0x19   : > { %195 = vst.msk [vmem:[#allocation2 + $0xa8] sm:$0xff] %vm172_vm0, %v6483_v0  ;;  %196 = vst.msk [vmem:[#allocation2 + $0xb0] sm:$0xff] %vm172_vm0, %v6483_v0  ;;  %v566_v25 = vrot.slane %v381_v13, 2  ;;  %v482_v26 = vrot.slane %v6589_v11, 1  ;;  %v483_v27 = vrot.slane %v6591_v12, 1  ;;  %v485_v28 = vrot.slane %v381_v13, 1 }
  0x1a   : > { %198 = vst.msk [vmem:[#allocation2 + $0xc0] sm:$0xff] %vm172_vm0, %v6483_v0  ;;  %199 = vst.msk [vmem:[#allocation2 + $0xc8] sm:$0xff] %vm172_vm0, %v6483_v0  ;;  %v4848_v32 = vld [vmem:[%s6584_s17 + $0x40] sm:$0xff]   ;;  %v565_v33 = vsel %vm562_vm2, %v563_v23, %v564_v24  ;;  %v4849_v37 = vld [vmem:[%s6584_s17 + $0x48] sm:$0xff]   ;;  %v4807_v43 = vunpack.c.l.bf16 %v4847_v31  ;;  %v4808_v44 = vunpack.c.h.bf16 %v4847_v31  ;;  %vm1667_vm11 = vcmask 261120  }
  0x1b   : > { %200 = vst.msk [vmem:[#allocation2 + $0xd0] sm:$0x3] %vm175_vm1, %v6483_v0  ;;  %203 = vst.msk [vmem:[#allocation2 + $0xe8] sm:$0x3] %vm175_vm1, %v6483_v0  ;;  %v567_v34 = vsel %vm562_vm2, %v564_v24, %v566_v25  ;;  %v484_v39 = vsel %vm481_vm3, %v482_v26, %v483_v27  ;;  %v486_v40 = vsel %vm481_vm3, %v483_v27, %v485_v28  ;;  %v4811_v45 = vunpack.c.l.bf16 %v4848_v32  ;;  %v6373_v28 = vld [vmem:[%s8936_s1] sm:$0xff]  }
  0x1c   : > { %201 = vst.msk [vmem:[#allocation2 + $0xd8] sm:$0xff] %vm172_vm0, %v6483_v0  ;;  %202 = vst.msk [vmem:[#allocation2 + $0xe0] sm:$0xff] %vm172_vm0, %v6483_v0  ;;  %v5098_v38 = vpack.i.bf16 %v567_v34, %v565_v33  ;;  %v5093_v42 = vpack.i.bf16 %v486_v40, %v484_v39  ;;  %v4812_v46 = vunpack.c.h.bf16 %v4848_v32  ;;  %v4815_v47 = vunpack.c.l.bf16 %v4849_v37  ;;  %4928 = vmatprep.subr.bf16.mxu0 %v6373_v28 }
  0x1d   : > { %204 = vst.msk [vmem:[#allocation2 + $0xf0] sm:$0xff] %vm172_vm0, %v6483_v0  ;;  %205 = vst.msk [vmem:[#allocation2 + $0xf8] sm:$0xff] %vm172_vm0, %v6483_v0  ;;  %v4816_v51 = vunpack.c.h.bf16 %v4849_v37  ;;  %4929 = vmatpush3.bf16.msra.mxu0 %v6373_v28  ;;  %vm1736_vm12 = vcmask 293888   ;;  %vm2047_vm13 = vcmask 1043456  }
  0x1e   : > { %206 = vst.msk [vmem:[#allocation2 + $0x100] sm:$0x3] %vm175_vm1, %v6483_v0  ;;  %209 = vst.msk [vmem:[#allocation2 + $0x118] sm:$0x3] %vm175_vm1, %v6483_v0  ;;  %5099 = vrot.lane.b32.xlu1 %v5098_v38, %s6484_s18  ;;  %5094 = vrot.lane.b32.xlu0 %v5093_v42, %s6485_s19 }
  0x1f   : > { %207 = vst.msk [vmem:[#allocation2 + $0x108] sm:$0xff] %vm172_vm0, %v6483_v0  ;;  %208 = vst.msk [vmem:[#allocation2 + $0x110] sm:$0xff] %vm172_vm0, %v6483_v0 }
  0x20   : > { %210 = vst.msk [vmem:[#allocation2 + $0x120] sm:$0xff] %vm172_vm0, %v6483_v0  ;;  %211 = vst.msk [vmem:[#allocation2 + $0x128] sm:$0xff] %vm172_vm0, %v6483_v0 }
  0x21   : > { %212 = vst.msk [vmem:[#allocation2 + $0x130] sm:$0x3] %vm175_vm1, %v6483_v0  ;;  %215 = vst.msk [vmem:[#allocation2 + $0x148] sm:$0x3] %vm175_vm1, %v6483_v0 }
  0x22   : > { %213 = vst.msk [vmem:[#allocation2 + $0x138] sm:$0xff] %vm172_vm0, %v6483_v0  ;;  %214 = vst.msk [vmem:[#allocation2 + $0x140] sm:$0xff] %vm172_vm0, %v6483_v0 }
  0x23   : > { %216 = vst.msk [vmem:[#allocation2 + $0x150] sm:$0xff] %vm172_vm0, %v6483_v0  ;;  %217 = vst.msk [vmem:[#allocation2 + $0x158] sm:$0xff] %vm172_vm0, %v6483_v0 }
  0x24   : > { %218 = vst.msk [vmem:[#allocation2 + $0x160] sm:$0x3] %vm175_vm1, %v6483_v0  ;;  %221 = vst.msk [vmem:[#allocation2 + $0x178] sm:$0x3] %vm175_vm1, %v6483_v0 }
  0x25   : > { %219 = vst.msk [vmem:[#allocation2 + $0x168] sm:$0xff] %vm172_vm0, %v6483_v0  ;;  %220 = vst.msk [vmem:[#allocation2 + $0x170] sm:$0xff] %vm172_vm0, %v6483_v0 }
  0x26   : > { %222 = vst.msk [vmem:[#allocation2 + $0x180] sm:$0xff] %vm172_vm0, %v6483_v0  ;;  %223 = vst.msk [vmem:[#allocation2 + $0x188] sm:$0xff] %vm172_vm0, %v6483_v0 }
  0x27   : > { %224 = vst.msk [vmem:[#allocation2 + $0x190] sm:$0x3] %vm175_vm1, %v6483_v0  ;;  %227 = vst.msk [vmem:[#allocation2 + $0x1a8] sm:$0x3] %vm175_vm1, %v6483_v0 }
  0x28   : > { %225 = vst.msk [vmem:[#allocation2 + $0x198] sm:$0xff] %vm172_vm0, %v6483_v0  ;;  %226 = vst.msk [vmem:[#allocation2 + $0x1a0] sm:$0xff] %vm172_vm0, %v6483_v0 }
  0x29   : > { %295 = vst.msk [vmem:[#allocation2 + $0x31] sm:$0xff] %vm172_vm0, %v4783_v7  ;;  %296 = vst.msk [vmem:[#allocation2 + $0x39] sm:$0xff] %vm172_vm0, %v4784_v8 }
  0x2a   : > { %293 = vst.msk [vmem:[#allocation2 + $0x19] sm:$0xff] %vm172_vm0, %v4779_v9  ;;  %294 = vst.msk [vmem:[#allocation2 + $0x21] sm:$0xff] %vm172_vm0, %v4780_v10 }
  0x2b   : > { %297 = vst.msk [vmem:[#allocation2 + $0x49] sm:$0xff] %vm172_vm0, %v4787_v14  ;;  %298 = vst.msk [vmem:[#allocation2 + $0x51] sm:$0xff] %vm172_vm0, %v4788_v18 }
  0x2c   : > { %299 = vst.msk [vmem:[#allocation2 + $0x61] sm:$0xff] %vm172_vm0, %v4791_v19  ;;  %300 = vst.msk [vmem:[#allocation2 + $0x69] sm:$0xff] %vm172_vm0, %v4792_v20 }
  0x2d   : > { %301 = vst.msk [vmem:[#allocation2 + $0x79] sm:$0xff] %vm172_vm0, %v4795_v21  ;;  %302 = vst.msk [vmem:[#allocation2 + $0x81] sm:$0xff] %vm172_vm0, %v4796_v29 }
  0x2e   : > { %303 = vst.msk [vmem:[#allocation2 + $0x91] sm:$0xff] %vm172_vm0, %v4799_v30  ;;  %304 = vst.msk [vmem:[#allocation2 + $0x99] sm:$0xff] %vm172_vm0, %v4800_v35  ;;  %v6374_v35 = vld [vmem:[%s8936_s1 + $0x8] sm:$0xff]  }
  0x2f   : > { %305 = vst.msk [vmem:[#allocation2 + $0xa9] sm:$0xff] %vm172_vm0, %v4803_v36  ;;  %306 = vst.msk [vmem:[#allocation2 + $0xb1] sm:$0xff] %vm172_vm0, %v4804_v41  ;;  %4930 = vmatprep.subr.bf16.mxu0 %v6374_v35 }
  0x30   : > { %v331_v48 = vld [vmem:[#allocation2 + $0x30] sm:$0xff]  ;;  %v332_v49 = vld [vmem:[#allocation2 + $0x38] sm:$0xff]  ;;  %307 = vst.msk [vmem:[#allocation2 + $0xc1] sm:$0xff] %vm172_vm0, %v4807_v43  ;;  %308 = vst.msk [vmem:[#allocation2 + $0xc9] sm:$0xff] %vm172_vm0, %v4808_v44  ;;  %4931 = vmatpush3.bf16.msra.mxu0 %v6374_v35 }
  0x31   : > { %v328_v50 = vld [vmem:[#allocation2 + $0x18] sm:$0xff]  ;;  %309 = vst.msk [vmem:[#allocation2 + $0xd9] sm:$0xff] %vm172_vm0, %v4811_v45  ;;  %v6627_v52 = vmax.f32 %v331_v48, 0.0  ;;  %v6629_v53 = vmax.f32 %v332_v49, 0.0  ;;  %v329_v54 = vld [vmem:[#allocation2 + $0x20] sm:$0xff]  ;;  %310 = vst.msk [vmem:[#allocation2 + $0xe1] sm:$0xff] %vm172_vm0, %v4812_v46 }
  0x32   : > { %v6631_v55 = vmax.f32 %v328_v50, 0.0  ;;  %v334_v56 = vld [vmem:[#allocation2 + $0x48] sm:$0xff]  ;;  %311 = vst.msk [vmem:[#allocation2 + $0xf1] sm:$0xff] %vm172_vm0, %v4815_v47  ;;  %v6635_v57 = vmax.f32 %v329_v54, 0.0  ;;  %v335_v58 = vld [vmem:[#allocation2 + $0x50] sm:$0xff]  ;;  %312 = vst.msk [vmem:[#allocation2 + $0xf9] sm:$0xff] %vm172_vm0, %v4816_v51 }
  0x33   : > { %v6637_v59 = vmax.f32 %v334_v56, 0.0  ;;  %v330_v60 = vld [vmem:[#allocation2 + $0x28] sm:$0x3]  ;;  %v5108_v61 = vpack.i.bf16 %v6629_v53, %v6627_v52  ;;  %v6642_v62 = vmax.f32 %v335_v58, 0.0  ;;  %v333_v0 = vld [vmem:[#allocation2 + $0x40] sm:$0x3] }
  0x34   : > { %v384_v63 = vmax.f32 %v330_v60, 0.0  ;;  %v5103_v1 = vpack.i.bf16 %v6635_v57, %v6631_v55  ;;  %v568_v2 = vrot.slane %v6631_v55, 2  ;;  %v569_v3 = vrot.slane %v6635_v57, 2  ;;  %v336_v18 = vld [vmem:[#allocation2 + $0x58] sm:$0x3]  ;;  %v337_v45 = vld [vmem:[#allocation2 + $0x60] sm:$0xff] }
  0x35   : > { %v487_v4 = vrot.slane %v6631_v55, 1  ;;  %5109 = vrot.lane.b32.xlu1 %v5108_v61, %s6486_s20  ;;  %v6652_v5 = vpack.i.bf16 %v6642_v62, %v6637_v59  ;;  %v488_v7 = vrot.slane %v6635_v57, 1  ;;  %v387_v10 = vmax.f32 %v333_v0, 0.0  ;;  %v338_v46 = vld [vmem:[#allocation2 + $0x68] sm:$0xff]  ;;  %v339_v47 = vld [vmem:[#allocation2 + $0x70] sm:$0x3] }
  0x36   : > { %v571_v6 = vrot.slane %v384_v63, 2  ;;  %v490_v8 = vrot.slane %v384_v63, 1  ;;  %5104 = vrot.lane.b32.xlu0 %v5103_v1, %s6486_s20  ;;  %v570_v9 = vsel %vm562_vm2, %v568_v2, %v569_v3  ;;  %v492_v13 = vrot.slane %v6627_v52, 1 }
  0x37   : > { %v493_v14 = vrot.slane %v6629_v53, 1  ;;  %v489_v16 = vsel %vm481_vm3, %v487_v4, %v488_v7  ;;  %v495_v19 = vrot.slane %v387_v10, 1  ;;  %v573_v23 = vrot.slane %v6627_v52, 2  ;;  %v341_v4 = vld [vmem:[#allocation2 + $0x80] sm:$0xff] }
  0x38   : > { %v572_v15 = vsel %vm562_vm2, %v569_v3, %v571_v6  ;;  %v491_v17 = vsel %vm481_vm3, %v488_v7, %v490_v8  ;;  %v574_v25 = vrot.slane %v6629_v53, 2  ;;  %v576_v26 = vrot.slane %v387_v10, 2  ;;  %v340_v3 = vld [vmem:[#allocation2 + $0x78] sm:$0xff]  ;;  %v342_v6 = vld [vmem:[#allocation2 + $0x88] sm:$0x3] }
  0x39   : > { %5119 = vrot.lane.b32.xlu1 %v6652_v5, %s6487_s21  ;;  %v5128_v20 = vpack.i.bf16 %v572_v15, %v570_v9  ;;  %v5123_v21 = vpack.i.bf16 %v491_v17, %v489_v16  ;;  %v494_v22 = vsel %vm481_vm3, %v492_v13, %v493_v14  ;;  %v496_v24 = vsel %vm481_vm3, %v493_v14, %v495_v19  ;;  %v6375_v19 = vld [vmem:[%s8936_s1 + $0x10] ss:$0 sps:$4 sm:$0x33]  }
  0x3a   : > { %5114 = vrot.lane.b32.xlu0 %v5108_v61, %s6487_s21  ;;  %v390_v27 = vmax.f32 %v336_v18, 0.0  ;;  %v5138_v29 = vpack.i.bf16 %v496_v24, %v494_v22  ;;  %v497_v30 = vrot.slane %v6637_v59, 1  ;;  %v575_v31 = vsel %vm562_vm2, %v573_v23, %v574_v25  ;;  %5072 = vmatprep.subr.msk.bf16.mxu0 %vm1785_vm4, %v6375_v19 }
  0x3b   : > { %v577_v32 = vsel %vm562_vm2, %v574_v25, %v576_v26  ;;  %v498_v33 = vrot.slane %v6642_v62, 1  ;;  %v578_v40 = vrot.slane %v6637_v59, 2  ;;  %v579_v41 = vrot.slane %v6642_v62, 2  ;;  %v4851_v26 = vld [vmem:[%s6584_s17 + $0x58] sm:$0xff]  }
  0x3c   : > { %v500_v34 = vrot.slane %v390_v27, 1  ;;  %v5148_v36 = vpack.i.bf16 %v577_v32, %v575_v31  ;;  %v581_v42 = vrot.slane %v390_v27, 2  ;;  %v6695_v49 = vmax.f32 %v337_v45, 0.0  ;;  %v4852_v27 = vld [vmem:[%s6584_s17 + $0x60] sm:$0xff]  }
  0x3d   : > { %5129 = vrot.lane.b32.xlu1 %v5128_v20, %s6484_s18  ;;  %v499_v37 = vsel %vm481_vm3, %v497_v30, %v498_v33  ;;  %v580_v43 = vsel %vm562_vm2, %v578_v40, %v579_v41  ;;  %v6697_v50 = vmax.f32 %v338_v46, 0.0  ;;  %v393_v51 = vmax.f32 %v339_v47, 0.0  ;;  %v345_v40 = vld [vmem:[#allocation2 + $0xa0] sm:$0x3] }
  0x3e   : > { %5124 = vrot.lane.b32.xlu0 %v5123_v21, %s6485_s19  ;;  %v501_v38 = vsel %vm481_vm3, %v498_v33, %v500_v34  ;;  %v582_v44 = vsel %vm562_vm2, %v579_v41, %v581_v42  ;;  %v502_v54 = vrot.slane %v6695_v49, 1  ;;  %v583_v61 = vrot.slane %v6695_v49, 2  ;;  %v4853_v41 = vld [vmem:[%s6584_s17 + $0x68] sm:$0xff]  }
  0x3f   : > { %v5158_v39 = vpack.i.bf16 %v501_v38, %v499_v37  ;;  %v5173_v48 = vpack.i.bf16 %v582_v44, %v580_v43  ;;  %v503_v56 = vrot.slane %v6697_v50, 1  ;;  %v505_v58 = vrot.slane %v393_v51, 1 }
  0x40   : > { %v5198_v60 = vpack.i.bf16 %v6697_v50, %v6695_v49  ;;  %v584_v1 = vrot.slane %v6697_v50, 2  ;;  %v586_v2 = vrot.slane %v393_v51, 2  ;;  %v6712_v8 = vmax.f32 %v340_v3, 0.0  ;;  %v348_v3 = vld [vmem:[#allocation2 + $0xb8] sm:$0x3] }
  0x41   : > { %5139 = vrot.lane.b32.xlu1 %v5138_v29, %s6488_s26  ;;  %v504_v63 = vsel %vm481_vm3, %v502_v54, %v503_v56  ;;  %v506_v0 = vsel %vm481_vm3, %v503_v56, %v505_v58  ;;  %v6718_v13 = vmax.f32 %v341_v4, 0.0  ;;  %v396_v14 = vmax.f32 %v342_v6, 0.0 }
  0x42   : > { %5134 = vrot.lane.b32.xlu0 %v5123_v21, %s6488_s26  ;;  %v5208_v7 = vpack.i.bf16 %v506_v0, %v504_v63  ;;  %v585_v9 = vsel %vm562_vm2, %v583_v61, %v584_v1  ;;  %v587_v10 = vsel %vm562_vm2, %v584_v1, %v586_v2  ;;  %v507_v16 = vrot.slane %v6712_v8, 1  ;;  %v346_v1 = vld [vmem:[#allocation2 + $0xa8] sm:$0xff]  ;;  %v347_v2 = vld [vmem:[#allocation2 + $0xb0] sm:$0xff] }
  0x43   : > { %v5218_v15 = vpack.i.bf16 %v587_v10, %v585_v9  ;;  %v508_v17 = vrot.slane %v6718_v13, 1  ;;  %v510_v18 = vrot.slane %v396_v14, 1  ;;  %v1787_v28 = vsel %vm1785_vm4, %v6375_v19, 0  ;;  %v4854_v19 = vld [vmem:[%s6584_s17 + $0x70] sm:$0xff]  }
  0x44   : > { %v589_v30 = vrot.slane %v6718_v13, 2  ;;  %v591_v31 = vrot.slane %v396_v14, 2  ;;  %4933 = vmatpush3.bf16.msra.mxu0 %v1787_v28  ;;  %v4823_v32 = vunpack.c.l.bf16 %v4851_v26  ;;  %v4824_v33 = vunpack.c.h.bf16 %v4851_v26 }
  0x45   : > { %5149 = vrot.lane.b32.xlu1 %v5148_v36, %s6489_s27  ;;  %v509_v21 = vsel %vm481_vm3, %v507_v16, %v508_v17  ;;  %v511_v22 = vsel %vm481_vm3, %v508_v17, %v510_v18  ;;  %v4827_v34 = vunpack.c.l.bf16 %v4852_v27  ;;  %v4828_v35 = vunpack.c.h.bf16 %v4852_v27 }
  0x46   : > { %5144 = vrot.lane.b32.xlu0 %v5128_v20, %s6489_s27  ;;  %v4850_v20 = vld [vmem:[%s6584_s17 + $0x50] sm:$0xff]   ;;  %v6738_v24 = vpack.i.bf16 %v511_v22, %v509_v21  ;;  %315 = vst.msk [vmem:[#allocation2 + $0x121] sm:$0xff] %vm172_vm0, %v4823_v32  ;;  %316 = vst.msk [vmem:[#allocation2 + $0x129] sm:$0xff] %vm172_vm0, %v4824_v33  ;;  %v592_v38 = vsel %vm562_vm2, %v589_v30, %v591_v31  ;;  %v4831_v42 = vunpack.c.l.bf16 %v4853_v41  ;;  %v4832_v43 = vunpack.c.h.bf16 %v4853_v41  ;;  %v350_v31 = vld [vmem:[#allocation2 + $0xc8] sm:$0xff] }
  0x47   : > { %v4819_v23 = vunpack.c.l.bf16 %v4850_v20  ;;  %v4820_v25 = vunpack.c.h.bf16 %v4850_v20  ;;  %317 = vst.msk [vmem:[#allocation2 + $0x139] sm:$0xff] %vm172_vm0, %v4827_v34  ;;  %318 = vst.msk [vmem:[#allocation2 + $0x141] sm:$0xff] %vm172_vm0, %v4828_v35  ;;  %v399_v47 = vmax.f32 %v345_v40, 0.0  ;;  %v6781_v6 = vmax.f32 %v346_v1, 0.0  ;;  %v351_v32 = vld [vmem:[#allocation2 + $0xd0] sm:$0x3] }
  0x48   : > { %319 = vst.msk [vmem:[#allocation2 + $0x151] sm:$0xff] %vm172_vm0, %v4831_v42  ;;  %320 = vst.msk [vmem:[#allocation2 + $0x159] sm:$0xff] %vm172_vm0, %v4832_v43  ;;  %v6787_v10 = vmax.f32 %v347_v2, 0.0  ;;  %v402_v14 = vmax.f32 %v348_v3, 0.0  ;;  %v4835_v22 = vunpack.c.l.bf16 %v4854_v19  ;;  %v4855_v33 = vld [vmem:[%s6584_s17 + $0x78] sm:$0xff]   ;;  %s4776_s17 = sshll.u32 %s8960_s13, 8 }
  0x49   : > { %5159 = vrot.lane.b32.xlu1 %v5158_v39, %s6490_s28  ;;  %313 = vst.msk [vmem:[#allocation2 + $0x109] sm:$0xff] %vm172_vm0, %v4819_v23  ;;  %314 = vst.msk [vmem:[#allocation2 + $0x111] sm:$0xff] %vm172_vm0, %v4820_v25  ;;  %v515_v54 = vrot.slane %v399_v47, 1  ;;  %v596_v0 = vrot.slane %v399_v47, 2  ;;  %v517_v16 = vrot.slane %v6781_v6, 1  ;;  %v4836_v23 = vunpack.c.h.bf16 %v4854_v19 }
  0x4a   : > { %5154 = vrot.lane.b32.xlu0 %v5138_v29, %s6490_s28  ;;  %v518_v17 = vrot.slane %v6787_v10, 1  ;;  %v520_v18 = vrot.slane %v402_v14, 1  ;;  %321 = vst.msk [vmem:[#allocation2 + $0x169] sm:$0xff] %vm172_vm0, %v4835_v22  ;;  %v598_v25 = vrot.slane %v6781_v6, 2  ;;  %v599_v26 = vrot.slane %v6787_v10, 2 }
  0x4b   : > { %322 = vst.msk [vmem:[#allocation2 + $0x171] sm:$0xff] %vm172_vm0, %v4836_v23  ;;  %v601_v27 = vrot.slane %v402_v14, 2  ;;  %v4839_v34 = vunpack.c.l.bf16 %v4855_v33  ;;  %v4840_v35 = vunpack.c.h.bf16 %v4855_v33 }
  0x4c   : > { %v519_v20 = vsel %vm481_vm3, %v517_v16, %v518_v17  ;;  %v521_v21 = vsel %vm481_vm3, %v518_v17, %v520_v18  ;;  %v600_v28 = vsel %vm562_vm2, %v598_v25, %v599_v26  ;;  %v356_v25 = vld [vmem:[#allocation2 + $0xf8] sm:$0xff] }
  0x4d   : > { %5169 = vrot.lane.b32.xlu1 %v5138_v29, %s6485_s19  ;;  %v588_v29 = vrot.slane %v6712_v8, 2  ;;  %323 = vst.msk [vmem:[#allocation2 + $0x181] sm:$0xff] %vm172_vm0, %v4839_v34  ;;  %324 = vst.msk [vmem:[#allocation2 + $0x189] sm:$0xff] %vm172_vm0, %v4840_v35 }
  0x4e   : > { %5164 = vrot.lane.b32.xlu0 %v5148_v36, %s6491_s29 }
  0x4f   : > { %v590_v37 = vsel %vm562_vm2, %v588_v29, %v589_v30  ;;  %v602_v29 = vsel %vm562_vm2, %v599_v26, %v601_v27  ;;  %v349_v30 = vld [vmem:[#allocation2 + $0xc0] sm:$0xff] }
  0x50   : > { %v5253_v44 = vpack.i.bf16 %v592_v38, %v590_v37  ;;  %v6814_v37 = vmax.f32 %v349_v30, 0.0  ;;  %v6816_v38 = vmax.f32 %v350_v31, 0.0  ;;  %v357_v27 = vld [vmem:[#allocation2 + $0x100] sm:$0x3] }
  0x51   : > { %5179 = vrot.lane.b32.xlu1 %v5158_v39, %s6485_s19  ;;  %v411_v33 = vmax.f32 %v357_v27, 0.0 }
  0x52   : > { %5174 = vrot.lane.b32.xlu0 %v5173_v48, %s6491_s29  ;;  %v522_v40 = vrot.slane %v6814_v37, 1  ;;  %v523_v41 = vrot.slane %v6816_v38, 1  ;;  %v5358_v43 = vpack.i.bf16 %v6816_v38, %v6814_v37 }
  0x54   : > { %v524_v47 = vsel %vm481_vm3, %v522_v40, %v523_v41 }
  0x55   : > { %5189 = vrot.lane.b32.xlu1 %v5173_v48, %s6484_s18 }
  0x56   : > { %5184 = vrot.lane.b32.xlu0 %v5148_v36, %s6484_s18  ;;  %v343_v36 = vld [vmem:[#allocation2 + $0x90] sm:$0xff] }
  0x57   : > { %v6761_v45 = vmax.f32 %v343_v36, 0.0  ;;  %v5333_v36 = vpack.i.bf16 %v602_v29, %v600_v28  ;;  %v6873_v29 = vmax.f32 %v356_v25, 0.0 }
  0x59   : > { %5199 = vrot.lane.b32.xlu1 %v5198_v60, %s6486_s20  ;;  %v593_v58 = vrot.slane %v6761_v45, 2 }
  0x5a   : > { %5194 = vrot.lane.b32.xlu0 %v6652_v5, %s6486_s20  ;;  %v6727_v5 = vpack.i.bf16 %v6718_v13, %v6712_v8 }
  0x5d   : > { %5209 = vrot.lane.b32.xlu1 %v5208_v7, %s6488_s26 }
  0x5e   : > { %5204 = vrot.lane.b32.xlu0 %v5158_v39, %s6488_s26  ;;  %v344_v39 = vld [vmem:[#allocation2 + $0x98] sm:$0xff] }
  0x5f   : > { %v6763_v46 = vmax.f32 %v344_v39, 0.0  ;;  %v405_v39 = vmax.f32 %v351_v32, 0.0 }
  0x61   : > { %5219 = vrot.lane.b32.xlu1 %v5218_v15, %s6489_s27  ;;  %v513_v51 = vrot.slane %v6763_v46, 1  ;;  %v5278_v56 = vpack.i.bf16 %v6763_v46, %v6761_v45  ;;  %v594_v63 = vrot.slane %v6763_v46, 2  ;;  %v525_v42 = vrot.slane %v405_v39, 1 }
  0x62   : > { %5214 = vrot.lane.b32.xlu0 %v5173_v48, %s6489_s27  ;;  %v512_v48 = vrot.slane %v6761_v45, 1 }
  0x63   : > { %v516_v61 = vsel %vm481_vm3, %v513_v51, %v515_v54  ;;  %v597_v9 = vsel %vm562_vm2, %v594_v63, %v596_v0  ;;  %v606_v54 = vrot.slane %v405_v39, 2  ;;  %v533_v39 = vrot.slane %v6873_v29, 1 }
  0x65   : > { %5229 = vrot.lane.b32.xlu1 %v6727_v5, %s6487_s21 }
  0x66   : > { %5224 = vrot.lane.b32.xlu0 %v5198_v60, %s6487_s21  ;;  %v514_v60 = vsel %vm481_vm3, %v512_v48, %v513_v51  ;;  %v526_v48 = vsel %vm481_vm3, %v523_v41, %v525_v42  ;;  %v604_v51 = vrot.slane %v6816_v38, 2  ;;  %v535_v41 = vrot.slane %v411_v33, 1 }
  0x67   : > { %v5288_v4 = vpack.i.bf16 %v516_v61, %v514_v60  ;;  %v354_v60 = vld [vmem:[#allocation2 + $0xe8] sm:$0x3]  ;;  %v5368_v61 = vpack.i.bf16 %v526_v48, %v524_v47 }
  0x68   : > { %v607_v1 = vsel %vm562_vm2, %v604_v51, %v606_v54  ;;  %v408_v3 = vmax.f32 %v354_v60, 0.0  ;;  %v358_v48 = vld [vmem:[#allocation2 + $0x108] sm:$0xff]  ;;  %v6896_v60 = vld [vmem:[#allocation2 + $0x118] sm:$0x3] }
  0x69   : > { %5239 = vrot.lane.b32.xlu1 %v6738_v24, %s6490_s28 }
  0x6a   : > { %5234 = vrot.lane.b32.xlu0 %v5208_v7, %s6490_s28  ;;  %v530_v14 = vrot.slane %v408_v3, 1  ;;  %v611_v23 = vrot.slane %v408_v3, 2 }
  0x6d   : > { %5249 = vrot.lane.b32.xlu1 %v5208_v7, %s6485_s19  ;;  %v595_v7 = vsel %vm562_vm2, %v593_v58, %v594_v63  ;;  %v353_v58 = vld [vmem:[#allocation2 + $0xe0] sm:$0xff] }
  0x6e   : > { %5244 = vrot.lane.b32.xlu0 %v5218_v15, %s6491_s29  ;;  %v6838_v2 = vmax.f32 %v353_v58, 0.0  ;;  %v359_v58 = vld [vmem:[#allocation2 + $0x110] sm:$0xff] }
  0x70   : > { %v609_v22 = vrot.slane %v6838_v2, 2 }
  0x71   : > { %5259 = vrot.lane.b32.xlu1 %v6738_v24, %s6485_s19 }
  0x72   : > { %5254 = vrot.lane.b32.xlu0 %v5253_v44, %s6491_s29  ;;  %v612_v32 = vsel %vm562_vm2, %v609_v22, %v611_v23  ;;  %v414_v23 = vmax.f32 %v6896_v60, 0.0 }
  0x75   : > { %5269 = vrot.lane.b32.xlu1 %v5253_v44, %s6484_s18 }
  0x76   : > { %5264 = vrot.lane.b32.xlu0 %v5218_v15, %s6484_s18  ;;  %v5298_v15 = vpack.i.bf16 %v597_v9, %v595_v7  ;;  %v528_v9 = vrot.slane %v6838_v2, 1 }
  0x78   : > { %v531_v19 = vsel %vm481_vm3, %v528_v9, %v530_v14 }
  0x79   : > { %5279 = vrot.lane.b32.xlu1 %v5278_v56, %s6486_s20 }
  0x7a   : > { %5274 = vrot.lane.b32.xlu0 %v6727_v5, %s6486_s20  ;;  %v5308_v5 = vpack.i.bf16 %v6787_v10, %v6781_v6 }
  0x7d   : > { %5289 = vrot.lane.b32.xlu1 %v5288_v4, %s6488_s26 }
  0x7e   : > { %5284 = vrot.lane.b32.xlu0 %v6738_v24, %s6488_s26  ;;  %v5318_v24 = vpack.i.bf16 %v521_v21, %v519_v20 }
  0x81   : > { %5299 = vrot.lane.b32.xlu1 %v5298_v15, %s6489_s27 }
  0x82   : > { %5294 = vrot.lane.b32.xlu0 %v5253_v44, %s6489_s27  ;;  %v603_v44 = vrot.slane %v6814_v37, 2 }
  0x84   : > { %v605_v0 = vsel %vm562_vm2, %v603_v44, %v604_v51  ;;  %v616_v44 = vrot.slane %v411_v33, 2 }
  0x85   : > { %5309 = vrot.lane.b32.xlu1 %v5308_v5, %s6487_s21 }
  0x86   : > { %5304 = vrot.lane.b32.xlu0 %v5278_v56, %s6487_s21  ;;  %v352_v56 = vld [vmem:[#allocation2 + $0xd8] sm:$0xff] }
  0x87   : > { %v6833_v63 = vmax.f32 %v352_v56, 0.0 }
  0x89   : > { %5319 = vrot.lane.b32.xlu1 %v5318_v24, %s6490_s28  ;;  %v527_v7 = vrot.slane %v6833_v63, 1  ;;  %v6852_v16 = vpack.i.bf16 %v6838_v2, %v6833_v63  ;;  %v608_v21 = vrot.slane %v6833_v63, 2 }
  0x8a   : > { %5314 = vrot.lane.b32.xlu0 %v5288_v4, %s6490_s28 }
  0x8b   : > { %v529_v18 = vsel %vm481_vm3, %v527_v7, %v528_v9  ;;  %v610_v31 = vsel %vm562_vm2, %v608_v21, %v609_v22  ;;  %v536_v7 = vsel %vm481_vm3, %v533_v39, %v535_v41  ;;  %v6910_v22 = vmax.f32 %v359_v58, 0.0 }
  0x8c   : > { %v6884_v35 = vpack.i.bf16 %v612_v32, %v610_v31 }
  0x8d   : > { %5329 = vrot.lane.b32.xlu1 %v5288_v4, %s6485_s19  ;;  %v6841_v4 = vpack.i.bf16 %v607_v1, %v605_v0 }
  0x8e   : > { %5324 = vrot.lane.b32.xlu0 %v5298_v15, %s6491_s29 }
  0x90   : > { %v5095_v17 = vpop.permute.xlu0 %5094 }
  0x91   : > { %5339 = vrot.lane.b32.xlu1 %v5318_v24, %s6485_s19  ;;  %v5097_v51 = vunpack.i.h.bf16 %v5095_v17  ;;  %v5096_v54 = vunpack.i.l.bf16 %v5095_v17  ;;  %v6906_v17 = vmax.f32 %v358_v48, 0.0 }
  0x92   : > { %5334 = vrot.lane.b32.xlu0 %v5333_v36, %s6491_s29 }
  0x93   : > { %v1437_v25 = vsel %vm172_vm0, %v6589_v11, %v5096_v54 }
  0x95   : > { %5349 = vrot.lane.b32.xlu1 %v5333_v36, %s6484_s18 }
  0x96   : > { %5344 = vrot.lane.b32.xlu0 %v5298_v15, %s6484_s18  ;;  %v6848_v15 = vpop.permute.xlu1 %5099 }
  0x99   : > { %5359 = vrot.lane.b32.xlu1 %v5358_v43, %s6486_s20 }
  0x9a   : > { %5354 = vrot.lane.b32.xlu0 %v5308_v5, %s6486_s20  ;;  %v6859_v5 = vpack.i.bf16 %v531_v19, %v529_v18  ;;  %v5102_v18 = vunpack.i.h.bf16 %v6848_v15  ;;  %v5101_v19 = vunpack.i.l.bf16 %v6848_v15 }
  0x9d   : > { %5369 = vrot.lane.b32.xlu1 %v5368_v61, %s6488_s26 }
  0x9e   : > { %5364 = vrot.lane.b32.xlu0 %v5318_v24, %s6488_s26  ;;  %v355_v24 = vld [vmem:[#allocation2 + $0xf0] sm:$0xff] }
  0x9f   : > { %v6871_v28 = vmax.f32 %v355_v24, 0.0  ;;  %v1438_v24 = vsel %vm172_vm0, %v6591_v12, %v5097_v51 }
  0xa1   : > { %5379 = vrot.lane.b32.xlu1 %v6841_v4, %s6489_s27  ;;  %v613_v42 = vrot.slane %v6871_v28, 2  ;;  %v6894_v56 = vpack.i.bf16 %v6873_v29, %v6871_v28 }
  0xa2   : > { %5374 = vrot.lane.b32.xlu0 %v5333_v36, %s6489_s27  ;;  %v532_v36 = vrot.slane %v6871_v28, 1 }
  0xa4   : > { %v534_v1 = vsel %vm481_vm3, %v532_v36, %v533_v39 }
  0xa5   : > { %5389 = vrot.lane.b32.xlu1 %v6852_v16, %s6487_s21  ;;  %v6925_v33 = vpack.i.bf16 %v536_v7, %v534_v1 }
  0xa6   : > { %5384 = vrot.lane.b32.xlu0 %v5358_v43, %s6487_s21  ;;  %v614_v43 = vrot.slane %v6873_v29, 2 }
  0xa7   : > { %v6862_v20 = vpop.permute.xlu1 %5109 }
  0xa8   : > { %v6866_v26 = vpop.permute.xlu0 %5104  ;;  %v615_v9 = vsel %vm562_vm2, %v613_v42, %v614_v43  ;;  %v617_v14 = vsel %vm562_vm2, %v614_v43, %v616_v44  ;;  %v540_v42 = vrot.slane %v414_v23, 1  ;;  %v5112_v48 = vunpack.i.h.bf16 %v6862_v20 }
  0xa9   : > { %5399 = vrot.lane.b32.xlu1 %v6859_v5, %s6490_s28  ;;  %v5107_v12 = vunpack.i.h.bf16 %v6866_v26  ;;  %v5106_v11 = vunpack.i.l.bf16 %v6866_v26  ;;  %v6929_v39 = vpack.i.bf16 %v617_v14, %v615_v9  ;;  %v5111_v51 = vunpack.i.l.bf16 %v6862_v20 }
  0xaa   : > { %5394 = vrot.lane.b32.xlu0 %v5368_v61, %s6490_s28 }
  0xab   : > { %v6875_v30 = vpop.permute.xlu1 %5119 }
  0xac   : > { %v6879_v34 = vpop.permute.xlu0 %5114 }
  0xad   : > { %5409 = vrot.lane.b32.xlu1 %v5368_v61, %s6485_s19 }
  0xae   : > { %5404 = vrot.lane.b32.xlu0 %v6841_v4, %s6491_s29 }
  0xaf   : > { %v5130_v40 = vpop.permute.xlu1 %5129 }
  0xb0   : > { %v5125_v47 = vpop.permute.xlu0 %5124  ;;  %v5132_v27 = vunpack.i.h.bf16 %v5130_v40  ;;  %v5131_v31 = vunpack.i.l.bf16 %v5130_v40  ;;  %v537_v40 = vrot.slane %v6906_v17, 1 }
  0xb1   : > { %5419 = vrot.lane.b32.xlu1 %v6859_v5, %s6485_s19  ;;  %v5127_v61 = vunpack.i.h.bf16 %v5125_v47  ;;  %v5126_v0 = vunpack.i.l.bf16 %v5125_v47 }
  0xb2   : > { %5414 = vrot.lane.b32.xlu0 %v6884_v35, %s6491_s29 }
  0xb3   : > { %v6901_v3 = vpop.permute.xlu1 %5139  ;;  %v1440_v32 = vsel %vm172_vm0, %v6635_v57, %v5127_v61  ;;  %v1439_v15 = vsel %vm172_vm0, %v6631_v55, %v5126_v0  ;;  %v1470_v57 = vsel %vm1469_vm5, %v1437_v25, %v5101_v19  ;;  %v1471_v55 = vsel %vm1469_vm5, %v1438_v24, %v5102_v18 }
  0xb4   : > { %v5135_v21 = vpop.permute.xlu0 %5134  ;;  %v1473_v43 = vsel %vm1469_vm5, %v1440_v32, %v5132_v27  ;;  %v1472_v26 = vsel %vm1469_vm5, %v1439_v15, %v5131_v31  ;;  %v1504_v61 = vsel %vm1502_vm6, %v1471_v55, %v5107_v12  ;;  %v1503_v0 = vsel %vm1502_vm6, %v1470_v57, %v5106_v11 }
  0xb5   : > { %5429 = vrot.lane.b32.xlu1 %v6884_v35, %s6484_s18  ;;  %v5137_v44 = vunpack.i.h.bf16 %v5135_v21  ;;  %v5136_v47 = vunpack.i.l.bf16 %v5135_v21  ;;  %v5142_v1 = vunpack.i.h.bf16 %v6901_v3  ;;  %v5141_v7 = vunpack.i.l.bf16 %v6901_v3 }
  0xb6   : > { %5424 = vrot.lane.b32.xlu0 %v6841_v4, %s6484_s18  ;;  %v538_v4 = vrot.slane %v6910_v22, 1  ;;  %v1505_v14 = vsel %vm1502_vm6, %v1472_v26, %v5111_v51  ;;  %v1506_v18 = vsel %vm1502_vm6, %v1473_v43, %v5112_v48  ;;  %v6957_v25 = vpack.i.bf16 %v6910_v22, %v6906_v17 }
  0xb7   : > { %v5150_v36 = vpop.permute.xlu1 %5149  ;;  %v1537_v24 = vsel %vm1535_vm7, %v1504_v61, %v5137_v44  ;;  %v5117_v15 = vunpack.i.h.bf16 %v6879_v34  ;;  %v5116_v12 = vunpack.i.l.bf16 %v6879_v34  ;;  %v1538_v11 = vsel %vm1535_vm7, %v1505_v14, %v5141_v7 }
  0xb8   : > { %v5145_v41 = vpop.permute.xlu0 %5144  ;;  %v5152_v19 = vunpack.i.h.bf16 %v5150_v36  ;;  %v5151_v20 = vunpack.i.l.bf16 %v5150_v36  ;;  %v1539_v36 = vsel %vm1535_vm7, %v1506_v18, %v5142_v1  ;;  %v539_v26 = vsel %vm481_vm3, %v537_v40, %v538_v4 }
  0xb9   : > { %5439 = vrot.lane.b32.xlu1 %v6894_v56, %s6486_s20  ;;  %v5147_v54 = vunpack.i.h.bf16 %v5145_v41  ;;  %v5146_v58 = vunpack.i.l.bf16 %v5145_v41  ;;  %v541_v44 = vsel %vm481_vm3, %v538_v4, %v540_v42  ;;  %v5122_v4 = vunpack.i.h.bf16 %v6875_v30 }
  0xba   : > { %5434 = vrot.lane.b32.xlu0 %v6852_v16, %s6486_s20  ;;  %v1536_v16 = vsel %vm1535_vm7, %v1503_v0, %v5136_v47  ;;  %v1571_v55 = vsel %vm1568_vm8, %v1538_v11, %v5151_v20  ;;  %v1572_v41 = vsel %vm1568_vm8, %v1539_v36, %v5152_v19  ;;  %v5121_v42 = vunpack.i.l.bf16 %v6875_v30  ;;  %v361_v30 = vld [vmem:[#allocation2 + $0x120] sm:$0xff] }
  0xbb   : > { %v5160_v9 = vpop.permute.xlu1 %5159  ;;  %v1569_v3 = vsel %vm1568_vm8, %v1536_v16, %v5146_v58  ;;  %v1570_v27 = vsel %vm1568_vm8, %v1537_v24, %v5147_v54  ;;  %v1605_v18 = vsel %vm1601_vm9, %v1572_v41, %v5122_v4  ;;  %v621_v11 = vrot.slane %v414_v23, 2 }
  0xbc   : > { %v5155_v21 = vpop.permute.xlu0 %5154  ;;  %v1602_v34 = vsel %vm1601_vm9, %v1569_v3, %v5116_v12  ;;  %v1603_v48 = vsel %vm1601_vm9, %v1570_v27, %v5117_v15  ;;  %v5162_v51 = vunpack.i.h.bf16 %v5160_v9  ;;  %v5161_v54 = vunpack.i.l.bf16 %v5160_v9  ;;  %v363_v27 = vld [vmem:[#allocation2 + $0x130] sm:$0x3] }
  0xbd   : > { %5449 = vrot.lane.b32.xlu1 %v6925_v33, %s6488_s26  ;;  %v5157_v31 = vunpack.i.h.bf16 %v5155_v21  ;;  %v5156_v32 = vunpack.i.l.bf16 %v5155_v21  ;;  %v6987_v9 = vpack.i.bf16 %v541_v44, %v539_v26  ;;  %v362_v21 = vld [vmem:[#allocation2 + $0x128] sm:$0xff]  ;;  %v618_v3 = vrot.slane %v6906_v17, 2 }
  0xbe   : > { %5444 = vrot.lane.b32.xlu0 %v6859_v5, %s6488_s26  ;;  %v1638_v16 = vsel %vm1634_vm10, %v1605_v18, %v5162_v51  ;;  %v619_v12 = vrot.slane %v6910_v22, 2  ;;  %v7010_v41 = vmax.f32 %v362_v21, 0.0  ;;  %v364_v51 = vld [vmem:[#allocation2 + $0x138] sm:$0xff] }
  0xbf   : > { %v6967_v57 = vpop.permute.xlu1 %5169  ;;  %v1635_v58 = vsel %vm1634_vm10, %v1602_v34, %v5156_v32  ;;  %v1636_v40 = vsel %vm1634_vm10, %v1603_v48, %v5157_v31 }
  0xc0   : > { %v5165_v43 = vpop.permute.xlu0 %5164  ;;  %v620_v60 = vsel %vm562_vm2, %v618_v3, %v619_v12  ;;  %v622_v23 = vsel %vm562_vm2, %v619_v12, %v621_v11  ;;  %v5172_v12 = vunpack.i.h.bf16 %v6967_v57  ;;  %v5171_v11 = vunpack.i.l.bf16 %v6967_v57 }
  0xc1   : > { %v5167_v5 = vunpack.i.h.bf16 %v5165_v43  ;;  %v5166_v47 = vunpack.i.l.bf16 %v5165_v43  ;;  %5459 = vrot.lane.b32.xlu1 %v6929_v39, %s6489_s27  ;;  %v417_v43 = vmax.f32 %v363_v27, 0.0  ;;  %v7029_v48 = vpack.i.bf16 %v622_v23, %v620_v60 }
  0xc2   : > { %5454 = vrot.lane.b32.xlu0 %v6884_v35, %s6489_s27  ;;  %v1604_v35 = vsel %vm1601_vm9, %v1571_v55, %v5121_v42 }
  0xc3   : > { %v6983_v61 = vpop.permute.xlu1 %5179  ;;  %v1668_v0 = vsel %vm1667_vm11, %v1635_v58, %v5166_v47  ;;  %v1669_v1 = vsel %vm1667_vm11, %v1636_v40, %v5167_v5  ;;  %v1637_v24 = vsel %vm1634_vm10, %v1604_v35, %v5161_v54  ;;  %v543_v47 = vrot.slane %v7010_v41, 1  ;;  %v365_v54 = vld [vmem:[#allocation2 + $0x140] sm:$0xff]  ;;  %v7031_v58 = vld [vmem:[#allocation2 + $0x148] sm:$0x3] }
  0xc4   : > { %v5175_v7 = vpop.permute.xlu0 %5174  ;;  %v1700_v14 = vpack.c.bf16 %v1669_v1, %v1668_v0  ;;  %v545_v34 = vrot.slane %v417_v43, 1  ;;  %v626_v1 = vrot.slane %v417_v43, 2  ;;  %v7045_v35 = vmax.f32 %v365_v54, 0.0 }
  0xc5   : > { %v5177_v19 = vunpack.i.h.bf16 %v5175_v7  ;;  %v5176_v20 = vunpack.i.l.bf16 %v5175_v7  ;;  %5469 = vrot.lane.b32.xlu1 %v6957_v25, %s6487_s21  ;;  %v420_v18 = vmax.f32 %v7031_v58, 0.0 }
  0xc6   : > { %5464 = vrot.lane.b32.xlu0 %v6894_v56, %s6487_s21  ;;  %4934 = vmatprep.mubr.msk.bf16.mxu0 %vm1736_vm12, %v1700_v14  ;;  %v7008_v56 = vmax.f32 %v361_v30, 0.0  ;;  %v546_v7 = vsel %vm481_vm3, %v543_v47, %v545_v34  ;;  %v7043_v14 = vmax.f32 %v364_v51, 0.0 }
  0xc7   : > { %v1670_v31 = vsel %vm1667_vm11, %v1637_v24, %v5176_v20  ;;  %v1671_v32 = vsel %vm1667_vm11, %v1638_v16, %v5177_v19  ;;  %v7001_v15 = vpop.permute.xlu1 %5189  ;;  %v5182_v19 = vunpack.i.h.bf16 %v6983_v61  ;;  %v5181_v20 = vunpack.i.l.bf16 %v6983_v61 }
  0xc8   : > { %v7006_v36 = vpop.permute.xlu0 %5184  ;;  %v1701_v55 = vpack.c.bf16 %v1671_v32, %v1670_v31  ;;  %v542_v5 = vrot.slane %v7008_v56, 1  ;;  %v623_v0 = vrot.slane %v7008_v56, 2  ;;  %v7056_v21 = vpack.i.bf16 %v7010_v41, %v7008_v56 }
  0xc9   : > { %5479 = vrot.lane.b32.xlu1 %v6987_v9, %s6490_s28  ;;  %v547_v31 = vrot.slane %v7043_v14, 1  ;;  %v548_v61 = vrot.slane %v7045_v35, 1  ;;  %v550_v32 = vrot.slane %v420_v18, 1  ;;  %v5191_v43 = vunpack.i.l.bf16 %v7001_v15 }
  0xca   : > { %5474 = vrot.lane.b32.xlu0 %v6925_v33, %s6490_s28  ;;  %4935 = vmatmul.mubr.msk.bf16.vlgmr.msra.gmra.mrb[0].mxu0 %vm1736_vm12, %v1701_v55  ;;  %v544_v42 = vsel %vm481_vm3, %v542_v5, %v543_v47  ;;  %v5192_v55 = vunpack.i.h.bf16 %v7001_v15  ;;  %v1444_v60 = vsel %vm172_vm0, %v6642_v62, %v5182_v19  ;;  %v1443_v23 = vsel %vm172_vm0, %v6637_v59, %v5181_v20 }
  0xcb   : > { %v7017_v26 = vpop.permute.xlu1 %5199  ;;  %v7058_v16 = vpack.i.bf16 %v546_v7, %v544_v42  ;;  %v5187_v5 = vunpack.i.h.bf16 %v7006_v36  ;;  %v5186_v47 = vunpack.i.l.bf16 %v7006_v36  ;;  %v549_v36 = vsel %vm481_vm3, %v547_v31, %v548_v61 }
  0xcc   : > { %v7021_v44 = vpop.permute.xlu0 %5194  ;;  %v5202_v57 = vunpack.i.h.bf16 %v7017_v26  ;;  %v5201_v51 = vunpack.i.l.bf16 %v7017_v26  ;;  %v551_v42 = vsel %vm481_vm3, %v548_v61, %v550_v32  ;;  %v1442_v26 = vsel %vm172_vm0, %v6629_v53, %v5172_v12 }
  0xcd   : > { %5489 = vrot.lane.b32.xlu1 %v6925_v33, %s6485_s19  ;;  %v624_v33 = vrot.slane %v7010_v41, 2  ;;  %v5197_v62 = vunpack.i.h.bf16 %v7021_v44  ;;  %v5196_v59 = vunpack.i.l.bf16 %v7021_v44  ;;  %v1475_v44 = vsel %vm1469_vm5, %v1442_v26, %v5187_v5 }
  0xce   : > { %5484 = vrot.lane.b32.xlu0 %v6929_v39, %s6491_s29 }
  0xcf   : > { %v7033_v40 = vpop.permute.xlu1 %5209  ;;  %v625_v3 = vsel %vm562_vm2, %v623_v0, %v624_v33  ;;  %v627_v27 = vsel %vm562_vm2, %v624_v33, %v626_v1  ;;  %v1441_v0 = vsel %vm172_vm0, %v6627_v52, %v5171_v11  ;;  %v1476_v33 = vsel %vm1469_vm5, %v1443_v23, %v5191_v43 }
  0xd0   : > { %v7035_v4 = vpop.permute.xlu0 %5204  ;;  %v7084_v54 = vpack.i.bf16 %v627_v27, %v625_v3  ;;  %v1477_v1 = vsel %vm1469_vm5, %v1444_v60, %v5192_v55  ;;  %v1474_v7 = vsel %vm1469_vm5, %v1441_v0, %v5186_v47  ;;  %v1509_v53 = vsel %vm1502_vm6, %v1476_v33, %v5201_v51 }
  0xd1   : > { %5499 = vrot.lane.b32.xlu1 %v6987_v9, %s6485_s19  ;;  %v5207_v19 = vunpack.i.h.bf16 %v7035_v4  ;;  %v5206_v20 = vunpack.i.l.bf16 %v7035_v4  ;;  %v1510_v52 = vsel %vm1502_vm6, %v1477_v1, %v5202_v57  ;;  %v1507_v32 = vsel %vm1502_vm6, %v1474_v7, %v5196_v59 }
  0xd2   : > { %5494 = vrot.lane.b32.xlu0 %v7029_v48, %s6491_s29  ;;  %v5212_v55 = vunpack.i.h.bf16 %v7033_v40  ;;  %v5211_v4 = vunpack.i.l.bf16 %v7033_v40 }
  0xd3   : > { %v7052_v30 = vpop.permute.xlu1 %5219 }
  0xd4   : > { %v5215_v24 = vpop.permute.xlu0 %5214  ;;  %v5222_v5 = vunpack.i.h.bf16 %v7052_v30  ;;  %v5221_v47 = vunpack.i.l.bf16 %v7052_v30 }
  0xd5   : > { %5509 = vrot.lane.b32.xlu1 %v7029_v48, %s6484_s18  ;;  %v5217_v27 = vunpack.i.h.bf16 %v5215_v24  ;;  %v5216_v31 = vunpack.i.l.bf16 %v5215_v24  ;;  %v1540_v24 = vsel %vm1535_vm7, %v1507_v32, %v5206_v20 }
  0xd6   : > { %5504 = vrot.lane.b32.xlu0 %v6929_v39, %s6484_s18  ;;  %v7088_v39 = vpack.i.bf16 %v7045_v35, %v7043_v14 }
  0xd7   : > { %v7080_v34 = vpop.permute.xlu1 %5229  ;;  %v1573_v51 = vsel %vm1568_vm8, %v1540_v24, %v5216_v31 }
  0xd8   : > { %v5225_v15 = vpop.permute.xlu0 %5224  ;;  %v5232_v40 = vunpack.i.h.bf16 %v7080_v34 }
  0xd9   : > { %5519 = vrot.lane.b32.xlu1 %v7056_v21, %s6486_s20  ;;  %v5227_v12 = vunpack.i.h.bf16 %v5225_v15  ;;  %v5226_v11 = vunpack.i.l.bf16 %v5225_v15 }
  0xda   : > { %5514 = vrot.lane.b32.xlu0 %v6957_v25, %s6486_s20  ;;  %v1508_v25 = vsel %vm1502_vm6, %v1475_v44, %v5197_v62  ;;  %v5231_v62 = vunpack.i.l.bf16 %v7080_v34  ;;  %v1542_v34 = vsel %vm1535_vm7, %v1509_v53, %v5211_v4  ;;  %v368_v4 = vld [vmem:[#allocation2 + $0x158] sm:$0xff] }
  0xdb   : > { %v5240_v3 = vpop.permute.xlu1 %5239  ;;  %v1541_v23 = vsel %vm1535_vm7, %v1508_v25, %v5207_v19  ;;  %v1543_v19 = vsel %vm1535_vm7, %v1510_v52, %v5212_v55  ;;  %v367_v55 = vld [vmem:[#allocation2 + $0x150] sm:$0xff] }
  0xdc   : > { %v5235_v61 = vpop.permute.xlu0 %5234  ;;  %v1574_v15 = vsel %vm1568_vm8, %v1541_v23, %v5217_v27  ;;  %v5242_v30 = vunpack.i.h.bf16 %v5240_v3  ;;  %v5241_v1 = vunpack.i.l.bf16 %v5240_v3  ;;  %v1576_v3 = vsel %vm1568_vm8, %v1543_v19, %v5222_v5  ;;  %v371_v19 = vld [vmem:[#allocation2 + $0x170] sm:$0xff] }
  0xdd   : > { %5529 = vrot.lane.b32.xlu1 %v7058_v16, %s6488_s26  ;;  %v5237_v43 = vunpack.i.h.bf16 %v5235_v61  ;;  %v5236_v60 = vunpack.i.l.bf16 %v5235_v61  ;;  %v1607_v26 = vsel %vm1601_vm9, %v1574_v15, %v5227_v12  ;;  %v1575_v61 = vsel %vm1568_vm8, %v1542_v34, %v5221_v47  ;;  %v370_v34 = vld [vmem:[#allocation2 + $0x168] sm:$0xff] }
  0xde   : > { %5524 = vrot.lane.b32.xlu0 %v6987_v9, %s6488_s26  ;;  %v1606_v9 = vsel %vm1601_vm9, %v1573_v51, %v5226_v11  ;;  %v7144_v12 = vpack.i.bf16 %v551_v42, %v549_v36  ;;  %v1609_v53 = vsel %vm1601_vm9, %v1576_v3, %v5232_v40  ;;  %v628_v36 = vrot.slane %v7043_v14, 2 }
  0xdf   : > { %v7122_v57 = vpop.permute.xlu1 %5249  ;;  %v1639_v44 = vsel %vm1634_vm10, %v1606_v9, %v5236_v60  ;;  %v1640_v7 = vsel %vm1634_vm10, %v1607_v26, %v5237_v43  ;;  %v369_v43 = vld [vmem:[#allocation2 + $0x160] sm:$0x3]  ;;  %v1642_v24 = vsel %vm1634_vm10, %v1609_v53, %v5242_v30  ;;  %v629_v47 = vrot.slane %v7045_v35, 2 }
  0xe0   : > { %v5245_v59 = vpop.permute.xlu0 %5244  ;;  %v631_v51 = vrot.slane %v420_v18, 2 }
  0xe1   : > { %v5247_v0 = vunpack.i.h.bf16 %v5245_v59  ;;  %v5246_v33 = vunpack.i.l.bf16 %v5245_v59  ;;  %5539 = vrot.lane.b32.xlu1 %v7084_v54, %s6489_s27  ;;  %v423_v59 = vmax.f32 %v369_v43, 0.0  ;;  %v630_v58 = vsel %vm562_vm2, %v628_v36, %v629_v47 }
  0xe2   : > { %5534 = vrot.lane.b32.xlu0 %v7029_v48, %s6489_s27  ;;  %v1608_v48 = vsel %vm1601_vm9, %v1575_v61, %v5231_v62  ;;  %v7165_v62 = vmax.f32 %v367_v55, 0.0  ;;  %v632_v18 = vsel %vm562_vm2, %v629_v47, %v631_v51 }
  0xe3   : > { %v1672_v20 = vsel %vm1667_vm11, %v1639_v44, %v5246_v33  ;;  %v1673_v27 = vsel %vm1667_vm11, %v1640_v7, %v5247_v0  ;;  %v7140_v31 = vpop.permute.xlu1 %5259  ;;  %v1641_v60 = vsel %vm1634_vm10, %v1608_v48, %v5241_v1  ;;  %v555_v30 = vrot.slane %v423_v59, 1 }
  0xe4   : > { %v5255_v32 = vpop.permute.xlu0 %5254  ;;  %v1702_v25 = vpack.c.bf16 %v1673_v27, %v1672_v20  ;;  %v552_v0 = vrot.slane %v7165_v62, 1  ;;  %v633_v1 = vrot.slane %v7165_v62, 2  ;;  %v636_v7 = vrot.slane %v423_v59, 2  ;;  %v372_v27 = vld [vmem:[#allocation2 + $0x178] sm:$0x3] }
  0xe5   : > { %v5257_v11 = vunpack.i.h.bf16 %v5255_v32  ;;  %v5256_v52 = vunpack.i.l.bf16 %v5255_v32  ;;  %5549 = vrot.lane.b32.xlu1 %v7088_v39, %s6487_s21  ;;  %v7188_v20 = vpack.i.bf16 %v632_v18, %v630_v58  ;;  %v7198_v48 = vmax.f32 %v371_v19, 0.0 }
  0xe6   : > { %5544 = vrot.lane.b32.xlu0 %v7056_v21, %s6487_s21  ;;  %4938 = vmatprep.mubr.msk.bf16.mxu0 %vm1736_vm12, %v1702_v25  ;;  %v7167_v21 = vmax.f32 %v368_v4, 0.0  ;;  %v7196_v25 = vmax.f32 %v370_v34, 0.0  ;;  %v5262_v4 = vunpack.i.h.bf16 %v7140_v31  ;;  %v5261_v43 = vunpack.i.l.bf16 %v7140_v31 }
  0xe7   : > { %v1675_v42 = vsel %vm1667_vm11, %v1642_v24, %v5257_v11  ;;  %v1674_v23 = vsel %vm1667_vm11, %v1641_v60, %v5256_v52  ;;  %v7158_v5 = vpop.permute.xlu1 %5269  ;;  %v426_v52 = vmax.f32 %v372_v27, 0.0  ;;  %v558_v51 = vrot.slane %v7198_v48, 1 }
  0xe8   : > { %v7163_v15 = vpop.permute.xlu0 %5264  ;;  %v1703_v40 = vpack.c.bf16 %v1675_v42, %v1674_v23  ;;  %v553_v33 = vrot.slane %v7167_v21, 1  ;;  %v634_v44 = vrot.slane %v7167_v21, 2  ;;  %v7208_v55 = vpack.i.bf16 %v7167_v21, %v7165_v62 }
  0xe9   : > { %5559 = vrot.lane.b32.xlu1 %v7144_v12, %s6490_s28  ;;  %v7220_v23 = vpack.i.bf16 %v7198_v48, %v7196_v25  ;;  %v557_v47 = vrot.slane %v7196_v25, 1  ;;  %v638_v31 = vrot.slane %v7196_v25, 2  ;;  %v5252_v59 = vunpack.i.h.bf16 %v7122_v57 }
  0xea   : > { %5554 = vrot.lane.b32.xlu0 %v7058_v16, %s6490_s28  ;;  %4939 = vmatmul.mubr.msk.bf16.gmra.mrb[4].mxu0 %vm1736_vm12, %v1703_v40  ;;  %v554_v32 = vsel %vm481_vm3, %v552_v0, %v553_v33  ;;  %v635_v53 = vsel %vm562_vm2, %v633_v1, %v634_v44  ;;  %v637_v11 = vsel %vm562_vm2, %v634_v44, %v636_v7  ;;  %v560_v40 = vrot.slane %v426_v52, 1 }
  0xeb   : > { %v7174_v9 = vpop.permute.xlu1 %5279  ;;  %v7216_v42 = vpack.i.bf16 %v637_v11, %v635_v53  ;;  %v5251_v58 = vunpack.i.l.bf16 %v7122_v57  ;;  %v5272_v18 = vunpack.i.h.bf16 %v7158_v5  ;;  %v5271_v0 = vunpack.i.l.bf16 %v7158_v5 }
  0xec   : > { %v7178_v26 = vpop.permute.xlu0 %5274  ;;  %v5267_v1 = vunpack.i.h.bf16 %v7163_v15  ;;  %v5266_v44 = vunpack.i.l.bf16 %v7163_v15  ;;  %v5282_v57 = vunpack.i.h.bf16 %v7174_v9  ;;  %v5281_v34 = vunpack.i.l.bf16 %v7174_v9 }
  0xed   : > { %5569 = vrot.lane.b32.xlu1 %v7058_v16, %s6485_s19  ;;  %v556_v16 = vsel %vm481_vm3, %v553_v33, %v555_v30  ;;  %v1448_v33 = vsel %vm172_vm0, %v6718_v13, %v5262_v4  ;;  %v1447_v30 = vsel %vm172_vm0, %v6712_v8, %v5261_v43  ;;  %v639_v19 = vrot.slane %v7198_v48, 2 }
  0xee   : > { %5564 = vrot.lane.b32.xlu0 %v7084_v54, %s6491_s29  ;;  %v7214_v24 = vpack.i.bf16 %v556_v16, %v554_v32  ;;  %v5277_v13 = vunpack.i.h.bf16 %v7178_v26  ;;  %v5276_v27 = vunpack.i.l.bf16 %v7178_v26  ;;  %v559_v8 = vsel %vm481_vm3, %v557_v47, %v558_v51 }
  0xef   : > { %v7190_v61 = vpop.permute.xlu1 %5289  ;;  %v561_v15 = vsel %vm481_vm3, %v558_v51, %v560_v40  ;;  %v1446_v32 = vsel %vm172_vm0, %v6697_v50, %v5252_v59  ;;  %v1445_v9 = vsel %vm172_vm0, %v6695_v49, %v5251_v58  ;;  %v1480_v16 = vsel %vm1469_vm5, %v1447_v30, %v5271_v0 }
  0xf0   : > { %v7192_v3 = vpop.permute.xlu0 %5284  ;;  %v1481_v53 = vsel %vm1469_vm5, %v1448_v33, %v5272_v18  ;;  %v1479_v26 = vsel %vm1469_vm5, %v1446_v32, %v5267_v1  ;;  %v1478_v11 = vsel %vm1469_vm5, %v1445_v9, %v5266_v44  ;;  %v1513_v50 = vsel %vm1502_vm6, %v1480_v16, %v5281_v34 }
  0xf1   : > { %5579 = vrot.lane.b32.xlu1 %v7144_v12, %s6485_s19  ;;  %v5286_v4 = vunpack.i.l.bf16 %v7192_v3  ;;  %v1514_v49 = vsel %vm1502_vm6, %v1481_v53, %v5282_v57  ;;  %v1511_v59 = vsel %vm1502_vm6, %v1478_v11, %v5276_v27  ;;  %v5292_v0 = vunpack.i.h.bf16 %v7190_v61 }
  0xf2   : > { %5574 = vrot.lane.b32.xlu0 %v7188_v20, %s6491_s29 }
  0xf3   : > { %v7212_v60 = vpop.permute.xlu1 %5299 }
  0xf4   : > { %v5295_v36 = vpop.permute.xlu0 %5294  ;;  %v5302_v44 = vunpack.i.h.bf16 %v7212_v60  ;;  %v5301_v57 = vunpack.i.l.bf16 %v7212_v60 }
  0xf5   : > { %5589 = vrot.lane.b32.xlu1 %v7188_v20, %s6484_s18  ;;  %v5297_v47 = vunpack.i.h.bf16 %v5295_v36  ;;  %v5296_v51 = vunpack.i.l.bf16 %v5295_v36  ;;  %v1544_v36 = vsel %vm1535_vm7, %v1511_v59, %v5286_v4  ;;  %v1547_v4 = vsel %vm1535_vm7, %v1514_v49, %v5292_v0  ;;  %v373_v59 = vld [vmem:[#allocation2 + $0x180] sm:$0xff] }
  0xf6   : > { %5584 = vrot.lane.b32.xlu0 %v7084_v54, %s6484_s18  ;;  %v7244_v54 = vrot.slane %v426_v52, 2  ;;  %v5287_v52 = vunpack.i.h.bf16 %v7192_v3  ;;  %v5291_v3 = vunpack.i.l.bf16 %v7190_v61 }
  0xf7   : > { %v7239_v7 = vpop.permute.xlu1 %5309 }
  0xf8   : > { %v5305_v5 = vpop.permute.xlu0 %5304  ;;  %v5312_v61 = vunpack.i.h.bf16 %v7239_v7  ;;  %v5311_v27 = vunpack.i.l.bf16 %v7239_v7  ;;  %v1546_v7 = vsel %vm1535_vm7, %v1513_v50, %v5291_v3 }
  0xf9   : > { %5599 = vrot.lane.b32.xlu1 %v7208_v55, %s6486_s20  ;;  %v5307_v58 = vunpack.i.h.bf16 %v5305_v5  ;;  %v5306_v18 = vunpack.i.l.bf16 %v5305_v5  ;;  %v1577_v5 = vsel %vm1568_vm8, %v1544_v36, %v5296_v51 }
  0xfa   : > { %5594 = vrot.lane.b32.xlu0 %v7088_v39, %s6486_s20  ;;  %v1512_v39 = vsel %vm1502_vm6, %v1479_v26, %v5277_v13 }
  0xfb   : > { %v5320_v43 = vpop.permute.xlu1 %5319  ;;  %v1545_v1 = vsel %vm1535_vm7, %v1512_v39, %v5287_v52  ;;  %v374_v39 = vld [vmem:[#allocation2 + $0x188] sm:$0xff] }
  0xfc   : > { %v5315_v40 = vpop.permute.xlu0 %5314  ;;  %v1578_v13 = vsel %vm1568_vm8, %v1545_v1, %v5297_v47  ;;  %v5322_v60 = vunpack.i.h.bf16 %v5320_v43  ;;  %v5321_v26 = vunpack.i.l.bf16 %v5320_v43  ;;  %v1579_v43 = vsel %vm1568_vm8, %v1546_v7, %v5301_v57 }
  0xfd   : > { %5609 = vrot.lane.b32.xlu1 %v7214_v24, %s6488_s26  ;;  %v5317_v33 = vunpack.i.h.bf16 %v5315_v40  ;;  %v5316_v30 = vunpack.i.l.bf16 %v5315_v40  ;;  %v1611_v9 = vsel %vm1601_vm9, %v1578_v13, %v5307_v58  ;;  %v1580_v58 = vsel %vm1568_vm8, %v1547_v4, %v5302_v44 }
  0xfe   : > { %5604 = vrot.lane.b32.xlu0 %v7144_v12, %s6488_s26  ;;  %v1610_v12 = vsel %vm1601_vm9, %v1577_v5, %v5306_v18  ;;  %v1612_v50 = vsel %vm1601_vm9, %v1579_v43, %v5311_v27  ;;  %v1613_v49 = vsel %vm1601_vm9, %v1580_v58, %v5312_v61 }
  0xff   : > { %v7278_v34 = vpop.permute.xlu1 %5329  ;;  %v1643_v11 = vsel %vm1634_vm10, %v1610_v12, %v5316_v30  ;;  %v1644_v52 = vsel %vm1634_vm10, %v1611_v9, %v5317_v33  ;;  %v7300_v30 = vpack.i.bf16 %v561_v15, %v559_v8  ;;  %v1645_v36 = vsel %vm1634_vm10, %v1612_v50, %v5321_v26  ;;  %v377_v12 = vld [vmem:[#allocation2 + $0x1a0] sm:$0xff]  ;;  %v378_v9 = vld [vmem:[#allocation2 + $0x1a8] sm:$0x3] }
 0x100   : > { %v5325_v32 = vpop.permute.xlu0 %5324  ;;  %v1646_v1 = vsel %vm1634_vm10, %v1613_v49, %v5322_v60  ;;  %v427_v8 = vmax.f32 %v373_v59, 0.0  ;;  %v428_v15 = vmax.f32 %v374_v39, 0.0  ;;  %v431_v7 = vmax.f32 %v377_v12, 0.0 }
 0x101   : > { %v5327_v16 = vunpack.i.h.bf16 %v5325_v32  ;;  %v5326_v53 = vunpack.i.l.bf16 %v5325_v32  ;;  %5619 = vrot.lane.b32.xlu1 %v7216_v42, %s6489_s27  ;;  %v376_v32 = vld [vmem:[#allocation2 + $0x198] sm:$0xff]  ;;  %v432_v4 = vmax.f32 %v378_v9, 0.0 }
 0x102   : > { %5614 = vrot.lane.b32.xlu0 %v7188_v20, %s6489_s27  ;;  %v375_v20 = vld [vmem:[#allocation2 + $0x190] sm:$0x3]  ;;  %v647_v60 = vrot.slane %v428_v15, 1  ;;  %v7356_v49 = vpack.i.bf16 %v428_v15, %v427_v8 }
 0x103   : > { %v1676_v47 = vsel %vm1667_vm11, %v1643_v11, %v5326_v53  ;;  %v1677_v51 = vsel %vm1667_vm11, %v1644_v52, %v5327_v16  ;;  %v7296_v40 = vpop.permute.xlu1 %5339  ;;  %v429_v13 = vmax.f32 %v375_v20, 0.0  ;;  %v642_v16 = vsel %vm562_vm2, %v639_v19, %v7244_v54 }
 0x104   : > { %v5335_v18 = vpop.permute.xlu0 %5334  ;;  %v1704_v33 = vpack.c.bf16 %v1677_v51, %v1676_v47  ;;  %v646_v53 = vrot.slane %v427_v8, 1  ;;  %v7333_v52 = vmax.f32 %v376_v32, 0.0  ;;  %v652_v51 = vrot.slane %v428_v15, 2 }
 0x105   : > { %v5337_v0 = vunpack.i.h.bf16 %v5335_v18  ;;  %v5336_v3 = vunpack.i.l.bf16 %v5335_v18  ;;  %5629 = vrot.lane.b32.xlu1 %v7220_v23, %s6487_s21  ;;  %v649_v11 = vrot.slane %v429_v13, 1  ;;  %v654_v59 = vrot.slane %v429_v13, 2 }
 0x106   : > { %5624 = vrot.lane.b32.xlu0 %v7208_v55, %s6487_s21  ;;  %4942 = vmatprep.mubr.msk.bf16.mxu0 %vm1736_vm12, %v1704_v33  ;;  %v640_v55 = vsel %vm562_vm2, %v638_v31, %v639_v19  ;;  %v651_v31 = vrot.slane %v427_v8, 2  ;;  %v648_v54 = vsel %vm481_vm3, %v646_v53, %v647_v60  ;;  %v659_v58 = vrot.slane %v7333_v52, 1 }
 0x107   : > { %v1679_v44 = vsel %vm1667_vm11, %v1646_v1, %v5337_v0  ;;  %v1678_v57 = vsel %vm1667_vm11, %v1645_v36, %v5336_v3  ;;  %v7313_v5 = vpop.permute.xlu1 %5349  ;;  %v7341_v19 = vpack.i.bf16 %v642_v16, %v640_v55  ;;  %v650_v43 = vsel %vm481_vm3, %v647_v60, %v649_v11 }
 0x108   : > { %v7315_v61 = vpop.permute.xlu0 %5344  ;;  %v1705_v27 = vpack.c.bf16 %v1679_v44, %v1678_v57  ;;  %v7348_v18 = vrot.slane %v431_v7, 1  ;;  %v662_v33 = vrot.slane %v432_v4, 1  ;;  %v653_v20 = vsel %vm562_vm2, %v651_v31, %v652_v51 }
 0x109   : > { %5639 = vrot.lane.b32.xlu1 %v7300_v30, %s6490_s28  ;;  %v655_v50 = vsel %vm562_vm2, %v652_v51, %v654_v59  ;;  %v7358_v0 = vpack.i.bf16 %v650_v43, %v648_v54  ;;  %v5342_v3 = vunpack.i.h.bf16 %v7296_v40  ;;  %v5341_v36 = vunpack.i.l.bf16 %v7296_v40 }
 0x10a   : > { %5634 = vrot.lane.b32.xlu0 %v7214_v24, %s6490_s28  ;;  %4943 = vmatmul.mubr.msk.bf16.gmra.mrb[8].mxu0 %vm1736_vm12, %v1705_v27  ;;  %v7366_v44 = vsel %vm481_vm3, %v659_v58, %v7348_v18  ;;  %v7370_v57 = vsel %vm481_vm3, %v7348_v18, %v662_v33  ;;  %v7372_v27 = vpack.i.bf16 %v655_v50, %v653_v20  ;;  %v5332_v15 = vunpack.i.h.bf16 %v7278_v34 }
 0x10b   : > { %v7331_v26 = vpop.permute.xlu1 %5359  ;;  %v7375_v8 = vpack.i.bf16 %v431_v7, %v7333_v52  ;;  %v5331_v40 = vunpack.i.l.bf16 %v7278_v34  ;;  %v5352_v32 = vunpack.i.h.bf16 %v7313_v5  ;;  %v5351_v12 = vunpack.i.l.bf16 %v7313_v5 }
 0x10c   : > { %v7335_v47 = vpop.permute.xlu0 %5354  ;;  %v5718_v9 = vpack.i.bf16 %v7370_v57, %v7366_v44  ;;  %v664_v55 = vrot.slane %v7333_v52, 2  ;;  %v1452_v16 = vsel %vm172_vm0, %v6787_v10, %v5342_v3  ;;  %v1451_v34 = vsel %vm172_vm0, %v6781_v6, %v5341_v36 }
 0x10d   : > { %5649 = vrot.lane.b32.xlu1 %v7214_v24, %s6485_s19  ;;  %v5347_v53 = vunpack.i.h.bf16 %v7315_v61  ;;  %v5346_v60 = vunpack.i.l.bf16 %v7315_v61  ;;  %v5362_v5 = vunpack.i.h.bf16 %v7331_v26  ;;  %v7398_v51 = vrot.slane %v431_v7, 2 }
 0x10e   : > { %5644 = vrot.lane.b32.xlu0 %v7216_v42, %s6491_s29  ;;  %v7400_v59 = vrot.slane %v432_v4, 2  ;;  %v1450_v10 = vsel %vm172_vm0, %v6763_v46, %v5332_v15  ;;  %v1449_v6 = vsel %vm172_vm0, %v6761_v45, %v5331_v40  ;;  %v5357_v54 = vunpack.i.h.bf16 %v7335_v47 }
 0x10f   : > { %v7344_v39 = vpop.permute.xlu1 %5369  ;;  %v5356_v61 = vunpack.i.l.bf16 %v7335_v47  ;;  %v1485_v7 = vsel %vm1469_vm5, %v1452_v16, %v5352_v32  ;;  %v1483_v46 = vsel %vm1469_vm5, %v1450_v10, %v5347_v53  ;;  %v1482_v45 = vsel %vm1469_vm5, %v1449_v6, %v5346_v60 }
 0x110   : > { %v5365_v24 = vpop.permute.xlu0 %5364  ;;  %v1518_v50 = vsel %vm1502_vm6, %v1485_v7, %v5362_v5  ;;  %v5371_v32 = vunpack.i.l.bf16 %v7344_v39  ;;  %v668_v52 = vsel %vm562_vm2, %v7398_v51, %v7400_v59 }
 0x111   : > { %5659 = vrot.lane.b32.xlu1 %v7300_v30, %s6485_s19  ;;  %v5367_v43 = vunpack.i.h.bf16 %v5365_v24  ;;  %v5366_v4 = vunpack.i.l.bf16 %v5365_v24  ;;  %v1515_v40 = vsel %vm1502_vm6, %v1482_v45, %v5356_v61  ;;  %v1516_v24 = vsel %vm1502_vm6, %v1483_v46, %v5357_v54 }
 0x112   : > { %5654 = vrot.lane.b32.xlu0 %v7341_v19, %s6491_s29 }
 0x113   : > { %v7362_v1 = vpop.permute.xlu1 %5379 }
 0x114   : > { %v5375_v13 = vpop.permute.xlu0 %5374  ;;  %v5382_v53 = vunpack.i.h.bf16 %v7362_v1  ;;  %v5381_v60 = vunpack.i.l.bf16 %v7362_v1  ;;  %v1998_v1 = vld [vmem:[%s8937_s2] sm:$0xf] }
 0x115   : > { %5669 = vrot.lane.b32.xlu1 %v7341_v19, %s6484_s18  ;;  %v5377_v58 = vunpack.i.h.bf16 %v5375_v13  ;;  %v5376_v33 = vunpack.i.l.bf16 %v5375_v13  ;;  %v1548_v13 = vsel %vm1535_vm7, %v1515_v40, %v5366_v4  ;;  %5073 = vmatprep.subr.msk.bf16.mxu1 %vm2047_vm13, %v1998_v1  ;;  %v2049_v46 = vsel %vm2047_vm13, %v1998_v1, 0 }
 0x116   : > { %5664 = vrot.lane.b32.xlu0 %v7216_v42, %s6484_s18  ;;  %v5361_v42 = vunpack.i.l.bf16 %v7331_v26  ;;  %v1484_v26 = vsel %vm1469_vm5, %v1451_v34, %v5351_v12  ;;  %v1549_v12 = vsel %vm1535_vm7, %v1516_v24, %v5367_v43  ;;  %4967 = vmatpush3.bf16.msra.mxu1 %v2049_v46  ;;  %v7459_v24 = vsel %vm562_vm2, %v664_v55, %v7398_v51 }
 0x117   : > { %v7394_v11 = vpop.permute.xlu1 %5389  ;;  %v1581_v5 = vsel %vm1568_vm8, %v1548_v13, %v5376_v33 }
 0x118   : > { %v5385_v31 = vpop.permute.xlu0 %5384  ;;  %v1517_v47 = vsel %vm1502_vm6, %v1484_v26, %v5361_v42  ;;  %v5391_v10 = vunpack.i.l.bf16 %v7394_v11 }
 0x119   : > { %5679 = vrot.lane.b32.xlu1 %v7356_v49, %s6486_s20  ;;  %v5387_v3 = vunpack.i.h.bf16 %v5385_v31  ;;  %v5386_v36 = vunpack.i.l.bf16 %v5385_v31  ;;  %v5392_v31 = vunpack.i.h.bf16 %v7394_v11  ;;  %v1550_v45 = vsel %vm1535_vm7, %v1517_v47, %v5371_v32 }
 0x11a   : > { %5674 = vrot.lane.b32.xlu0 %v7220_v23, %s6486_s20  ;;  %v5372_v23 = vunpack.i.h.bf16 %v7344_v39  ;;  %v1582_v39 = vsel %vm1568_vm8, %v1549_v12, %v5377_v58 }
 0x11b   : > { %v5400_v20 = vpop.permute.xlu1 %5399  ;;  %v1614_v6 = vsel %vm1601_vm9, %v1581_v5, %v5386_v36  ;;  %v1615_v54 = vsel %vm1601_vm9, %v1582_v39, %v5387_v3  ;;  %v1583_v36 = vsel %vm1568_vm8, %v1550_v45, %v5381_v60 }
 0x11c   : > { %v5395_v15 = vpop.permute.xlu0 %5394  ;;  %v5401_v43 = vunpack.i.l.bf16 %v5400_v20  ;;  %v1551_v58 = vsel %vm1535_vm7, %v1518_v50, %v5372_v23  ;;  %v1616_v47 = vsel %vm1601_vm9, %v1583_v36, %v5391_v10 }
 0x11d   : > { %5689 = vrot.lane.b32.xlu1 %v7358_v0, %s6488_s26  ;;  %v5397_v16 = vunpack.i.h.bf16 %v5395_v15  ;;  %v5396_v34 = vunpack.i.l.bf16 %v5395_v15  ;;  %v1584_v15 = vsel %vm1568_vm8, %v1551_v58, %v5382_v53 }
 0x11e   : > { %5684 = vrot.lane.b32.xlu0 %v7300_v30, %s6488_s26  ;;  %v5402_v30 = vunpack.i.h.bf16 %v5400_v20  ;;  %v1617_v50 = vsel %vm1601_vm9, %v1584_v15, %v5392_v31  ;;  %v1649_v13 = vsel %vm1634_vm10, %v1616_v47, %v5401_v43 }
 0x11f   : > { %v7432_v42 = vpop.permute.xlu1 %5409  ;;  %v1647_v4 = vsel %vm1634_vm10, %v1614_v6, %v5396_v34  ;;  %v1648_v11 = vsel %vm1634_vm10, %v1615_v54, %v5397_v16 }
 0x120   : > { %v5405_v61 = vpop.permute.xlu0 %5404  ;;  %v1650_v12 = vsel %vm1634_vm10, %v1617_v50, %v5402_v30  ;;  %v5412_v6 = vunpack.i.h.bf16 %v7432_v42  ;;  %v5411_v54 = vunpack.i.l.bf16 %v7432_v42 }
 0x121   : > { %v5407_v26 = vunpack.i.h.bf16 %v5405_v61  ;;  %v5406_v7 = vunpack.i.l.bf16 %v5405_v61  ;;  %5699 = vrot.lane.b32.xlu1 %v7372_v27, %s6489_s27 }
 0x122   : > { %5694 = vrot.lane.b32.xlu0 %v7341_v19, %s6489_s27  ;;  %v1454_v58 = vsel %vm172_vm0, %v6816_v38, %v5412_v6  ;;  %v1453_v42 = vsel %vm172_vm0, %v6814_v37, %v5411_v54 }
 0x123   : > { %v1680_v33 = vsel %vm1667_vm11, %v1647_v4, %v5406_v7  ;;  %v1681_v3 = vsel %vm1667_vm11, %v1648_v11, %v5407_v26  ;;  %v5420_v20 = vpop.permute.xlu1 %5419 }
 0x124   : > { %v5415_v40 = vpop.permute.xlu0 %5414  ;;  %v1706_v19 = vpack.c.bf16 %v1681_v3, %v1680_v33  ;;  %v5422_v57 = vunpack.i.h.bf16 %v5420_v20 }
 0x125   : > { %v5417_v23 = vunpack.i.h.bf16 %v5415_v40  ;;  %v5416_v32 = vunpack.i.l.bf16 %v5415_v40  ;;  %5709 = vrot.lane.b32.xlu1 %v7375_v8, %s6487_s21 }
 0x126   : > { %5704 = vrot.lane.b32.xlu0 %v7356_v49, %s6487_s21  ;;  %4946 = vmatprep.mubr.msk.bf16.mxu0 %vm1736_vm12, %v1706_v19  ;;  %v5728_v49 = vpack.i.bf16 %v668_v52, %v7459_v24 }
 0x127   : > { %v1683_v55 = vsel %vm1667_vm11, %v1650_v12, %v5417_v23  ;;  %v1682_v16 = vsel %vm1667_vm11, %v1649_v13, %v5416_v32  ;;  %v5430_v34 = vpop.permute.xlu1 %5429 }
 0x128   : > { %v5425_v53 = vpop.permute.xlu0 %5424  ;;  %v1707_v60 = vpack.c.bf16 %v1683_v55, %v1682_v16  ;;  %v5432_v61 = vunpack.i.h.bf16 %v5430_v34  ;;  %v5431_v30 = vunpack.i.l.bf16 %v5430_v34 }
 0x129   : > { %5719 = vrot.lane.b32.xlu1 %v5718_v9, %s6490_s28  ;;  %v5421_v9 = vunpack.i.l.bf16 %v5420_v20  ;;  %v5427_v7 = vunpack.i.h.bf16 %v5425_v53  ;;  %v5426_v1 = vunpack.i.l.bf16 %v5425_v53 }
 0x12a   : > { %5714 = vrot.lane.b32.xlu0 %v7358_v0, %s6490_s28  ;;  %4947 = vmatmul.mubr.msk.bf16.gmra.mrb[12].mxu0 %vm1736_vm12, %v1707_v60 }
 0x12b   : > { %v5440_v59 = vpop.permute.xlu1 %5439  ;;  %v1455_v26 = vsel %vm172_vm0, %v6833_v63, %v5421_v9  ;;  %v1487_v63 = vsel %vm1469_vm5, %v1454_v58, %v5427_v7  ;;  %v1486_v3 = vsel %vm1469_vm5, %v1453_v42, %v5426_v1 }
 0x12c   : > { %v5435_v5 = vpop.permute.xlu0 %5434  ;;  %v5442_v43 = vunpack.i.h.bf16 %v5440_v59  ;;  %v5441_v4 = vunpack.i.l.bf16 %v5440_v59  ;;  %v1488_v33 = vsel %vm1469_vm5, %v1455_v26, %v5431_v30 }
 0x12d   : > { %5729 = vrot.lane.b32.xlu1 %v5728_v49, %s6491_s29  ;;  %v5437_v46 = vunpack.i.h.bf16 %v5435_v5  ;;  %v5436_v45 = vunpack.i.l.bf16 %v5435_v5 }
 0x12e   : > { %5724 = vrot.lane.b32.xlu0 %v7372_v27, %s6491_s29  ;;  %v1456_v27 = vsel %vm172_vm0, %v6838_v2, %v5422_v57  ;;  %v1521_v40 = vsel %vm1502_vm6, %v1488_v33, %v5441_v4 }
 0x12f   : > { %v7486_v39 = vpop.permute.xlu1 %5449  ;;  %v1489_v2 = vsel %vm1469_vm5, %v1456_v27, %v5432_v61  ;;  %v1519_v37 = vsel %vm1502_vm6, %v1486_v3, %v5436_v45  ;;  %v1520_v23 = vsel %vm1502_vm6, %v1487_v63, %v5437_v46 }
 0x130   : > { %v5445_v31 = vpop.permute.xlu0 %5444  ;;  %v1522_v19 = vsel %vm1502_vm6, %v1489_v2, %v5442_v43  ;;  %v5452_v12 = vunpack.i.h.bf16 %v7486_v39  ;;  %v5451_v52 = vunpack.i.l.bf16 %v7486_v39 }
 0x131   : > { %5744 = vrot.lane.b32.xlu1 %v7375_v8, %s6487_s21  ;;  %v5447_v20 = vunpack.i.h.bf16 %v5445_v31  ;;  %v5446_v36 = vunpack.i.l.bf16 %v5445_v31 }
 0x132   : > { %v1554_v7 = vsel %vm1535_vm7, %v1521_v40, %v5451_v52  ;;  %v1555_v1 = vsel %vm1535_vm7, %v1522_v19, %v5452_v12 }
 0x133   : > { %v7490_v10 = vpop.permute.xlu1 %5459  ;;  %v1552_v34 = vsel %vm1535_vm7, %v1519_v37, %v5446_v36  ;;  %v1553_v53 = vsel %vm1535_vm7, %v1520_v23, %v5447_v20 }
 0x134   : > { %v5455_v0 = vpop.permute.xlu0 %5454  ;;  %v5462_v60 = vunpack.i.h.bf16 %v7490_v10  ;;  %v5461_v49 = vunpack.i.l.bf16 %v7490_v10 }
 0x135   : > { %v5457_v47 = vunpack.i.h.bf16 %v5455_v0  ;;  %v5456_v38 = vunpack.i.l.bf16 %v5455_v0 }
 0x136   : > { %v1588_v46 = vsel %vm1568_vm8, %v1555_v1, %v5462_v60 }
 0x137   : > { %v5470_v8 = vpop.permute.xlu1 %5469  ;;  %v1585_v5 = vsel %vm1568_vm8, %v1552_v34, %v5456_v38  ;;  %v1586_v31 = vsel %vm1568_vm8, %v1553_v53, %v5457_v47 }
 0x138   : > { %v5465_v11 = vpop.permute.xlu0 %5464  ;;  %v5472_v57 = vunpack.i.h.bf16 %v5470_v8  ;;  %v5471_v9 = vunpack.i.l.bf16 %v5470_v8 }
 0x139   : > { %v5467_v32 = vunpack.i.h.bf16 %v5465_v11  ;;  %v5466_v13 = vunpack.i.l.bf16 %v5465_v11  ;;  %v1587_v11 = vsel %vm1568_vm8, %v1554_v7, %v5461_v49 }
 0x13a   : > { %v1620_v42 = vsel %vm1601_vm9, %v1587_v11, %v5471_v9  ;;  %v1621_v33 = vsel %vm1601_vm9, %v1588_v46, %v5472_v57 }
 0x13b   : > { %v5480_v15 = vpop.permute.xlu1 %5479  ;;  %v1618_v39 = vsel %vm1601_vm9, %v1585_v5, %v5466_v13  ;;  %v1619_v6 = vsel %vm1601_vm9, %v1586_v31, %v5467_v32 }
 0x13c   : > { %v5475_v50 = vpop.permute.xlu0 %5474  ;;  %v5482_v30 = vunpack.i.h.bf16 %v5480_v15  ;;  %v5481_v27 = vunpack.i.l.bf16 %v5480_v15 }
 0x13d   : > { %v5477_v55 = vunpack.i.h.bf16 %v5475_v50  ;;  %v5476_v16 = vunpack.i.l.bf16 %v5475_v50 }
 0x13e   : > { %v1653_v3 = vsel %vm1634_vm10, %v1620_v42, %v5481_v27  ;;  %v1654_v20 = vsel %vm1634_vm10, %v1621_v33, %v5482_v30 }
 0x13f   : > { %v5490_v59 = vpop.permute.xlu1 %5489  ;;  %v1651_v26 = vsel %vm1634_vm10, %v1618_v39, %v5476_v16  ;;  %v1652_v10 = vsel %vm1634_vm10, %v1619_v6, %v5477_v55 }
 0x140   : > { %v5485_v0 = vpop.permute.xlu0 %5484  ;;  %v5492_v55 = vunpack.i.h.bf16 %v5490_v59  ;;  %v5491_v16 = vunpack.i.l.bf16 %v5490_v59 }
 0x141   : > { %v5487_v54 = vunpack.i.h.bf16 %v5485_v0  ;;  %v5486_v61 = vunpack.i.l.bf16 %v5485_v0 }
 0x142   : > { %v1457_v59 = vsel %vm172_vm0, %v6871_v28, %v5491_v16 }
 0x143   : > { %v1684_v43 = vsel %vm1667_vm11, %v1651_v26, %v5486_v61  ;;  %v1685_v8 = vsel %vm1667_vm11, %v1652_v10, %v5487_v54  ;;  %v5500_v4 = vpop.permute.xlu1 %5499  ;;  %v1458_v61 = vsel %vm172_vm0, %v6873_v29, %v5492_v55 }
 0x144   : > { %v5495_v45 = vpop.permute.xlu0 %5494  ;;  %v1708_v58 = vpack.c.bf16 %v1685_v8, %v1684_v43  ;;  %v5502_v32 = vunpack.i.h.bf16 %v5500_v4  ;;  %v5501_v13 = vunpack.i.l.bf16 %v5500_v4 }
 0x145   : > { %v5497_v2 = vunpack.i.h.bf16 %v5495_v45  ;;  %v5496_v63 = vunpack.i.l.bf16 %v5495_v45 }
 0x146   : > { %4950 = vmatprep.mubr.msk.bf16.mxu0 %vm1736_vm12, %v1708_v58  ;;  %v1460_v60 = vsel %vm172_vm0, %v6910_v22, %v5502_v32  ;;  %v1459_v49 = vsel %vm172_vm0, %v6906_v17, %v5501_v13 }
 0x147   : > { %v1687_v36 = vsel %vm1667_vm11, %v1654_v20, %v5497_v2  ;;  %v1686_v15 = vsel %vm1667_vm11, %v1653_v3, %v5496_v63  ;;  %v5510_v40 = vpop.permute.xlu1 %5509 }
 0x148   : > { %v5505_v19 = vpop.permute.xlu0 %5504  ;;  %v1709_v47 = vpack.c.bf16 %v1687_v36, %v1686_v15  ;;  %v5512_v34 = vunpack.i.h.bf16 %v5510_v40  ;;  %v5511_v53 = vunpack.i.l.bf16 %v5510_v40 }
 0x149   : > { %v5507_v5 = vunpack.i.h.bf16 %v5505_v19  ;;  %v5506_v31 = vunpack.i.l.bf16 %v5505_v19 }
 0x14a   : > { %4951 = vmatmul.mubr.msk.bf16.gmra.mrb[16].mxu0 %vm1736_vm12, %v1709_v47  ;;  %v1492_v30 = vsel %vm1469_vm5, %v1459_v49, %v5511_v53  ;;  %v1493_v22 = vsel %vm1469_vm5, %v1460_v60, %v5512_v34 }
 0x14b   : > { %v5520_v38 = vpop.permute.xlu1 %5519  ;;  %v1491_v17 = vsel %vm1469_vm5, %v1458_v61, %v5507_v5  ;;  %v1490_v27 = vsel %vm1469_vm5, %v1457_v59, %v5506_v31 }
 0x14c   : > { %v5515_v50 = vpop.permute.xlu0 %5514  ;;  %v5522_v9 = vunpack.i.h.bf16 %v5520_v38  ;;  %v5521_v0 = vunpack.i.l.bf16 %v5520_v38 }
 0x14d   : > { %v5517_v6 = vunpack.i.h.bf16 %v5515_v50  ;;  %v5516_v54 = vunpack.i.l.bf16 %v5515_v50 }
 0x14e   : > { %v1525_v1 = vsel %vm1502_vm6, %v1492_v30, %v5521_v0  ;;  %v1526_v43 = vsel %vm1502_vm6, %v1493_v22, %v5522_v9 }
 0x14f   : > { %v7536_v37 = vpop.permute.xlu1 %5529  ;;  %v1523_v28 = vsel %vm1502_vm6, %v1490_v27, %v5516_v54  ;;  %v1524_v11 = vsel %vm1502_vm6, %v1491_v17, %v5517_v6 }
 0x150   : > { %v5525_v23 = vpop.permute.xlu0 %5524  ;;  %v5532_v58 = vunpack.i.h.bf16 %v7536_v37  ;;  %v5531_v42 = vunpack.i.l.bf16 %v7536_v37 }
 0x151   : > { %v5527_v26 = vunpack.i.h.bf16 %v5525_v23  ;;  %v5526_v10 = vunpack.i.l.bf16 %v5525_v23 }
 0x152   : > { %v1558_v34 = vsel %vm1535_vm7, %v1525_v1, %v5531_v42  ;;  %v1559_v53 = vsel %vm1535_vm7, %v1526_v43, %v5532_v58 }
 0x153   : > { %v7538_v12 = vpop.permute.xlu1 %5539  ;;  %v1556_v63 = vsel %vm1535_vm7, %v1523_v28, %v5526_v10  ;;  %v1557_v3 = vsel %vm1535_vm7, %v1524_v11, %v5527_v26 }
 0x154   : > { %v5535_v52 = vpop.permute.xlu0 %5534  ;;  %v5542_v20 = vunpack.i.h.bf16 %v7538_v12  ;;  %v5541_v36 = vunpack.i.l.bf16 %v7538_v12 }
 0x155   : > { %v5537_v8 = vunpack.i.h.bf16 %v5535_v52  ;;  %v5536_v29 = vunpack.i.l.bf16 %v5535_v52 }
 0x156   : > { %v1591_v31 = vsel %vm1568_vm8, %v1558_v34, %v5541_v36 }
 0x157   : > { %v5550_v57 = vpop.permute.xlu1 %5549  ;;  %v1589_v40 = vsel %vm1568_vm8, %v1556_v63, %v5536_v29  ;;  %v1590_v19 = vsel %vm1568_vm8, %v1557_v3, %v5537_v8 }
 0x158   : > { %v5545_v39 = vpop.permute.xlu0 %5544  ;;  %v5552_v47 = vunpack.i.h.bf16 %v5550_v57  ;;  %v5551_v38 = vunpack.i.l.bf16 %v5550_v57  ;;  %v1592_v57 = vsel %vm1568_vm8, %v1559_v53, %v5542_v20 }
 0x159   : > { %v5547_v46 = vunpack.i.h.bf16 %v5545_v39  ;;  %v5546_v45 = vunpack.i.l.bf16 %v5545_v39 }
 0x15a   : > { %v1624_v39 = vsel %vm1601_vm9, %v1591_v31, %v5551_v38  ;;  %v1625_v6 = vsel %vm1601_vm9, %v1592_v57, %v5552_v47 }
 0x15b   : > { %v5560_v7 = vpop.permute.xlu1 %5559  ;;  %v1622_v37 = vsel %vm1601_vm9, %v1589_v40, %v5546_v45  ;;  %v1623_v23 = vsel %vm1601_vm9, %v1590_v19, %v5547_v46 }
 0x15c   : > { %v5555_v4 = vpop.permute.xlu0 %5554  ;;  %v5562_v52 = vunpack.i.h.bf16 %v5560_v7  ;;  %v5561_v55 = vunpack.i.l.bf16 %v5560_v7 }
 0x15d   : > { %v5557_v33 = vunpack.i.h.bf16 %v5555_v4  ;;  %v5556_v2 = vunpack.i.l.bf16 %v5555_v4 }
 0x15e   : > { %v1657_v59 = vsel %vm1634_vm10, %v1624_v39, %v5561_v55  ;;  %v1658_v30 = vsel %vm1634_vm10, %v1625_v6, %v5562_v52 }
 0x15f   : > { %v5570_v15 = vpop.permute.xlu1 %5569  ;;  %v1655_v16 = vsel %vm1634_vm10, %v1622_v37, %v5556_v2  ;;  %v1656_v12 = vsel %vm1634_vm10, %v1623_v23, %v5557_v33 }
 0x160   : > { %v5565_v50 = vpop.permute.xlu0 %5564  ;;  %v5572_v46 = vunpack.i.h.bf16 %v5570_v15  ;;  %v5571_v45 = vunpack.i.l.bf16 %v5570_v15 }
 0x161   : > { %v5567_v32 = vunpack.i.h.bf16 %v5565_v50  ;;  %v5566_v13 = vunpack.i.l.bf16 %v5565_v50 }
 0x162   : > { %v1462_v50 = vsel %vm172_vm0, %v7010_v41, %v5572_v46  ;;  %v1461_v15 = vsel %vm172_vm0, %v7008_v56, %v5571_v45 }
 0x163   : > { %v1688_v60 = vsel %vm1667_vm11, %v1655_v16, %v5566_v13  ;;  %v1689_v49 = vsel %vm1667_vm11, %v1656_v12, %v5567_v32  ;;  %v5580_v5 = vpop.permute.xlu1 %5579 }
 0x164   : > { %v5575_v9 = vpop.permute.xlu0 %5574  ;;  %v1710_v0 = vpack.c.bf16 %v1689_v49, %v1688_v60  ;;  %v5582_v29 = vunpack.i.h.bf16 %v5580_v5  ;;  %v5581_v4 = vunpack.i.l.bf16 %v5580_v5 }
 0x165   : > { %v5577_v54 = vunpack.i.h.bf16 %v5575_v9  ;;  %v5576_v61 = vunpack.i.l.bf16 %v5575_v9 }
 0x166   : > { %4954 = vmatprep.mubr.msk.bf16.mxu0 %vm1736_vm12, %v1710_v0  ;;  %v1464_v33 = vsel %vm172_vm0, %v7045_v35, %v5582_v29  ;;  %v1463_v2 = vsel %vm172_vm0, %v7043_v14, %v5581_v4 }
 0x167   : > { %v1691_v22 = vsel %vm1667_vm11, %v1658_v30, %v5577_v54  ;;  %v1690_v17 = vsel %vm1667_vm11, %v1657_v59, %v5576_v61  ;;  %v5590_v27 = vpop.permute.xlu1 %5589 }
 0x168   : > { %v5585_v26 = vpop.permute.xlu0 %5584  ;;  %v1711_v10 = vpack.c.bf16 %v1691_v22, %v1690_v17  ;;  %v5592_v58 = vunpack.i.h.bf16 %v5590_v27  ;;  %v5591_v42 = vunpack.i.l.bf16 %v5590_v27 }
 0x169   : > { %v5587_v63 = vunpack.i.h.bf16 %v5585_v26  ;;  %v5586_v3 = vunpack.i.l.bf16 %v5585_v26 }
 0x16a   : > { %4955 = vmatmul.mubr.msk.bf16.gmra.mrb[20].mxu0 %vm1736_vm12, %v1711_v10  ;;  %v1496_v37 = vsel %vm1469_vm5, %v1463_v2, %v5591_v42  ;;  %v1497_v35 = vsel %vm1469_vm5, %v1464_v33, %v5592_v58 }
 0x16b   : > { %v5600_v7 = vpop.permute.xlu1 %5599  ;;  %v1495_v14 = vsel %vm1469_vm5, %v1462_v50, %v5587_v63  ;;  %v1494_v23 = vsel %vm1469_vm5, %v1461_v15, %v5586_v3 }
 0x16c   : > { %v5595_v1 = vpop.permute.xlu0 %5594  ;;  %v5602_v36 = vunpack.i.h.bf16 %v5600_v7  ;;  %v5601_v40 = vunpack.i.l.bf16 %v5600_v7 }
 0x16d   : > { %v5597_v47 = vunpack.i.h.bf16 %v5595_v1  ;;  %v5596_v38 = vunpack.i.l.bf16 %v5595_v1 }
 0x16e   : > { %v1529_v55 = vsel %vm1502_vm6, %v1496_v37, %v5601_v40  ;;  %v1530_v16 = vsel %vm1502_vm6, %v1497_v35, %v5602_v36 }
 0x16f   : > { %v7582_v43 = vpop.permute.xlu1 %5609  ;;  %v1527_v56 = vsel %vm1502_vm6, %v1494_v23, %v5596_v38  ;;  %v1528_v53 = vsel %vm1502_vm6, %v1495_v14, %v5597_v47 }
 0x170   : > { %v5605_v8 = vpop.permute.xlu0 %5604  ;;  %v5612_v5 = vunpack.i.h.bf16 %v7582_v43  ;;  %v5611_v31 = vunpack.i.l.bf16 %v7582_v43 }
 0x171   : > { %v5607_v32 = vunpack.i.h.bf16 %v5605_v8  ;;  %v5606_v13 = vunpack.i.l.bf16 %v5605_v8 }
 0x173   : > { %v7584_v28 = vpop.permute.xlu1 %5619  ;;  %v1560_v0 = vsel %vm1535_vm7, %v1527_v56, %v5606_v13  ;;  %v1561_v39 = vsel %vm1535_vm7, %v1528_v53, %v5607_v32 }
 0x174   : > { %v5615_v11 = vpop.permute.xlu0 %5614  ;;  %v5622_v6 = vunpack.i.h.bf16 %v7584_v28  ;;  %v5621_v54 = vunpack.i.l.bf16 %v7584_v28  ;;  %v1562_v28 = vsel %vm1535_vm7, %v1529_v55, %v5611_v31 }
 0x175   : > { %v5617_v12 = vunpack.i.h.bf16 %v5615_v11  ;;  %v5616_v41 = vunpack.i.l.bf16 %v5615_v11  ;;  %v1563_v11 = vsel %vm1535_vm7, %v1530_v16, %v5612_v5 }
 0x176   : > { %v1595_v42 = vsel %vm1568_vm8, %v1562_v28, %v5621_v54  ;;  %v1596_v33 = vsel %vm1568_vm8, %v1563_v11, %v5622_v6 }
 0x177   : > { %v5630_v20 = vpop.permute.xlu1 %5629  ;;  %v1593_v59 = vsel %vm1568_vm8, %v1560_v0, %v5616_v41  ;;  %v1594_v30 = vsel %vm1568_vm8, %v1561_v39, %v5617_v12 }
 0x178   : > { %v5625_v19 = vpop.permute.xlu0 %5624  ;;  %v5632_v22 = vunpack.i.h.bf16 %v5630_v20  ;;  %v5631_v17 = vunpack.i.l.bf16 %v5630_v20 }
 0x179   : > { %v5627_v60 = vunpack.i.h.bf16 %v5625_v19  ;;  %v5626_v49 = vunpack.i.l.bf16 %v5625_v19 }
 0x17a   : > { %v1628_v3 = vsel %vm1601_vm9, %v1595_v42, %v5631_v17  ;;  %v1629_v20 = vsel %vm1601_vm9, %v1596_v33, %v5632_v22 }
 0x17b   : > { %v5640_v52 = vpop.permute.xlu1 %5639  ;;  %v1626_v26 = vsel %vm1601_vm9, %v1593_v59, %v5626_v49  ;;  %v1627_v10 = vsel %vm1601_vm9, %v1594_v30, %v5627_v60 }
 0x17c   : > { %v5635_v34 = vpop.permute.xlu0 %5634  ;;  %v5642_v43 = vunpack.i.h.bf16 %v5640_v52  ;;  %v5641_v8 = vunpack.i.l.bf16 %v5640_v52 }
 0x17d   : > { %v5637_v57 = vunpack.i.h.bf16 %v5635_v34  ;;  %v5636_v9 = vunpack.i.l.bf16 %v5635_v34 }
 0x17e   : > { %v1661_v19 = vsel %vm1634_vm10, %v1628_v3, %v5641_v8  ;;  %v1662_v47 = vsel %vm1634_vm10, %v1629_v20, %v5642_v43 }
 0x17f   : > { %v5650_v61 = vpop.permute.xlu1 %5649  ;;  %v1659_v29 = vsel %vm1634_vm10, %v1626_v26, %v5636_v9  ;;  %v1660_v4 = vsel %vm1634_vm10, %v1627_v10, %v5637_v57 }
 0x180   : > { %v5645_v27 = vpop.permute.xlu0 %5644  ;;  %v5652_v16 = vunpack.i.h.bf16 %v5650_v61  ;;  %v5651_v12 = vunpack.i.l.bf16 %v5650_v61 }
 0x181   : > { %v5647_v7 = vunpack.i.h.bf16 %v5645_v27  ;;  %v5646_v1 = vunpack.i.l.bf16 %v5645_v27 }
 0x182   : > { %v1466_v0 = vsel %vm172_vm0, %v7167_v21, %v5652_v16  ;;  %v1465_v39 = vsel %vm172_vm0, %v7165_v62, %v5651_v12 }
 0x183   : > { %v1692_v46 = vsel %vm1667_vm11, %v1659_v29, %v5646_v1  ;;  %v1693_v45 = vsel %vm1667_vm11, %v1660_v4, %v5647_v7  ;;  %v5660_v58 = vpop.permute.xlu1 %5659 }
 0x184   : > { %v5655_v2 = vpop.permute.xlu0 %5654  ;;  %v1712_v63 = vpack.c.bf16 %v1693_v45, %v1692_v46  ;;  %v5662_v32 = vunpack.i.h.bf16 %v5660_v58  ;;  %v5661_v13 = vunpack.i.l.bf16 %v5660_v58 }
 0x185   : > { %v5657_v36 = vunpack.i.h.bf16 %v5655_v2  ;;  %v5656_v40 = vunpack.i.l.bf16 %v5655_v2 }
 0x186   : > { %4958 = vmatprep.mubr.msk.bf16.mxu0 %vm1736_vm12, %v1712_v63  ;;  %v1468_v53 = vsel %vm172_vm0, %v7198_v48, %v5662_v32  ;;  %v1467_v60 = vsel %vm172_vm0, %v7196_v25, %v5661_v13 }
 0x187   : > { %v1695_v38 = vsel %vm1667_vm11, %v1662_v47, %v5657_v36  ;;  %v1694_v50 = vsel %vm1667_vm11, %v1661_v19, %v5656_v40  ;;  %v5670_v15 = vpop.permute.xlu1 %5669 }
 0x188   : > { %v5665_v37 = vpop.permute.xlu0 %5664  ;;  %v1713_v35 = vpack.c.bf16 %v1695_v38, %v1694_v50  ;;  %v5672_v41 = vunpack.i.h.bf16 %v5670_v15  ;;  %v5671_v34 = vunpack.i.l.bf16 %v5670_v15 }
 0x189   : > { %v5667_v56 = vunpack.i.h.bf16 %v5665_v37  ;;  %v5666_v49 = vunpack.i.l.bf16 %v5665_v37 }
 0x18a   : > { %4959 = vmatmul.mubr.msk.bf16.gmra.mrb[24].mxu0 %vm1736_vm12, %v1713_v35  ;;  %v1500_v54 = vsel %vm1469_vm5, %v1467_v60, %v5671_v34  ;;  %v1501_v61 = vsel %vm1469_vm5, %v1468_v53, %v5672_v41 }
 0x18b   : > { %v5680_v14 = vpop.permute.xlu1 %5679  ;;  %v1499_v48 = vsel %vm1469_vm5, %v1466_v0, %v5667_v56  ;;  %v1498_v25 = vsel %vm1469_vm5, %v1465_v39, %v5666_v49 }
 0x18c   : > { %v5675_v23 = vpop.permute.xlu0 %5674  ;;  %v5682_v31 = vunpack.i.h.bf16 %v5680_v14  ;;  %v5681_v57 = vunpack.i.l.bf16 %v5680_v14 }
 0x18d   : > { %v5676_v6 = vunpack.i.l.bf16 %v5675_v23  ;;  %v5677_v59 = vunpack.i.h.bf16 %v5675_v23 }
 0x18e   : > { %v1533_v26 = vsel %vm1502_vm6, %v1500_v54, %v5681_v57  ;;  %v1534_v21 = vsel %vm1502_vm6, %v1501_v61, %v5682_v31 }
 0x18f   : > { %v5690_v52 = vpop.permute.xlu1 %5689  ;;  %v1531_v1 = vsel %vm1502_vm6, %v1498_v25, %v5676_v6  ;;  %v1532_v4 = vsel %vm1502_vm6, %v1499_v48, %v5677_v59 }
 0x190   : > { %v5685_v55 = vpop.permute.xlu0 %5684  ;;  %v5692_v30 = vunpack.i.h.bf16 %v5690_v52  ;;  %v5691_v22 = vunpack.i.l.bf16 %v5690_v52 }
 0x191   : > { %v5686_v17 = vunpack.i.l.bf16 %v5685_v55  ;;  %v5687_v10 = vunpack.i.h.bf16 %v5685_v55 }
 0x192   : > { %v1566_v45 = vsel %vm1535_vm7, %v1533_v26, %v5691_v22  ;;  %v1567_v58 = vsel %vm1535_vm7, %v1534_v21, %v5692_v30 }
 0x193   : > { %v5700_v5 = vpop.permute.xlu1 %5699  ;;  %v1564_v42 = vsel %vm1535_vm7, %v1531_v1, %v5686_v17  ;;  %v1565_v63 = vsel %vm1535_vm7, %v1532_v4, %v5687_v10 }
 0x194   : > { %v5695_v9 = vpop.permute.xlu0 %5694  ;;  %v5701_v62 = vunpack.i.l.bf16 %v5700_v5  ;;  %v5702_v43 = vunpack.i.h.bf16 %v5700_v5 }
 0x195   : > { %v5697_v8 = vunpack.i.h.bf16 %v5695_v9  ;;  %v5696_v29 = vunpack.i.l.bf16 %v5695_v9 }
 0x196   : > { %v1599_v3 = vsel %vm1568_vm8, %v1566_v45, %v5701_v62  ;;  %v1600_v19 = vsel %vm1568_vm8, %v1567_v58, %v5702_v43 }
 0x197   : > { %v5710_v27 = vpop.permute.xlu1 %5709  ;;  %v1597_v47 = vsel %vm1568_vm8, %v1564_v42, %v5696_v29  ;;  %v1598_v38 = vsel %vm1568_vm8, %v1565_v63, %v5697_v8  ;;  %v2436_v63 = vld [vmem:[#allocation2] sm:$0xff] }
 0x198   : > { %v5705_v7 = vpop.permute.xlu0 %5704  ;;  %v5712_v28 = vunpack.i.h.bf16 %v5710_v27  ;;  %v5711_v11 = vunpack.i.l.bf16 %v5710_v27 }
 0x199   : > { %v5706_v46 = vunpack.i.l.bf16 %v5705_v7  ;;  %v5707_v33 = vunpack.i.h.bf16 %v5705_v7 }
 0x19a   : > { %v1632_v37 = vsel %vm1601_vm9, %v1599_v3, %v5711_v11  ;;  %v1633_v35 = vsel %vm1601_vm9, %v1600_v19, %v5712_v28  ;;  %v2437_v3 = vld [vmem:[#allocation2 + $0x8] sm:$0xff] }
 0x19b   : > { %v5720_v2 = vpop.permute.xlu1 %5719  ;;  %v1630_v14 = vsel %vm1601_vm9, %v1597_v47, %v5706_v46  ;;  %v1631_v13 = vsel %vm1601_vm9, %v1598_v38, %v5707_v33 }
 0x19c   : > { %v5722_v20 = vunpack.i.h.bf16 %v5720_v2  ;;  %v5721_v36 = vunpack.i.l.bf16 %v5720_v2  ;;  %v5715_v40 = vpop.permute.xlu0 %5714 }
 0x19d   : > { %v5716_v50 = vunpack.i.l.bf16 %v5715_v40  ;;  %v4936_v15 = vpop.f32.mrb[0].mxu0  ;;  %v5717_v23 = vunpack.i.h.bf16 %v5715_v40  ;;  %v7674_v40 = vmax.f32 %v2437_v3, 0.0 }
 0x19e   : > { %v1823_v32 = vpop.f32.mrb[1].mxu0  ;;  %v1665_v52 = vsel %vm1634_vm10, %v1632_v37, %v5721_v36  ;;  %v1666_v55 = vsel %vm1634_vm10, %v1633_v35, %v5722_v20  ;;  %v1952_v16 = vmax.f32 %v4936_v15, 0.0  ;;  %v2438_v20 = vld [vmem:[#allocation2 + $0x10] sm:$0x3]  ;;  %v7672_v36 = vmax.f32 %v2436_v63, 0.0  ;;  %v6380_v63 = vld [vmem:[#allocation2 + $0x38] sm:$0xff] }
 0x19f   : > { %v4937_v12 = vpop.f32.mrb[2].mxu0  ;;  %v5730_v41 = vpop.permute.xlu1 %5729  ;;  %v1663_v34 = vsel %vm1634_vm10, %v1630_v14, %v5716_v50  ;;  %v1950_v31 = vmax.f32 %v1823_v32, 0.0  ;;  %v1664_v39 = vsel %vm1634_vm10, %v1631_v13, %v5717_v23  ;;  %v2492_v19 = vmax.f32 %v2438_v20, 0.0  ;;  %v6381_v20 = vld [vmem:[#allocation2 + $0x18] sm:$0xff] }
 0x1a0   : > { %v1953_v56 = vmax.f32 %v4937_v12, 0.0  ;;  %v5732_v53 = vunpack.i.h.bf16 %v5730_v41  ;;  %v5731_v60 = vunpack.i.l.bf16 %v5730_v41  ;;  %v5725_v49 = vpop.permute.xlu0 %5724  ;;  %v1826_v5 = vpop.f32.mrb[3].mxu0  ;;  %v2592_v38 = vrot.slane %v7672_v36, 1 }
 0x1a1   : > { %v5727_v57 = vunpack.i.h.bf16 %v5725_v49  ;;  %v5726_v9 = vunpack.i.l.bf16 %v5725_v49  ;;  %v1951_v0 = vmax.f32 %v1826_v5, 0.0  ;;  %v2593_v50 = vrot.slane %v7674_v40, 1 }
 0x1a2   : > { %v1983_v6 = vpack.c.bf16 %v1953_v56, %v1952_v16  ;;  %v1698_v54 = vsel %vm1667_vm11, %v1665_v52, %v5731_v60  ;;  %v1699_v61 = vsel %vm1667_vm11, %v1666_v55, %v5732_v53  ;;  %v2595_v15 = vrot.slane %v2492_v19, 1 }
 0x1a3   : > { %v1696_v48 = vsel %vm1667_vm11, %v1663_v34, %v5726_v9  ;;  %v1697_v59 = vsel %vm1667_vm11, %v1664_v39, %v5727_v57  ;;  %v1982_v25 = vpack.c.bf16 %v1951_v0, %v1950_v31  ;;  %v1715_v30 = vpack.c.bf16 %v1699_v61, %v1698_v54 }
 0x1a4   : > { %v1714_v22 = vpack.c.bf16 %v1697_v59, %v1696_v48  ;;  %v2594_v14 = vsel %vm481_vm3, %v2592_v38, %v2593_v50  ;;  %v2596_v23 = vsel %vm481_vm3, %v2593_v50, %v2595_v15  ;;  %v2672_v41 = vrot.slane %v7672_v36, 2  ;;  %v6383_v50 = vld [vmem:[#allocation2 + $0x40] sm:$0x3] }
 0x1a5   : > { %4968 = vmatprep.mubr.msk.bf16.mxu1 %vm1469_vm5, %v1982_v25  ;;  %v5733_v16 = vpack.i.bf16 %v2596_v23, %v2594_v14  ;;  %v2673_v34 = vrot.slane %v7674_v40, 2  ;;  %v2675_v56 = vrot.slane %v2492_v19, 2  ;;  %v2266_v3 = vrot.slane %v6380_v63, 1 }
 0x1a6   : > { %4962 = vmatprep.mubr.msk.bf16.mxu0 %vm1736_vm12, %v1714_v22  ;;  %4969 = vmatmul.mubr.msk.bf16.vlgmr.msra.gmra.mrb[0].mxu1 %vm1469_vm5, %v1983_v6  ;;  %v2260_v19 = vrot.slane %v6381_v20, 1  ;;  %v2268_v15 = vrot.slane %v6383_v50, 1  ;;  %v6385_v20 = vld [vmem:[#allocation2 + $0x60] sm:$0xff] }
 0x1a7   : > { %4963 = vmatmul.mubr.msk.bf16.gmra.mrb[28].mxu0 %vm1736_vm12, %v1715_v30  ;;  %5734 = vrot.lane.b32.xlu0 %v5733_v16, %s6485_s19  ;;  %v2674_v49 = vsel %vm562_vm2, %v2672_v41, %v2673_v34  ;;  %v2676_v5 = vsel %vm562_vm2, %v2673_v34, %v2675_v56 }
 0x1a8   : > { %v5738_v31 = vpack.i.bf16 %v2676_v5, %v2674_v49 }
 0x1ab   : > { %5739 = vrot.lane.b32.xlu0 %v5738_v31, %s6484_s18 }
 0x1bd   : > { %v4940_v17 = vpop.f32.mrb[4].mxu0 }
 0x1be   : > { %v1839_v27 = vpop.f32.mrb[5].mxu0  ;;  %v1956_v21 = vmax.f32 %v4940_v17, 0.0 }
 0x1bf   : > { %v4941_v26 = vpop.f32.mrb[6].mxu0  ;;  %v1954_v7 = vmax.f32 %v1839_v27, 0.0 }
 0x1c0   : > { %v1957_v10 = vmax.f32 %v4941_v26, 0.0  ;;  %v1842_v62 = vpop.f32.mrb[7].mxu0 }
 0x1c1   : > { %v1955_v1 = vmax.f32 %v1842_v62, 0.0 }
 0x1c2   : > { %v1985_v43 = vpack.c.bf16 %v1957_v10, %v1956_v21 }
 0x1c3   : > { %v1984_v8 = vpack.c.bf16 %v1955_v1, %v1954_v7 }
 0x1c5   : > { %4972 = vmatprep.mubr.msk.bf16.mxu1 %vm1469_vm5, %v1984_v8 }
 0x1c6   : > { %4973 = vmatmul.mubr.msk.bf16.gmra.mrb[4].mxu1 %vm1469_vm5, %v1985_v43 }
 0x1dd   : > { %v4944_v29 = vpop.f32.mrb[8].mxu0 }
 0x1de   : > { %v1855_v4 = vpop.f32.mrb[9].mxu0  ;;  %v1960_v11 = vmax.f32 %v4944_v29, 0.0 }
 0x1df   : > { %v4945_v28 = vpop.f32.mrb[10].mxu0  ;;  %v1958_v58 = vmax.f32 %v1855_v4, 0.0 }
 0x1e0   : > { %v1961_v46 = vmax.f32 %v4945_v28, 0.0  ;;  %v1858_v45 = vpop.f32.mrb[11].mxu0 }
 0x1e1   : > { %v1959_v42 = vmax.f32 %v1858_v45, 0.0 }
 0x1e2   : > { %v1987_v33 = vpack.c.bf16 %v1961_v46, %v1960_v11 }
 0x1e3   : > { %v1986_v2 = vpack.c.bf16 %v1959_v42, %v1958_v58 }
 0x1e5   : > { %4976 = vmatprep.mubr.msk.bf16.mxu1 %vm1469_vm5, %v1986_v2 }
 0x1e6   : > { %4977 = vmatmul.mubr.msk.bf16.gmra.mrb[8].mxu1 %vm1469_vm5, %v1987_v33  ;;  %v6379_v33 = vld [vmem:[#allocation2 + $0x30] sm:$0xff] }
 0x1e7   : > { %v2265_v2 = vrot.slane %v6379_v33, 1 }
 0x1e9   : > { %v2267_v14 = vsel %vm481_vm3, %v2265_v2, %v2266_v3 }
 0x1fd   : > { %v4948_v47 = vpop.f32.mrb[12].mxu0 }
 0x1fe   : > { %v1871_v37 = vpop.f32.mrb[13].mxu0  ;;  %v1964_v32 = vmax.f32 %v4948_v47, 0.0  ;;  %v6382_v47 = vld [vmem:[#allocation2 + $0x20] sm:$0xff] }
 0x1ff   : > { %v4949_v35 = vpop.f32.mrb[14].mxu0  ;;  %v1962_v13 = vmax.f32 %v1871_v37, 0.0  ;;  %v2261_v38 = vrot.slane %v6382_v47, 1  ;;  %v6384_v37 = vld [vmem:[#allocation2 + $0x28] sm:$0x3] }
 0x200   : > { %v1965_v52 = vmax.f32 %v4949_v35, 0.0  ;;  %v1874_v55 = vpop.f32.mrb[15].mxu0  ;;  %v2263_v35 = vrot.slane %v6384_v37, 1  ;;  %v6386_v47 = vld [vmem:[#allocation2 + $0x68] sm:$0xff] }
 0x201   : > { %v1963_v12 = vmax.f32 %v1874_v55, 0.0  ;;  %v2262_v23 = vsel %vm481_vm3, %v2260_v19, %v2261_v38  ;;  %v2275_v19 = vrot.slane %v6385_v20, 1 }
 0x202   : > { %v1989_v53 = vpack.c.bf16 %v1965_v52, %v1964_v32 }
 0x203   : > { %v1988_v60 = vpack.c.bf16 %v1963_v12, %v1962_v13  ;;  %v2269_v13 = vsel %vm481_vm3, %v2266_v3, %v2268_v15  ;;  %v2264_v12 = vsel %vm481_vm3, %v2261_v38, %v2263_v35  ;;  %v2276_v38 = vrot.slane %v6386_v47, 1  ;;  %v6387_v15 = vld [vmem:[#allocation2 + $0x48] sm:$0xff]  ;;  %v6388_v35 = vld [vmem:[#allocation2 + $0x50] sm:$0xff]  ;;  %v6377_v47 = vld [vmem:[%s8936_s1 + $0x1c] sm:$0xff]  }
 0x204   : > { %v2270_v37 = vrot.slane %v6387_v15, 1 }
 0x205   : > { %4980 = vmatprep.mubr.msk.bf16.mxu1 %vm1469_vm5, %v1988_v60 }
 0x206   : > { %4981 = vmatmul.mubr.msk.bf16.gmra.mrb[12].mxu1 %vm1469_vm5, %v1989_v53 }
 0x21d   : > { %v4952_v57 = vpop.f32.mrb[16].mxu0 }
 0x21e   : > { %v1887_v9 = vpop.f32.mrb[17].mxu0  ;;  %v1968_v39 = vmax.f32 %v4952_v57, 0.0 }
 0x21f   : > { %v4953_v0 = vpop.f32.mrb[18].mxu0  ;;  %v1966_v61 = vmax.f32 %v1887_v9, 0.0 }
 0x220   : > { %v1969_v6 = vmax.f32 %v4953_v0, 0.0  ;;  %v1890_v54 = vpop.f32.mrb[19].mxu0 }
 0x221   : > { %v1967_v48 = vmax.f32 %v1890_v54, 0.0 }
 0x222   : > { %v1991_v59 = vpack.c.bf16 %v1969_v6, %v1968_v39 }
 0x223   : > { %v1990_v25 = vpack.c.bf16 %v1967_v48, %v1966_v61 }
 0x225   : > { %4984 = vmatprep.mubr.msk.bf16.mxu1 %vm1469_vm5, %v1990_v25 }
 0x226   : > { %4985 = vmatmul.mubr.msk.bf16.gmra.mrb[16].mxu1 %vm1469_vm5, %v1991_v59 }
 0x23d   : > { %v4956_v30 = vpop.f32.mrb[20].mxu0 }
 0x23e   : > { %v1903_v22 = vpop.f32.mrb[21].mxu0  ;;  %v1972_v27 = vmax.f32 %v4956_v30, 0.0 }
 0x23f   : > { %v4957_v17 = vpop.f32.mrb[22].mxu0  ;;  %v1970_v10 = vmax.f32 %v1903_v22, 0.0 }
 0x240   : > { %v1973_v26 = vmax.f32 %v4957_v17, 0.0  ;;  %v1906_v21 = vpop.f32.mrb[23].mxu0 }
 0x241   : > { %v1971_v62 = vmax.f32 %v1906_v21, 0.0 }
 0x242   : > { %v1993_v7 = vpack.c.bf16 %v1973_v26, %v1972_v27 }
 0x243   : > { %v1992_v1 = vpack.c.bf16 %v1971_v62, %v1970_v10 }
 0x245   : > { %4988 = vmatprep.mubr.msk.bf16.mxu1 %vm1469_vm5, %v1992_v1 }
 0x246   : > { %4989 = vmatmul.mubr.msk.bf16.gmra.mrb[20].mxu1 %vm1469_vm5, %v1993_v7 }
 0x25d   : > { %v4960_v43 = vpop.f32.mrb[24].mxu0 }
 0x25e   : > { %v1919_v8 = vpop.f32.mrb[25].mxu0  ;;  %v1976_v4 = vmax.f32 %v4960_v43, 0.0 }
 0x25f   : > { %v4961_v29 = vpop.f32.mrb[26].mxu0  ;;  %v1974_v46 = vmax.f32 %v1919_v8, 0.0 }
 0x260   : > { %v1977_v28 = vmax.f32 %v4961_v29, 0.0  ;;  %v1922_v11 = vpop.f32.mrb[27].mxu0 }
 0x261   : > { %v1975_v45 = vmax.f32 %v1922_v11, 0.0 }
 0x262   : > { %v1995_v58 = vpack.c.bf16 %v1977_v28, %v1976_v4 }
 0x263   : > { %v1994_v42 = vpack.c.bf16 %v1975_v45, %v1974_v46 }
 0x265   : > { %4992 = vmatprep.mubr.msk.bf16.mxu1 %vm1469_vm5, %v1994_v42 }
 0x266   : > { %4993 = vmatmul.mubr.msk.bf16.gmra.mrb[24].mxu1 %vm1469_vm5, %v1995_v58 }
 0x279   : > { %v4970_v32 = vpop.f32.mrb[0].mxu1 }
 0x27a   : > { %v2374_v52 = vadd.f32 %v4970_v32, %v2267_v14  ;;  %v4964_v55 = vpop.f32.mrb[28].mxu0  ;;  %v2085_v16 = vpop.f32.mrb[1].mxu1  ;;  %v2271_v14 = vrot.slane %v6388_v35, 1  ;;  %v6391_v35 = vld [vmem:[#allocation2 + $0x90] sm:$0xff] }
 0x27b   : > { %v2372_v41 = vadd.f32 %v2262_v23, %v2085_v16  ;;  %v1935_v34 = vpop.f32.mrb[29].mxu0  ;;  %v4971_v56 = vpop.f32.mrb[2].mxu1  ;;  %v1980_v5 = vmax.f32 %v4964_v55, 0.0  ;;  %v6389_v23 = vld [vmem:[#allocation2 + $0x70] sm:$0x3] }
 0x27c   : > { %2406 = vst.msk [vmem:[#allocation2 + $0x31] sm:$0xff] %vm172_vm0, %v2374_v52  ;;  %v2375_v53 = vadd.f32 %v4971_v56, %v2269_v13  ;;  %v4965_v60 = vpop.f32.mrb[30].mxu0  ;;  %v2088_v49 = vpop.f32.mrb[3].mxu1  ;;  %v1978_v0 = vmax.f32 %v1935_v34, 0.0  ;;  %v2278_v32 = vrot.slane %v6389_v23, 1  ;;  %v2277_v34 = vsel %vm481_vm3, %v2275_v19, %v2276_v38  ;;  %v6392_v23 = vld [vmem:[#allocation2 + $0x98] sm:$0xff] }
 0x27d   : > { %2404 = vst.msk [vmem:[#allocation2 + $0x19] sm:$0xff] %vm172_vm0, %v2372_v41  ;;  %v1981_v31 = vmax.f32 %v4965_v60, 0.0  ;;  %v2373_v57 = vadd.f32 %v2264_v12, %v2088_v49  ;;  %v1938_v9 = vpop.f32.mrb[31].mxu0  ;;  %v6390_v12 = vld [vmem:[#allocation2 + $0x58] sm:$0x3]  ;;  %v2272_v60 = vsel %vm481_vm3, %v2270_v37, %v2271_v14 }
 0x27e   : > { %2407 = vst.msk [vmem:[#allocation2 + $0x39] sm:$0xff] %vm172_vm0, %v2375_v53  ;;  %v1979_v39 = vmax.f32 %v1938_v9, 0.0  ;;  %v2273_v41 = vrot.slane %v6390_v12, 1 }
 0x27f   : > { %v1997_v6 = vpack.c.bf16 %v1981_v31, %v1980_v5  ;;  %2405 = vst.msk [vmem:[#allocation2 + $0x21] sm:$0xff] %vm172_vm0, %v2373_v57  ;;  %v2279_v5 = vsel %vm481_vm3, %v2276_v38, %v2278_v32  ;;  %v2286_v32 = vrot.slane %v6392_v23, 1 }
 0x280   : > { %v1996_v54 = vpack.c.bf16 %v1979_v39, %v1978_v0  ;;  %v2274_v39 = vsel %vm481_vm3, %v2271_v14, %v2273_v41  ;;  %v2285_v14 = vrot.slane %v6391_v35, 1  ;;  %v6395_v41 = vld [vmem:[#allocation2 + $0xa0] sm:$0x3] }
 0x282   : > { %4996 = vmatprep.mubr.msk.bf16.mxu1 %vm1469_vm5, %v1996_v54 }
 0x283   : > { %4997 = vmatmul.mubr.msk.bf16.gmra.mrb[28].mxu1 %vm1469_vm5, %v1997_v6  ;;  %v2442_v61 = vld [vmem:[#allocation2 + $0x30] sm:$0xff] }
 0x284   : > { %v7704_v48 = vmax.f32 %v2442_v61, 0.0  ;;  %v2439_v26 = vld [vmem:[#allocation2 + $0x18] sm:$0xff] }
 0x285   : > { %v2443_v59 = vld [vmem:[#allocation2 + $0x38] sm:$0xff]  ;;  %v2444_v25 = vld [vmem:[#allocation2 + $0x40] sm:$0x3]  ;;  %v7719_v4 = vmax.f32 %v2439_v26, 0.0 }
 0x286   : > { %v7706_v30 = vmax.f32 %v2443_v59, 0.0  ;;  %v2498_v22 = vmax.f32 %v2444_v25, 0.0  ;;  %v2440_v17 = vld [vmem:[#allocation2 + $0x20] sm:$0xff]  ;;  %v2602_v27 = vrot.slane %v7704_v48, 1  ;;  %v2441_v28 = vld [vmem:[#allocation2 + $0x28] sm:$0x3] }
 0x287   : > { %v7709_v21 = vmax.f32 %v2440_v17, 0.0  ;;  %v2682_v46 = vrot.slane %v7704_v48, 2  ;;  %v2495_v33 = vmax.f32 %v2441_v28, 0.0  ;;  %v2597_v50 = vrot.slane %v7719_v4, 1 }
 0x288   : > { %v5753_v10 = vpack.i.bf16 %v7706_v30, %v7704_v48  ;;  %v2603_v62 = vrot.slane %v7706_v30, 1  ;;  %v2605_v7 = vrot.slane %v2498_v22, 1  ;;  %v2683_v1 = vrot.slane %v7706_v30, 2 }
 0x289   : > { %v2685_v43 = vrot.slane %v2498_v22, 2  ;;  %v5758_v45 = vpack.i.bf16 %v7709_v21, %v7719_v4  ;;  %v2598_v63 = vrot.slane %v7709_v21, 1  ;;  %v2600_v3 = vrot.slane %v2495_v33, 1 }
 0x28a   : > { %5754 = vrot.lane.b32.xlu0 %v5753_v10, %s6487_s21  ;;  %5749 = vrot.lane.b32.xlu1 %v5753_v10, %s6486_s20  ;;  %v2604_v8 = vsel %vm481_vm3, %v2602_v27, %v2603_v62  ;;  %v2606_v29 = vsel %vm481_vm3, %v2603_v62, %v2605_v7  ;;  %v2684_v58 = vsel %vm562_vm2, %v2682_v46, %v2683_v1  ;;  %v2678_v55 = vrot.slane %v7709_v21, 2 }
 0x28b   : > { %v5763_v11 = vpack.i.bf16 %v2606_v29, %v2604_v8  ;;  %v2686_v42 = vsel %vm562_vm2, %v2683_v1, %v2685_v43  ;;  %v2599_v13 = vsel %vm481_vm3, %v2597_v50, %v2598_v63  ;;  %v2601_v52 = vsel %vm481_vm3, %v2598_v63, %v2600_v3 }
 0x28c   : > { %v5768_v2 = vpack.i.bf16 %v2686_v42, %v2684_v58  ;;  %v2680_v16 = vrot.slane %v2495_v33, 2  ;;  %v2677_v56 = vrot.slane %v7719_v4, 2  ;;  %v5793_v53 = vpack.i.bf16 %v2601_v52, %v2599_v13  ;;  %v6393_v13 = vld [vmem:[#allocation2 + $0x78] sm:$0xff] }
 0x28d   : > { %v2280_v52 = vrot.slane %v6393_v13, 1 }
 0x28e   : > { %5764 = vrot.lane.b32.xlu1 %v5763_v11, %s6488_s26  ;;  %5759 = vrot.lane.b32.xlu0 %v5758_v45, %s6486_s20  ;;  %v2679_v31 = vsel %vm562_vm2, %v2677_v56, %v2678_v55  ;;  %v2681_v57 = vsel %vm562_vm2, %v2678_v55, %v2680_v16  ;;  %v6376_v45 = vld [vmem:[%s8936_s1 + $0x14] sm:$0xff]   ;;  %v6394_v55 = vld [vmem:[#allocation2 + $0x80] sm:$0xff] }
 0x28f   : > { %v5798_v25 = vpack.i.bf16 %v2681_v57, %v2679_v31  ;;  %5000 = vmatprep.subr.bf16.mxu1 %v6376_v45  ;;  %v2281_v16 = vrot.slane %v6394_v55, 1  ;;  %v6396_v31 = vld [vmem:[#allocation2 + $0x88] sm:$0x3] }
 0x290   : > { %5001 = vmatpush3.bf16.msra.mxu1 %v6376_v45  ;;  %v2283_v57 = vrot.slane %v6396_v31, 1  ;;  %v6398_v31 = vld [vmem:[#allocation2 + $0xc8] sm:$0xff] }
 0x291   : > { %5002 = vmatprep.subr.bf16.mxu1 %v6377_v47 }
 0x292   : > { %5769 = vrot.lane.b32.xlu1 %v5768_v2, %s6489_s27  ;;  %5774 = vrot.lane.b32.xlu0 %v5763_v11, %s6490_s28 }
 0x294   : > { %5003 = vmatpush3.bf16.msra.mxu1 %v6377_v47 }
 0x296   : > { %5784 = vrot.lane.b32.xlu1 %v5763_v11, %s6485_s19  ;;  %5779 = vrot.lane.b32.xlu0 %v5768_v2, %s6491_s29 }
 0x299   : > { %v4974_v49 = vpop.f32.mrb[4].mxu1 }
 0x29a   : > { %v2378_v9 = vadd.f32 %v4974_v49, %v2277_v34  ;;  %5789 = vrot.lane.b32.xlu0 %v5768_v2, %s6484_s18  ;;  %5794 = vrot.lane.b32.xlu1 %v5793_v53, %s6485_s19  ;;  %v2101_v0 = vpop.f32.mrb[5].mxu1  ;;  %v2288_v34 = vrot.slane %v6395_v41, 1 }
 0x29b   : > { %v2376_v6 = vadd.f32 %v2272_v60, %v2101_v0  ;;  %v4975_v54 = vpop.f32.mrb[6].mxu1 }
 0x29c   : > { %2410 = vst.msk [vmem:[#allocation2 + $0x61] sm:$0xff] %vm172_vm0, %v2378_v9  ;;  %v2379_v61 = vadd.f32 %v4975_v54, %v2279_v5  ;;  %v2104_v59 = vpop.f32.mrb[7].mxu1  ;;  %v6378_v5 = vld [vmem:[%s8936_s1 + $0x24] ss:$0 sps:$4 sm:$0x33]   ;;  %v2287_v9 = vsel %vm481_vm3, %v2285_v14, %v2286_v32  ;;  %v2282_v54 = vsel %vm481_vm3, %v2280_v52, %v2281_v16 }
 0x29d   : > { %2408 = vst.msk [vmem:[#allocation2 + $0x49] sm:$0xff] %vm172_vm0, %v2376_v6  ;;  %v2377_v22 = vadd.f32 %v2274_v39, %v2104_v59  ;;  %5074 = vmatprep.subr.msk.bf16.mxu1 %vm1785_vm4, %v6378_v5  ;;  %v3888_v6 = vsel %vm1785_vm4, %v6378_v5, 0 }
 0x29e   : > { %2411 = vst.msk [vmem:[#allocation2 + $0x69] sm:$0xff] %vm172_vm0, %v2379_v61  ;;  %5804 = vrot.lane.b32.xlu0 %v5793_v53, %s6488_s26  ;;  %5799 = vrot.lane.b32.xlu1 %v5798_v25, %s6484_s18  ;;  %v2289_v61 = vsel %vm481_vm3, %v2286_v32, %v2288_v34 }
 0x29f   : > { %2409 = vst.msk [vmem:[#allocation2 + $0x51] sm:$0xff] %vm172_vm0, %v2377_v22  ;;  %5005 = vmatpush3.bf16.msra.mxu1 %v3888_v6  ;;  %v6400_v6 = vld [vmem:[#allocation2 + $0xb0] sm:$0xff] }
 0x2a2   : > { %5809 = vrot.lane.b32.xlu0 %v5798_v25, %s6489_s27 }
 0x2a3   : > { %v2448_v17 = vld [vmem:[#allocation2 + $0x60] sm:$0xff] }
 0x2a4   : > { %v7753_v10 = vmax.f32 %v2448_v17, 0.0  ;;  %v2445_v43 = vld [vmem:[#allocation2 + $0x48] sm:$0xff] }
 0x2a5   : > { %v2449_v27 = vld [vmem:[#allocation2 + $0x68] sm:$0xff]  ;;  %v2450_v26 = vld [vmem:[#allocation2 + $0x70] sm:$0x3]  ;;  %v7764_v46 = vmax.f32 %v2445_v43, 0.0 }
 0x2a6   : > { %v7755_v62 = vmax.f32 %v2449_v27, 0.0  ;;  %v2446_v7 = vld [vmem:[#allocation2 + $0x50] sm:$0xff]  ;;  %v2504_v1 = vmax.f32 %v2450_v26, 0.0  ;;  %v2612_v58 = vrot.slane %v7753_v10, 1  ;;  %v2447_v20 = vld [vmem:[#allocation2 + $0x58] sm:$0x3] }
 0x2a7   : > { %v7759_v29 = vmax.f32 %v2446_v7, 0.0  ;;  %v2692_v19 = vrot.slane %v7753_v10, 2  ;;  %v2501_v37 = vmax.f32 %v2447_v20, 0.0  ;;  %v2687_v0 = vrot.slane %v7764_v46, 2 }
 0x2a8   : > { %v5818_v8 = vpack.i.bf16 %v7755_v62, %v7753_v10  ;;  %v2613_v28 = vrot.slane %v7755_v62, 1  ;;  %v2615_v11 = vrot.slane %v2504_v1, 1  ;;  %v2693_v63 = vrot.slane %v7755_v62, 2 }
 0x2a9   : > { %v5828_v42 = vpack.i.bf16 %v7759_v29, %v7764_v46  ;;  %v2695_v3 = vrot.slane %v2504_v1, 2  ;;  %v2688_v56 = vrot.slane %v7759_v29, 2  ;;  %v2690_v53 = vrot.slane %v2501_v37, 2 }
 0x2aa   : > { %5819 = vrot.lane.b32.xlu0 %v5818_v8, %s6487_s21  ;;  %5814 = vrot.lane.b32.xlu1 %v5818_v8, %s6486_s20  ;;  %v2614_v33 = vsel %vm481_vm3, %v2612_v58, %v2613_v28  ;;  %v2616_v2 = vsel %vm481_vm3, %v2613_v28, %v2615_v11  ;;  %v2694_v50 = vsel %vm562_vm2, %v2692_v19, %v2693_v63  ;;  %v2608_v60 = vrot.slane %v7759_v29, 1 }
 0x2ab   : > { %v5843_v38 = vpack.i.bf16 %v2616_v2, %v2614_v33  ;;  %v2696_v15 = vsel %vm562_vm2, %v2693_v63, %v2695_v3  ;;  %v2610_v49 = vrot.slane %v2501_v37, 1  ;;  %v2607_v39 = vrot.slane %v7764_v46, 1 }
 0x2ac   : > { %v5848_v12 = vpack.i.bf16 %v2696_v15, %v2694_v50  ;;  %v2689_v25 = vsel %vm562_vm2, %v2687_v0, %v2688_v56  ;;  %v2691_v22 = vsel %vm562_vm2, %v2688_v56, %v2690_v53  ;;  %v2284_v1 = vsel %vm481_vm3, %v2281_v16, %v2283_v57 }
 0x2ad   : > { %v2609_v17 = vsel %vm481_vm3, %v2607_v39, %v2608_v60  ;;  %v2611_v27 = vsel %vm481_vm3, %v2608_v60, %v2610_v49  ;;  %v5868_v45 = vpack.i.bf16 %v2691_v22, %v2689_v25  ;;  %v6397_v49 = vld [vmem:[#allocation2 + $0xc0] sm:$0xff]  ;;  %v2296_v57 = vrot.slane %v6398_v31, 1 }
 0x2ae   : > { %5829 = vrot.lane.b32.xlu0 %v5828_v42, %s6486_s20  ;;  %5824 = vrot.lane.b32.xlu1 %v5828_v42, %s6487_s21  ;;  %v5863_v58 = vpack.i.bf16 %v2611_v27, %v2609_v17  ;;  %v2295_v5 = vrot.slane %v6397_v49, 1 }
 0x2b2   : > { %5844 = vrot.lane.b32.xlu0 %v5843_v38, %s6490_s28  ;;  %5834 = vrot.lane.b32.xlu1 %v5843_v38, %s6488_s26 }
 0x2b6   : > { %5849 = vrot.lane.b32.xlu0 %v5848_v12, %s6491_s29  ;;  %5839 = vrot.lane.b32.xlu1 %v5848_v12, %s6489_s27 }
 0x2b9   : > { %v4978_v59 = vpop.f32.mrb[8].mxu1 }
 0x2ba   : > { %v2382_v26 = vadd.f32 %v4978_v59, %v2287_v9  ;;  %5859 = vrot.lane.b32.xlu0 %v5848_v12, %s6484_s18  ;;  %5854 = vrot.lane.b32.xlu1 %v5843_v38, %s6485_s19  ;;  %v2117_v7 = vpop.f32.mrb[9].mxu1  ;;  %v6399_v9 = vld [vmem:[#allocation2 + $0xa8] sm:$0xff] }
 0x2bb   : > { %v2380_v43 = vadd.f32 %v2282_v54, %v2117_v7  ;;  %v4979_v8 = vpop.f32.mrb[10].mxu1  ;;  %v2290_v0 = vrot.slane %v6399_v9, 1  ;;  %v2291_v54 = vrot.slane %v6400_v6, 1 }
 0x2bc   : > { %2414 = vst.msk [vmem:[#allocation2 + $0x91] sm:$0xff] %vm172_vm0, %v2382_v26  ;;  %v2383_v28 = vadd.f32 %v4979_v8, %v2289_v61  ;;  %v2120_v11 = vpop.f32.mrb[11].mxu1  ;;  %v6401_v61 = vld [vmem:[#allocation2 + $0xd0] sm:$0x3]  ;;  %v6402_v26 = vld [vmem:[#allocation2 + $0xb8] sm:$0x3] }
 0x2bd   : > { %2412 = vst.msk [vmem:[#allocation2 + $0x79] sm:$0xff] %vm172_vm0, %v2380_v43  ;;  %v2381_v42 = vadd.f32 %v2284_v1, %v2120_v11  ;;  %v2298_v59 = vrot.slane %v6401_v61, 1  ;;  %v2293_v7 = vrot.slane %v6402_v26, 1  ;;  %v2297_v1 = vsel %vm481_vm3, %v2295_v5, %v2296_v57 }
 0x2be   : > { %2415 = vst.msk [vmem:[#allocation2 + $0x99] sm:$0xff] %vm172_vm0, %v2383_v28  ;;  %5869 = vrot.lane.b32.xlu0 %v5868_v45, %s6491_s29  ;;  %5864 = vrot.lane.b32.xlu1 %v5863_v58, %s6490_s28  ;;  %v2292_v28 = vsel %vm481_vm3, %v2290_v0, %v2291_v54 }
 0x2bf   : > { %2413 = vst.msk [vmem:[#allocation2 + $0x81] sm:$0xff] %vm172_vm0, %v2381_v42  ;;  %v2299_v11 = vsel %vm481_vm3, %v2296_v57, %v2298_v59 }
 0x2c2   : > { %5884 = vrot.lane.b32.xlu0 %v5863_v58, %s6488_s26  ;;  %5874 = vrot.lane.b32.xlu1 %v5863_v58, %s6485_s19 }
 0x2c3   : > { %v2454_v33 = vld [vmem:[#allocation2 + $0x90] sm:$0xff] }
 0x2c4   : > { %v7816_v3 = vmax.f32 %v2454_v33, 0.0  ;;  %v2451_v38 = vld [vmem:[#allocation2 + $0x78] sm:$0xff] }
 0x2c5   : > { %v2455_v2 = vld [vmem:[#allocation2 + $0x98] sm:$0xff]  ;;  %v2456_v63 = vld [vmem:[#allocation2 + $0xa0] sm:$0x3]  ;;  %v7827_v14 = vmax.f32 %v2451_v38, 0.0 }
 0x2c6   : > { %5889 = vrot.lane.b32.xlu0 %v5868_v45, %s6489_s27  ;;  %5879 = vrot.lane.b32.xlu1 %v5868_v45, %s6484_s18  ;;  %v7818_v20 = vmax.f32 %v2455_v2, 0.0  ;;  %v2452_v19 = vld [vmem:[#allocation2 + $0x80] sm:$0xff]  ;;  %v2510_v47 = vmax.f32 %v2456_v63, 0.0  ;;  %v2622_v23 = vrot.slane %v7816_v3, 1  ;;  %v2453_v12 = vld [vmem:[#allocation2 + $0x88] sm:$0x3] }
 0x2c7   : > { %v7822_v15 = vmax.f32 %v2452_v19, 0.0  ;;  %v2702_v41 = vrot.slane %v7816_v3, 2  ;;  %v2507_v60 = vmax.f32 %v2453_v12, 0.0  ;;  %v2697_v43 = vrot.slane %v7827_v14, 2 }
 0x2c8   : > { %v5898_v50 = vpack.i.bf16 %v7818_v20, %v7816_v3  ;;  %v2623_v37 = vrot.slane %v7818_v20, 1  ;;  %v2625_v35 = vrot.slane %v2510_v47, 1  ;;  %v2703_v55 = vrot.slane %v7818_v20, 2 }
 0x2c9   : > { %v5908_v32 = vpack.i.bf16 %v7822_v15, %v7827_v14  ;;  %v2705_v16 = vrot.slane %v2510_v47, 2  ;;  %v2698_v25 = vrot.slane %v7822_v15, 2  ;;  %v2700_v22 = vrot.slane %v2507_v60, 2 }
 0x2ca   : > { %5899 = vrot.lane.b32.xlu0 %v5898_v50, %s6487_s21  ;;  %5894 = vrot.lane.b32.xlu1 %v5898_v50, %s6486_s20  ;;  %v2624_v13 = vsel %vm481_vm3, %v2622_v23, %v2623_v37  ;;  %v2626_v52 = vsel %vm481_vm3, %v2623_v37, %v2625_v35  ;;  %v2704_v56 = vsel %vm562_vm2, %v2702_v41, %v2703_v55  ;;  %v2618_v17 = vrot.slane %v7822_v15, 1 }
 0x2cb   : > { %v5923_v34 = vpack.i.bf16 %v2626_v52, %v2624_v13  ;;  %v2706_v53 = vsel %vm562_vm2, %v2703_v55, %v2705_v16  ;;  %v2620_v27 = vrot.slane %v2507_v60, 1  ;;  %v2617_v8 = vrot.slane %v7827_v14, 1 }
 0x2cc   : > { %v5928_v39 = vpack.i.bf16 %v2706_v53, %v2704_v56  ;;  %v2699_v58 = vsel %vm562_vm2, %v2697_v43, %v2698_v25  ;;  %v2701_v42 = vsel %vm562_vm2, %v2698_v25, %v2700_v22  ;;  %v2294_v47 = vsel %vm481_vm3, %v2291_v54, %v2293_v7 }
 0x2cd   : > { %v2619_v33 = vsel %vm481_vm3, %v2617_v8, %v2618_v17  ;;  %v2621_v2 = vsel %vm481_vm3, %v2618_v17, %v2620_v27  ;;  %v5948_v23 = vpack.i.bf16 %v2701_v42, %v2699_v58  ;;  %v7890_v17 = vpop.permute.xlu0 %5734  ;;  %v6404_v8 = vld [vmem:[#allocation2 + $0xf8] sm:$0xff]  ;;  %v6406_v42 = vld [vmem:[#allocation2 + $0xe0] sm:$0xff] }
 0x2ce   : > { %5909 = vrot.lane.b32.xlu0 %v5908_v32, %s6486_s20  ;;  %5904 = vrot.lane.b32.xlu1 %v5908_v32, %s6487_s21  ;;  %v5943_v32 = vpack.i.bf16 %v2621_v2, %v2619_v33  ;;  %v2301_v33 = vrot.slane %v6406_v42, 1  ;;  %v6407_v2 = vld [vmem:[#allocation2 + $0x100] sm:$0x3] }
 0x2d2   : > { %5924 = vrot.lane.b32.xlu0 %v5923_v34, %s6490_s28  ;;  %5914 = vrot.lane.b32.xlu1 %v5923_v34, %s6488_s26 }
 0x2d6   : > { %5929 = vrot.lane.b32.xlu0 %v5928_v39, %s6491_s29  ;;  %5919 = vrot.lane.b32.xlu1 %v5928_v39, %s6489_s27 }
 0x2d9   : > { %v4982_v45 = vpop.f32.mrb[12].mxu1 }
 0x2da   : > { %v2386_v63 = vadd.f32 %v4982_v45, %v2297_v1  ;;  %5939 = vrot.lane.b32.xlu0 %v5928_v39, %s6484_s18  ;;  %5934 = vrot.lane.b32.xlu1 %v5923_v34, %s6485_s19  ;;  %v2133_v19 = vpop.f32.mrb[13].mxu1  ;;  %v6403_v1 = vld [vmem:[#allocation2 + $0xf0] sm:$0xff] }
 0x2db   : > { %v2384_v38 = vadd.f32 %v2292_v28, %v2133_v19  ;;  %v4983_v50 = vpop.f32.mrb[14].mxu1  ;;  %v2305_v43 = vrot.slane %v6403_v1, 1  ;;  %v2306_v28 = vrot.slane %v6404_v8, 1 }
 0x2dc   : > { %2418 = vst.msk [vmem:[#allocation2 + $0xc1] sm:$0xff] %vm172_vm0, %v2386_v63  ;;  %v2387_v37 = vadd.f32 %v4983_v50, %v2299_v11  ;;  %v2136_v35 = vpop.f32.mrb[15].mxu1  ;;  %v6405_v11 = vld [vmem:[#allocation2 + $0xd8] sm:$0xff]  ;;  %v2308_v63 = vrot.slane %v6407_v2, 1 }
 0x2dd   : > { %2416 = vst.msk [vmem:[#allocation2 + $0xa9] sm:$0xff] %vm172_vm0, %v2384_v38  ;;  %v2385_v13 = vadd.f32 %v2294_v47, %v2136_v35  ;;  %v2300_v45 = vrot.slane %v6405_v11, 1  ;;  %v7902_v35 = vpop.permute.xlu0 %5739  ;;  %v5737_v11 = vunpack.i.h.bf16 %v7890_v17 }
 0x2de   : > { %2419 = vst.msk [vmem:[#allocation2 + $0xc9] sm:$0xff] %vm172_vm0, %v2387_v37  ;;  %5949 = vrot.lane.b32.xlu0 %v5948_v23, %s6491_s29  ;;  %5944 = vrot.lane.b32.xlu1 %v5943_v32, %s6490_s28  ;;  %v7900_v37 = vpop.permute.xlu1 %5744 }
 0x2df   : > { %2417 = vst.msk [vmem:[#allocation2 + $0xb1] sm:$0xff] %vm172_vm0, %v2385_v13  ;;  %8946 = vst [vmem:[#allocation3_spill] sm:$0xff] %v7900_v37 }
 0x2e2   : > { %5964 = vrot.lane.b32.xlu0 %v5943_v32, %s6488_s26  ;;  %5954 = vrot.lane.b32.xlu1 %v5943_v32, %s6485_s19  ;;  %v6408_v32 = vld [vmem:[#allocation2 + $0xe8] sm:$0x3] }
 0x2e3   : > { %v2460_v52 = vld [vmem:[#allocation2 + $0xc0] sm:$0xff]  ;;  %v2303_v13 = vrot.slane %v6408_v32, 1  ;;  %v3547_v32 = vsel %vm172_vm0, %v7674_v40, %v5737_v11 }
 0x2e4   : > { %v7868_v12 = vmax.f32 %v2460_v52, 0.0  ;;  %v2457_v53 = vld [vmem:[#allocation2 + $0xa8] sm:$0xff] }
 0x2e5   : > { %v2461_v55 = vld [vmem:[#allocation2 + $0xc8] sm:$0xff]  ;;  %v2462_v16 = vld [vmem:[#allocation2 + $0xd0] sm:$0x3]  ;;  %v7879_v57 = vmax.f32 %v2457_v53, 0.0 }
 0x2e6   : > { %5969 = vrot.lane.b32.xlu0 %v5948_v23, %s6489_s27  ;;  %5959 = vrot.lane.b32.xlu1 %v5948_v23, %s6484_s18  ;;  %v7870_v41 = vmax.f32 %v2461_v55, 0.0  ;;  %v2458_v34 = vld [vmem:[#allocation2 + $0xb0] sm:$0xff]  ;;  %v2516_v56 = vmax.f32 %v2462_v16, 0.0  ;;  %v2632_v9 = vrot.slane %v7868_v12, 1  ;;  %v2459_v59 = vld [vmem:[#allocation2 + $0xb8] sm:$0x3]  ;;  %v2307_v23 = vsel %vm481_vm3, %v2305_v43, %v2306_v28 }
 0x2e7   : > { %v7874_v49 = vmax.f32 %v2458_v34, 0.0  ;;  %v2712_v25 = vrot.slane %v7868_v12, 2  ;;  %v2513_v7 = vmax.f32 %v2459_v59, 0.0  ;;  %v2707_v52 = vrot.slane %v7879_v57, 2 }
 0x2e8   : > { %v5978_v60 = vpack.i.bf16 %v7870_v41, %v7868_v12  ;;  %v2633_v5 = vrot.slane %v7870_v41, 1  ;;  %v2635_v31 = vrot.slane %v2516_v56, 1  ;;  %v2713_v54 = vrot.slane %v7870_v41, 2 }
 0x2e9   : > { %v5988_v0 = vpack.i.bf16 %v7874_v49, %v7879_v57  ;;  %v2715_v61 = vrot.slane %v2516_v56, 2  ;;  %v2708_v19 = vrot.slane %v7874_v49, 2  ;;  %v2710_v47 = vrot.slane %v2513_v7, 2 }
 0x2ea   : > { %5979 = vrot.lane.b32.xlu0 %v5978_v60, %s6487_s21  ;;  %5974 = vrot.lane.b32.xlu1 %v5978_v60, %s6486_s20  ;;  %v2634_v39 = vsel %vm481_vm3, %v2632_v9, %v2633_v5  ;;  %v2636_v6 = vsel %vm481_vm3, %v2633_v5, %v2635_v31  ;;  %v2714_v27 = vsel %vm562_vm2, %v2712_v25, %v2713_v54  ;;  %v2628_v38 = vrot.slane %v7874_v49, 1 }
 0x2eb   : > { %v6003_v22 = vpack.i.bf16 %v2636_v6, %v2634_v39  ;;  %v2716_v26 = vsel %vm562_vm2, %v2713_v54, %v2715_v61  ;;  %v2630_v50 = vrot.slane %v2513_v7, 1  ;;  %v2627_v55 = vrot.slane %v7879_v57, 1 }
 0x2ec   : > { %v6008_v58 = vpack.i.bf16 %v2716_v26, %v2714_v27  ;;  %v2302_v16 = vsel %vm481_vm3, %v2300_v45, %v2301_v33  ;;  %v2309_v34 = vsel %vm481_vm3, %v2306_v28, %v2308_v63  ;;  %v2709_v53 = vsel %vm562_vm2, %v2707_v52, %v2708_v19 }
 0x2ed   : > { %v2711_v60 = vsel %vm562_vm2, %v2708_v19, %v2710_v47  ;;  %v2629_v5 = vsel %vm481_vm3, %v2627_v55, %v2628_v38  ;;  %v2631_v31 = vsel %vm481_vm3, %v2628_v38, %v2630_v50  ;;  %v2304_v54 = vsel %vm481_vm3, %v2301_v33, %v2303_v13 }
 0x2ee   : > { %5989 = vrot.lane.b32.xlu0 %v5988_v0, %s6486_s20  ;;  %5984 = vrot.lane.b32.xlu1 %v5988_v0, %s6487_s21  ;;  %v6028_v27 = vpack.i.bf16 %v2711_v60, %v2709_v53  ;;  %v6023_v26 = vpack.i.bf16 %v2631_v31, %v2629_v5  ;;  %v5736_v45 = vunpack.i.l.bf16 %v7890_v17  ;;  %v5742_v52 = vunpack.i.h.bf16 %v7902_v35  ;;  %v6409_v53 = vld [vmem:[#allocation2 + $0x120] sm:$0xff]  ;;  %v6410_v5 = vld [vmem:[#allocation2 + $0x128] sm:$0xff] }
 0x2ef   : > { %v2315_v60 = vrot.slane %v6409_v53, 1  ;;  %v2316_v31 = vrot.slane %v6410_v5, 1 }
 0x2f0   : > { %v3546_v13 = vsel %vm172_vm0, %v7672_v36, %v5736_v45  ;;  %v6411_v36 = vld [vmem:[#allocation2 + $0x108] sm:$0xff] }
 0x2f2   : > { %6004 = vrot.lane.b32.xlu0 %v6003_v22, %s6490_s28  ;;  %5994 = vrot.lane.b32.xlu1 %v6003_v22, %s6488_s26 }
 0x2f6   : > { %6009 = vrot.lane.b32.xlu0 %v6008_v58, %s6491_s29  ;;  %5999 = vrot.lane.b32.xlu1 %v6008_v58, %s6489_s27 }
 0x2f9   : > { %v4986_v56 = vpop.f32.mrb[16].mxu1 }
 0x2fa   : > { %v2390_v9 = vadd.f32 %v4986_v56, %v2307_v23  ;;  %6019 = vrot.lane.b32.xlu0 %v6008_v58, %s6484_s18  ;;  %6014 = vrot.lane.b32.xlu1 %v6003_v22, %s6485_s19  ;;  %v2149_v0 = vpop.f32.mrb[17].mxu1 }
 0x2fb   : > { %v2388_v39 = vadd.f32 %v2302_v16, %v2149_v0  ;;  %v4987_v6 = vpop.f32.mrb[18].mxu1  ;;  %v5741_v16 = vunpack.i.l.bf16 %v7902_v35  ;;  %v7962_v0 = vld [vmem:[#allocation2 + $0x110] sm:$0xff] }
 0x2fc   : > { %2422 = vst.msk [vmem:[#allocation2 + $0xf1] sm:$0xff] %vm172_vm0, %v2390_v9  ;;  %v2391_v61 = vadd.f32 %v4987_v6, %v2309_v34  ;;  %v7917_v59 = vpop.permute.xlu0 %5754  ;;  %v7919_v25 = vpop.permute.xlu1 %5749  ;;  %v2310_v9 = vrot.slane %v6411_v36, 1 }
 0x2fd   : > { %2420 = vst.msk [vmem:[#allocation2 + $0xd9] sm:$0xff] %vm172_vm0, %v2388_v39  ;;  %v2152_v7 = vpop.f32.mrb[19].mxu1  ;;  %v8939_v39 = vrot.slane %v7962_v0, 1  ;;  %v3578_v45 = vsel %vm1469_vm5, %v3546_v13, %v5741_v16  ;;  %v5756_v53 = vunpack.i.l.bf16 %v7917_v59 }
 0x2fe   : > { %2423 = vst.msk [vmem:[#allocation2 + $0xf9] sm:$0xff] %vm172_vm0, %v2391_v61  ;;  %v2389_v22 = vadd.f32 %v2304_v54, %v2152_v7  ;;  %6029 = vrot.lane.b32.xlu0 %v6028_v27, %s6491_s29  ;;  %6024 = vrot.lane.b32.xlu1 %v6023_v26, %s6490_s28  ;;  %v6413_v61 = vld [vmem:[#allocation2 + $0x130] sm:$0x3] }
 0x300   : > { %2421 = vst.msk [vmem:[#allocation2 + $0xe1] sm:$0xff] %vm172_vm0, %v2389_v22  ;;  %v7926_v1 = vpop.permute.xlu1 %5764  ;;  %v7928_v43 = vpop.permute.xlu0 %5759 }
 0x302   : > { %6044 = vrot.lane.b32.xlu0 %v6023_v26, %s6488_s26  ;;  %6034 = vrot.lane.b32.xlu1 %v6023_v26, %s6485_s19 }
 0x303   : > { %v2466_v8 = vld [vmem:[#allocation2 + $0xf0] sm:$0xff] }
 0x304   : > { %v7932_v28 = vpop.permute.xlu0 %5774  ;;  %v7936_v33 = vpop.permute.xlu1 %5769  ;;  %v7940_v2 = vmax.f32 %v2466_v8, 0.0  ;;  %v2463_v47 = vld [vmem:[#allocation2 + $0xd8] sm:$0xff] }
 0x305   : > { %v2467_v58 = vld [vmem:[#allocation2 + $0xf8] sm:$0xff]  ;;  %v2468_v42 = vld [vmem:[#allocation2 + $0x100] sm:$0x3]  ;;  %v7959_v34 = vmax.f32 %v2463_v47, 0.0  ;;  %v5761_v47 = vunpack.i.l.bf16 %v7928_v43 }
 0x306   : > { %6049 = vrot.lane.b32.xlu0 %v6028_v27, %s6489_s27  ;;  %6039 = vrot.lane.b32.xlu1 %v6028_v27, %s6484_s18  ;;  %8947 = vst [vmem:[#allocation4_spill] sm:$0xff] %v7940_v2  ;;  %v7942_v63 = vmax.f32 %v2467_v58, 0.0  ;;  %v2522_v19 = vmax.f32 %v2468_v42, 0.0  ;;  %v2642_v40 = vrot.slane %v7940_v2, 1  ;;  %v2318_v27 = vrot.slane %v6413_v61, 1 }
 0x307   : > { %v2464_v38 = vld [vmem:[#allocation2 + $0xe0] sm:$0xff]  ;;  %v2465_v11 = vld [vmem:[#allocation2 + $0xe8] sm:$0x3]  ;;  %v3579_v58 = vsel %vm1469_vm5, %v3547_v32, %v5742_v52  ;;  %v5762_v42 = vunpack.i.h.bf16 %v7928_v43  ;;  %v5757_v43 = vunpack.i.h.bf16 %v7917_v59  ;;  %v3610_v36 = vsel %vm1502_vm6, %v3578_v45, %v5761_v47 }
 0x308   : > { %8948 = vst [vmem:[#allocation5_spill] sm:$0xff] %v7942_v63  ;;  %v7944_v50 = vpop.permute.xlu0 %5779  ;;  %v6058_v17 = vpack.i.bf16 %v7942_v63, %v7940_v2  ;;  %v7948_v23 = vmax.f32 %v2464_v38, 0.0  ;;  %v2643_v55 = vrot.slane %v7942_v63, 1  ;;  %v2645_v56 = vrot.slane %v2522_v19, 1  ;;  %v7965_v35 = vpop.permute.xlu1 %5784 }
 0x309   : > { %v2723_v22 = vrot.slane %v7942_v63, 2  ;;  %v2725_v8 = vrot.slane %v2522_v19, 2  ;;  %v2722_v38 = vrot.slane %v7940_v2, 2  ;;  %v2312_v19 = vsel %vm481_vm3, %v2310_v9, %v8939_v39 }
 0x30a   : > { %6059 = vrot.lane.b32.xlu0 %v6058_v17, %s6487_s21  ;;  %6054 = vrot.lane.b32.xlu1 %v6058_v17, %s6486_s20  ;;  %v6068_v54 = vpack.i.bf16 %v7948_v23, %v7959_v34  ;;  %v2644_v26 = vsel %vm481_vm3, %v2642_v40, %v2643_v55  ;;  %v2646_v7 = vsel %vm481_vm3, %v2643_v55, %v2645_v56  ;;  %v6414_v55 = vld [vmem:[#allocation2 + $0x118] sm:$0x3]  ;;  %v2519_v56 = vmax.f32 %v2465_v11, 0.0 }
 0x30b   : > { %v2317_v17 = vsel %vm481_vm3, %v2315_v60, %v2316_v31  ;;  %v2313_v13 = vrot.slane %v6414_v55, 1  ;;  %v6083_v32 = vpack.i.bf16 %v2646_v7, %v2644_v26  ;;  %v2319_v52 = vsel %vm481_vm3, %v2316_v31, %v2318_v27 }
 0x30c   : > { %v7967_v6 = vpop.permute.xlu0 %5789  ;;  %v2724_v40 = vsel %vm562_vm2, %v2722_v38, %v2723_v22  ;;  %v2726_v5 = vsel %vm562_vm2, %v2723_v22, %v2725_v8  ;;  %v3611_v60 = vsel %vm1502_vm6, %v3579_v58, %v5762_v42  ;;  %v7992_v9 = vpop.permute.xlu1 %5794  ;;  %v5777_v31 = vunpack.i.h.bf16 %v7932_v28 }
 0x30d   : > { %v5776_v59 = vunpack.i.l.bf16 %v7932_v28  ;;  %v5782_v27 = vunpack.i.h.bf16 %v7944_v50  ;;  %v2718_v26 = vrot.slane %v7948_v23, 2  ;;  %v6088_v22 = vpack.i.bf16 %v2726_v5, %v2724_v40 }
 0x30e   : > { %6069 = vrot.lane.b32.xlu0 %v6068_v54, %s6486_s20  ;;  %6064 = vrot.lane.b32.xlu1 %v6068_v54, %s6487_s21  ;;  %v2717_v8 = vrot.slane %v7959_v34, 2  ;;  %v2720_v11 = vrot.slane %v2519_v56, 2  ;;  %v2638_v42 = vrot.slane %v7948_v23, 1  ;;  %v2640_v47 = vrot.slane %v2519_v56, 1 }
 0x30f   : > { %v5781_v38 = vunpack.i.l.bf16 %v7944_v50 }
 0x310   : > { %v5805_v16 = vpop.permute.xlu0 %5804  ;;  %v2719_v5 = vsel %vm562_vm2, %v2717_v8, %v2718_v26  ;;  %v5800_v39 = vpop.permute.xlu1 %5799 }
 0x311   : > { %v5807_v54 = vunpack.i.h.bf16 %v5805_v16  ;;  %v5806_v61 = vunpack.i.l.bf16 %v5805_v16 }
 0x312   : > { %6084 = vrot.lane.b32.xlu0 %v6083_v32, %s6490_s28  ;;  %6074 = vrot.lane.b32.xlu1 %v6083_v32, %s6488_s26 }
 0x313   : > { %v3643_v55 = vsel %vm1535_vm7, %v3611_v60, %v5807_v54  ;;  %v3642_v28 = vsel %vm1535_vm7, %v3610_v36, %v5806_v61  ;;  %v2721_v60 = vsel %vm562_vm2, %v2718_v26, %v2720_v11 }
 0x314   : > { %v5810_v7 = vpop.permute.xlu0 %5809 }
 0x315   : > { %v5812_v45 = vunpack.i.h.bf16 %v5810_v7  ;;  %v5811_v58 = vunpack.i.l.bf16 %v5810_v7  ;;  %v2637_v7 = vrot.slane %v7959_v34, 1 }
 0x316   : > { %6089 = vrot.lane.b32.xlu0 %v6088_v22, %s6491_s29  ;;  %6079 = vrot.lane.b32.xlu1 %v6088_v22, %s6489_s27 }
 0x317   : > { %v3674_v16 = vsel %vm1568_vm8, %v3642_v28, %v5811_v58  ;;  %v3675_v40 = vsel %vm1568_vm8, %v3643_v55, %v5812_v45  ;;  %v2639_v58 = vsel %vm481_vm3, %v2637_v7, %v2638_v42  ;;  %v2641_v45 = vsel %vm481_vm3, %v2638_v42, %v2640_v47 }
 0x318   : > { %v3706_v56 = vsel %vm1601_vm9, %v3674_v16, %v5756_v53  ;;  %v3707_v50 = vsel %vm1601_vm9, %v3675_v40, %v5757_v43  ;;  %v6103_v47 = vpack.i.bf16 %v2641_v45, %v2639_v58  ;;  %v5802_v40 = vunpack.i.h.bf16 %v5800_v39 }
 0x319   : > { %v4990_v36 = vpop.f32.mrb[20].mxu1  ;;  %v3738_v54 = vsel %vm1634_vm10, %v3706_v56, %v5776_v59  ;;  %v3739_v61 = vsel %vm1634_vm10, %v3707_v50, %v5777_v31  ;;  %v8949_v59 = vrot.slane %v7962_v0, 1  ;;  %v6416_v56 = vld [vmem:[#allocation2 + $0x158] sm:$0xff] }
 0x31a   : > { %v2394_v55 = vadd.f32 %v4990_v36, %v2317_v17  ;;  %6099 = vrot.lane.b32.xlu0 %v6088_v22, %s6484_s18  ;;  %6094 = vrot.lane.b32.xlu1 %v6083_v32, %s6485_s19  ;;  %v2165_v8 = vpop.f32.mrb[21].mxu1  ;;  %v3770_v53 = vsel %vm1667_vm11, %v3738_v54, %v5781_v38  ;;  %v3771_v43 = vsel %vm1667_vm11, %v3739_v61, %v5782_v27  ;;  %v2326_v50 = vrot.slane %v6416_v56, 1  ;;  %v6417_v36 = vld [vmem:[#allocation2 + $0x138] sm:$0xff]  ;;  %v8046_v61 = vld [vmem:[#allocation2 + $0x140] sm:$0xff] }
 0x31b   : > { %v2392_v26 = vadd.f32 %v2312_v19, %v2165_v8  ;;  %v4991_v11 = vpop.f32.mrb[22].mxu1  ;;  %v2314_v31 = vsel %vm481_vm3, %v8949_v59, %v2313_v13  ;;  %v3802_v28 = vpack.c.bf16 %v3771_v43, %v3770_v53  ;;  %v6108_v32 = vpack.i.bf16 %v2721_v60, %v2719_v5  ;;  %v6415_v5 = vld [vmem:[#allocation2 + $0x150] sm:$0xff]  ;;  %v6419_v59 = vld [vmem:[#allocation2 + $0x160] sm:$0x3] }
 0x31c   : > { %2426 = vst.msk [vmem:[#allocation2 + $0x121] sm:$0xff] %vm172_vm0, %v2394_v55  ;;  %v2395_v42 = vadd.f32 %v4991_v11, %v2319_v52  ;;  %v8026_v17 = vpop.permute.xlu0 %5819  ;;  %v8028_v22 = vpop.permute.xlu1 %5814  ;;  %v5796_v19 = vunpack.i.l.bf16 %v7992_v9  ;;  %v5797_v13 = vunpack.i.h.bf16 %v7992_v9  ;;  %v5801_v52 = vunpack.i.l.bf16 %v5800_v39 }
 0x31d   : > { %2424 = vst.msk [vmem:[#allocation2 + $0x109] sm:$0xff] %vm172_vm0, %v2392_v26  ;;  %v2168_v38 = vpop.f32.mrb[23].mxu1  ;;  %5006 = vmatprep.mubr.msk.bf16.mxu1 %vm1736_vm12, %v3802_v28  ;;  %v2325_v7 = vrot.slane %v6415_v5, 1  ;;  %v2320_v54 = vrot.slane %v6417_v36, 1  ;;  %v8940_v58 = vrot.slane %v8046_v61, 1  ;;  %v5751_v53 = vunpack.i.l.bf16 %v7919_v25 }
 0x31e   : > { %2427 = vst.msk [vmem:[#allocation2 + $0x129] sm:$0xff] %vm172_vm0, %v2395_v42  ;;  %v2393_v0 = vadd.f32 %v2314_v31, %v2168_v38  ;;  %6109 = vrot.lane.b32.xlu0 %v6108_v32, %s6491_s29  ;;  %6104 = vrot.lane.b32.xlu1 %v6103_v47, %s6490_s28  ;;  %v3548_v60 = vsel %vm172_vm0, %v7719_v4, %v5796_v19  ;;  %v2328_v31 = vrot.slane %v6419_v59, 1  ;;  %v5752_v28 = vunpack.i.h.bf16 %v7919_v25  ;;  %v8075_v25 = vld [vmem:[#allocation2 + $0x148] sm:$0x3] }
 0x31f   : > { %v3549_v39 = vsel %vm172_vm0, %v7709_v21, %v5797_v13  ;;  %v3580_v45 = vsel %vm1469_vm5, %v3548_v60, %v5801_v52  ;;  %v8059_v11 = vsel %vm481_vm3, %v2325_v7, %v2326_v50  ;;  %v5767_v38 = vunpack.i.h.bf16 %v7926_v1 }
 0x320   : > { %2425 = vst.msk [vmem:[#allocation2 + $0x111] sm:$0xff] %vm172_vm0, %v2393_v0  ;;  %v8038_v27 = vpop.permute.xlu0 %5829  ;;  %v8040_v16 = vpop.permute.xlu1 %5824  ;;  %v3581_v4 = vsel %vm1469_vm5, %v3549_v39, %v5802_v40  ;;  %v3612_v0 = vsel %vm1502_vm6, %v3580_v45, %v5751_v53  ;;  %v8073_v52 = vsel %vm481_vm3, %v2320_v54, %v8940_v58  ;;  %v5787_v36 = vunpack.i.h.bf16 %v7965_v35 }
 0x321   : > { %v3613_v40 = vsel %vm1502_vm6, %v3581_v4, %v5752_v28  ;;  %v5786_v54 = vunpack.i.l.bf16 %v7965_v35  ;;  %v5772_v45 = vunpack.i.h.bf16 %v7936_v33 }
 0x322   : > { %6124 = vrot.lane.b32.xlu0 %v6103_v47, %s6488_s26  ;;  %6114 = vrot.lane.b32.xlu1 %v6103_v47, %s6485_s19  ;;  %v3645_v35 = vsel %vm1535_vm7, %v3613_v40, %v5767_v38  ;;  %v5792_v40 = vunpack.i.h.bf16 %v7967_v6 }
 0x323   : > { %v2472_v9 = vld [vmem:[#allocation2 + $0x120] sm:$0xff] }
 0x324   : > { %v8052_v55 = vpop.permute.xlu0 %5844  ;;  %v8054_v8 = vpop.permute.xlu1 %5834  ;;  %v8064_v21 = vmax.f32 %v2472_v9, 0.0  ;;  %v2469_v19 = vld [vmem:[#allocation2 + $0x108] sm:$0xff]  ;;  %v5766_v9 = vunpack.i.l.bf16 %v7926_v1  ;;  %v5771_v1 = vunpack.i.l.bf16 %v7936_v33  ;;  %v3551_v33 = vsel %vm172_vm0, %v7706_v30, %v5787_v36 }
 0x325   : > { %v2473_v43 = vld [vmem:[#allocation2 + $0x128] sm:$0xff]  ;;  %v2474_v26 = vld [vmem:[#allocation2 + $0x130] sm:$0x3]  ;;  %v8094_v53 = vmax.f32 %v2469_v19, 0.0  ;;  %v5791_v30 = vunpack.i.l.bf16 %v7967_v6  ;;  %v3677_v36 = vsel %vm1568_vm8, %v3645_v35, %v5772_v45  ;;  %v5831_v6 = vunpack.i.l.bf16 %v8038_v27 }
 0x326   : > { %6129 = vrot.lane.b32.xlu0 %v6108_v32, %s6489_s27  ;;  %6119 = vrot.lane.b32.xlu1 %v6108_v32, %s6484_s18  ;;  %8950 = vst [vmem:[#allocation6_spill] sm:$0xff] %v8064_v21  ;;  %v8066_v42 = vmax.f32 %v2473_v43, 0.0  ;;  %v2528_v47 = vmax.f32 %v2474_v26, 0.0  ;;  %v8097_v43 = vsel %vm481_vm3, %v2326_v50, %v2328_v31  ;;  %v3644_v26 = vsel %vm1535_vm7, %v3612_v0, %v5766_v9 }
 0x327   : > { %v2470_v13 = vld [vmem:[#allocation2 + $0x110] sm:$0xff]  ;;  %v2652_v59 = vrot.slane %v8064_v21, 1  ;;  %v2471_v50 = vld [vmem:[#allocation2 + $0x118] sm:$0x3]  ;;  %v3550_v31 = vsel %vm172_vm0, %v7704_v48, %v5786_v54  ;;  %v5827_v9 = vunpack.i.h.bf16 %v8040_v16  ;;  %v5826_v32 = vunpack.i.l.bf16 %v8040_v16 }
 0x328   : > { %8951 = vst [vmem:[#allocation7_spill] sm:$0xff] %v8066_v42  ;;  %v8079_v5 = vpop.permute.xlu0 %5849  ;;  %v8081_v7 = vpop.permute.xlu1 %5839  ;;  %v6138_v56 = vpack.i.bf16 %v8066_v42, %v8064_v21  ;;  %v8085_v60 = vmax.f32 %v2470_v13, 0.0  ;;  %v2653_v39 = vrot.slane %v8066_v42, 1  ;;  %v2655_v4 = vrot.slane %v2528_v47, 1 }
 0x329   : > { %v2735_v58 = vrot.slane %v2528_v47, 2  ;;  %v2732_v47 = vrot.slane %v8064_v21, 2  ;;  %v3676_v48 = vsel %vm1568_vm8, %v3644_v26, %v5771_v1  ;;  %v2525_v54 = vmax.f32 %v2471_v50, 0.0 }
 0x32a   : > { %6139 = vrot.lane.b32.xlu0 %v6138_v56, %s6487_s21  ;;  %6134 = vrot.lane.b32.xlu1 %v6138_v56, %s6486_s20  ;;  %v6148_v19 = vpack.i.bf16 %v8085_v60, %v8094_v53  ;;  %v2733_v56 = vrot.slane %v8066_v42, 2  ;;  %v2654_v38 = vsel %vm481_vm3, %v2652_v59, %v2653_v39  ;;  %v2656_v0 = vsel %vm481_vm3, %v2653_v39, %v2655_v4 }
 0x32b   : > { %v6163_v59 = vpack.i.bf16 %v2656_v0, %v2654_v38  ;;  %v5832_v21 = vunpack.i.h.bf16 %v8038_v27  ;;  %v3709_v1 = vsel %vm1601_vm9, %v3677_v36, %v5827_v9  ;;  %v3708_v45 = vsel %vm1601_vm9, %v3676_v48, %v5826_v32 }
 0x32c   : > { %v8103_v28 = vpop.permute.xlu0 %5859  ;;  %v8105_v13 = vpop.permute.xlu1 %5854  ;;  %v2734_v37 = vsel %vm562_vm2, %v2732_v47, %v2733_v56  ;;  %v2736_v16 = vsel %vm562_vm2, %v2733_v56, %v2735_v58  ;;  %v2728_v35 = vrot.slane %v8085_v60, 2  ;;  %v2730_v56 = vrot.slane %v2525_v54, 2 }
 0x32d   : > { %v6168_v9 = vpack.i.bf16 %v2736_v16, %v2734_v37  ;;  %v3583_v32 = vsel %vm1469_vm5, %v3551_v33, %v5792_v40  ;;  %v2648_v48 = vrot.slane %v8085_v60, 1  ;;  %v2650_v36 = vrot.slane %v2525_v54, 1 }
 0x32e   : > { %6149 = vrot.lane.b32.xlu0 %v6148_v19, %s6486_s20  ;;  %6144 = vrot.lane.b32.xlu1 %v6148_v19, %s6487_s21  ;;  %v3615_v37 = vsel %vm1502_vm6, %v3583_v32, %v5832_v21  ;;  %v2647_v40 = vrot.slane %v8094_v53, 1  ;;  %v2731_v16 = vsel %vm562_vm2, %v2728_v35, %v2730_v56 }
 0x32f   : > { %v2651_v21 = vsel %vm481_vm3, %v2648_v48, %v2650_v36  ;;  %v6421_v36 = vld [vmem:[#allocation2 + $0x180] sm:$0xff] }
 0x330   : > { %v5870_v39 = vpop.permute.xlu0 %5869  ;;  %v5865_v4 = vpop.permute.xlu1 %5864 }
 0x331   : > { %v5872_v42 = vunpack.i.h.bf16 %v5870_v39  ;;  %v5871_v2 = vunpack.i.l.bf16 %v5870_v39  ;;  %v5867_v63 = vunpack.i.h.bf16 %v5865_v4  ;;  %v5866_v19 = vunpack.i.l.bf16 %v5865_v4 }
 0x332   : > { %6164 = vrot.lane.b32.xlu0 %v6163_v59, %s6490_s28  ;;  %6154 = vrot.lane.b32.xlu1 %v6163_v59, %s6488_s26 }
 0x333   : > { %v3741_v26 = vsel %vm1634_vm10, %v3709_v1, %v5867_v63  ;;  %v3740_v58 = vsel %vm1634_vm10, %v3708_v45, %v5866_v19  ;;  %v3582_v63 = vsel %vm1469_vm5, %v3550_v31, %v5791_v30 }
 0x334   : > { %v3773_v50 = vsel %vm1667_vm11, %v3741_v26, %v5872_v42  ;;  %v3772_v38 = vsel %vm1667_vm11, %v3740_v58, %v5871_v2  ;;  %v5885_v27 = vpop.permute.xlu0 %5884  ;;  %v8138_v0 = vpop.permute.xlu1 %5874  ;;  %v2727_v2 = vrot.slane %v8094_v53, 2  ;;  %v5822_v42 = vunpack.i.h.bf16 %v8026_v17 }
 0x335   : > { %v3803_v47 = vpack.c.bf16 %v3773_v50, %v3772_v38  ;;  %v5887_v39 = vunpack.i.h.bf16 %v5885_v27  ;;  %v5886_v4 = vunpack.i.l.bf16 %v5885_v27  ;;  %v3614_v33 = vsel %vm1502_vm6, %v3582_v63, %v5831_v6 }
 0x336   : > { %6169 = vrot.lane.b32.xlu0 %v6168_v9, %s6491_s29  ;;  %6159 = vrot.lane.b32.xlu1 %v6168_v9, %s6489_s27  ;;  %v2729_v30 = vsel %vm562_vm2, %v2727_v2, %v2728_v35  ;;  %v2649_v26 = vsel %vm481_vm3, %v2647_v40, %v2648_v48  ;;  %v5821_v6 = vunpack.i.l.bf16 %v8026_v17  ;;  %v8953_v17 = vrot.slane %v8046_v61, 1 }
 0x337   : > { %5007 = vmatmul.mubr.msk.bf16.vlgmr.msra.gmra.mrb[32].mxu1 %vm1736_vm12, %v3803_v47  ;;  %v3647_v58 = vsel %vm1535_vm7, %v3615_v37, %v5887_v39  ;;  %v3646_v50 = vsel %vm1535_vm7, %v3614_v33, %v5886_v4  ;;  %v8952_v47 = vrot.slane %v8075_v25, 1  ;;  %v2335_v63 = vrot.slane %v6421_v36, 1 }
 0x338   : > { %v5890_v54 = vpop.permute.xlu0 %5889  ;;  %v8151_v31 = vpop.permute.xlu1 %5879  ;;  %v6188_v4 = vpack.i.bf16 %v2731_v16, %v2729_v30  ;;  %v6183_v2 = vpack.i.bf16 %v2651_v21, %v2649_v26  ;;  %v5847_v25 = vunpack.i.h.bf16 %v8052_v55  ;;  %v5846_v61 = vunpack.i.l.bf16 %v8052_v55  ;;  %v6422_v30 = vld [vmem:[#allocation2 + $0x188] sm:$0xff] }
 0x339   : > { %v5892_v19 = vunpack.i.h.bf16 %v5890_v54  ;;  %v5891_v1 = vunpack.i.l.bf16 %v5890_v54  ;;  %v4994_v45 = vpop.f32.mrb[24].mxu1  ;;  %v2324_v48 = vsel %vm481_vm3, %v8953_v17, %v8952_v47  ;;  %v5852_v54 = vunpack.i.h.bf16 %v8079_v5  ;;  %v6426_v17 = vld [vmem:[#allocation2 + $0x178] sm:$0x3] }
 0x33a   : > { %v2398_v38 = vadd.f32 %v4994_v45, %v8059_v11  ;;  %6179 = vrot.lane.b32.xlu0 %v6168_v9, %s6484_s18  ;;  %6174 = vrot.lane.b32.xlu1 %v6163_v59, %s6485_s19  ;;  %v2181_v35 = vpop.f32.mrb[25].mxu1  ;;  %v2336_v16 = vrot.slane %v6422_v30, 1 }
 0x33b   : > { %v3678_v56 = vsel %vm1568_vm8, %v3646_v50, %v5891_v1  ;;  %v3679_v27 = vsel %vm1568_vm8, %v3647_v58, %v5892_v19  ;;  %v4995_v32 = vpop.f32.mrb[26].mxu1  ;;  %v2396_v37 = vadd.f32 %v8073_v52, %v2181_v35  ;;  %v5876_v1 = vunpack.i.l.bf16 %v8138_v0  ;;  %v6423_v58 = vld [vmem:[#allocation2 + $0x168] sm:$0xff] }
 0x33c   : > { %v3710_v11 = vsel %vm1601_vm9, %v3678_v56, %v5821_v6  ;;  %v3711_v9 = vsel %vm1601_vm9, %v3679_v27, %v5822_v42  ;;  %2430 = vst.msk [vmem:[#allocation2 + $0x151] sm:$0xff] %vm172_vm0, %v2398_v38  ;;  %v8173_v59 = vpop.permute.xlu0 %5899  ;;  %v8175_v39 = vpop.permute.xlu1 %5894  ;;  %v2399_v33 = vadd.f32 %v4995_v32, %v8097_v43  ;;  %v5851_v42 = vunpack.i.l.bf16 %v8079_v5  ;;  %v6424_v38 = vld [vmem:[#allocation2 + $0x170] sm:$0xff] }
 0x33d   : > { %v2184_v40 = vpop.f32.mrb[27].mxu1  ;;  %2428 = vst.msk [vmem:[#allocation2 + $0x139] sm:$0xff] %vm172_vm0, %v2396_v37  ;;  %v3742_v55 = vsel %vm1634_vm10, %v3710_v11, %v5846_v61  ;;  %v3743_v52 = vsel %vm1634_vm10, %v3711_v9, %v5847_v25  ;;  %v5881_v43 = vunpack.i.l.bf16 %v8151_v31  ;;  %v5877_v6 = vunpack.i.h.bf16 %v8138_v0  ;;  %v6425_v32 = vld [vmem:[#allocation2 + $0x190] sm:$0x3] }
 0x33e   : > { %v2397_v19 = vadd.f32 %v2324_v48, %v2184_v40  ;;  %6189 = vrot.lane.b32.xlu0 %v6188_v4, %s6491_s29  ;;  %6184 = vrot.lane.b32.xlu1 %v6183_v2, %s6490_s28  ;;  %2431 = vst.msk [vmem:[#allocation2 + $0x159] sm:$0xff] %vm172_vm0, %v2399_v33  ;;  %v3774_v26 = vsel %vm1667_vm11, %v3742_v55, %v5851_v42  ;;  %v2330_v50 = vrot.slane %v6423_v58, 1  ;;  %v2331_v35 = vrot.slane %v6424_v38, 1 }
 0x33f   : > { %v3775_v21 = vsel %vm1667_vm11, %v3743_v52, %v5852_v54  ;;  %v5882_v56 = vunpack.i.h.bf16 %v8151_v31  ;;  %v2338_v47 = vrot.slane %v6425_v32, 1  ;;  %v2333_v48 = vrot.slane %v6426_v17, 1 }
 0x340   : > { %2429 = vst.msk [vmem:[#allocation2 + $0x141] sm:$0xff] %vm172_vm0, %v2397_v19  ;;  %v8192_v5 = vpop.permute.xlu0 %5909  ;;  %v8194_v45 = vpop.permute.xlu1 %5904  ;;  %v3804_v27 = vpack.c.bf16 %v3775_v21, %v3774_v26  ;;  %v3552_v36 = vsel %vm172_vm0, %v7764_v46, %v5876_v1  ;;  %v8211_v31 = vsel %vm481_vm3, %v2335_v63, %v2336_v16  ;;  %v5856_v25 = vunpack.i.l.bf16 %v8105_v13 }
 0x341   : > { %v3584_v0 = vsel %vm1469_vm5, %v3552_v36, %v5881_v43  ;;  %v3553_v61 = vsel %vm172_vm0, %v7759_v29, %v5877_v6  ;;  %v8218_v46 = vsel %vm481_vm3, %v2330_v50, %v2331_v35  ;;  %v8224_v54 = vsel %vm481_vm3, %v2336_v16, %v2338_v47 }
 0x342   : > { %6204 = vrot.lane.b32.xlu0 %v6183_v2, %s6488_s26  ;;  %6194 = vrot.lane.b32.xlu1 %v6183_v2, %s6485_s19  ;;  %v5816_v2 = vunpack.i.l.bf16 %v8028_v22  ;;  %v3585_v33 = vsel %vm1469_vm5, %v3553_v61, %v5882_v56  ;;  %v8227_v42 = vsel %vm481_vm3, %v2331_v35, %v2333_v48  ;;  %v5817_v29 = vunpack.i.h.bf16 %v8028_v22 }
 0x343   : > { %5010 = vmatprep.mubr.msk.bf16.mxu1 %vm1736_vm12, %v3804_v27  ;;  %v2478_v37 = vld [vmem:[#allocation2 + $0x150] sm:$0xff]  ;;  %v5837_v52 = vunpack.i.h.bf16 %v8054_v8  ;;  %v5842_v43 = vunpack.i.h.bf16 %v8081_v7  ;;  %v5861_v22 = vunpack.i.l.bf16 %v8103_v28  ;;  %v5857_v6 = vunpack.i.h.bf16 %v8105_v13 }
 0x344   : > { %v8206_v11 = vpop.permute.xlu0 %5924  ;;  %v8208_v9 = vpop.permute.xlu1 %5914  ;;  %v3616_v19 = vsel %vm1502_vm6, %v3584_v0, %v5816_v2  ;;  %v8240_v21 = vmax.f32 %v2478_v37, 0.0  ;;  %v3554_v58 = vsel %vm172_vm0, %v7753_v10, %v5856_v25  ;;  %v3617_v50 = vsel %vm1502_vm6, %v3585_v33, %v5817_v29  ;;  %v2475_v38 = vld [vmem:[#allocation2 + $0x138] sm:$0xff] }
 0x345   : > { %v2479_v40 = vld [vmem:[#allocation2 + $0x158] sm:$0xff]  ;;  %v2480_v63 = vld [vmem:[#allocation2 + $0x160] sm:$0x3]  ;;  %v5841_v27 = vunpack.i.l.bf16 %v8081_v7  ;;  %v5862_v32 = vunpack.i.h.bf16 %v8103_v28  ;;  %v3649_v17 = vsel %vm1535_vm7, %v3617_v50, %v5837_v52  ;;  %v5907_v10 = vunpack.i.h.bf16 %v8194_v45 }
 0x346   : > { %6209 = vrot.lane.b32.xlu0 %v6188_v4, %s6489_s27  ;;  %6199 = vrot.lane.b32.xlu1 %v6188_v4, %s6484_s18  ;;  %v8231_v30 = vmax.f32 %v2479_v40, 0.0  ;;  %v2534_v55 = vmax.f32 %v2480_v63, 0.0  ;;  %v5836_v4 = vunpack.i.l.bf16 %v8054_v8  ;;  %v5906_v48 = vunpack.i.l.bf16 %v8194_v45 }
 0x347   : > { %v2476_v1 = vld [vmem:[#allocation2 + $0x140] sm:$0xff]  ;;  %v8264_v7 = vmax.f32 %v2475_v38, 0.0  ;;  %v3555_v28 = vsel %vm172_vm0, %v7755_v62, %v5857_v6  ;;  %v3586_v2 = vsel %vm1469_vm5, %v3554_v58, %v5861_v22  ;;  %v2662_v61 = vrot.slane %v8240_v21, 1  ;;  %v2477_v45 = vld [vmem:[#allocation2 + $0x148] sm:$0x3] }
 0x348   : > { %v8236_v26 = vpop.permute.xlu0 %5929  ;;  %v8238_v16 = vpop.permute.xlu1 %5919  ;;  %v3648_v8 = vsel %vm1535_vm7, %v3616_v19, %v5836_v4  ;;  %v6218_v35 = vpack.i.bf16 %v8231_v30, %v8240_v21  ;;  %v8250_v56 = vmax.f32 %v2476_v1, 0.0  ;;  %v2663_v47 = vrot.slane %v8231_v30, 1 }
 0x349   : > { %v2665_v13 = vrot.slane %v2534_v55, 1  ;;  %v3680_v25 = vsel %vm1568_vm8, %v3648_v8, %v5841_v27  ;;  %v2743_v33 = vrot.slane %v8231_v30, 2  ;;  %v2745_v40 = vrot.slane %v2534_v55, 2 }
 0x34a   : > { %6219 = vrot.lane.b32.xlu0 %v6218_v35, %s6487_s21  ;;  %6214 = vrot.lane.b32.xlu1 %v6218_v35, %s6486_s20  ;;  %v6228_v37 = vpack.i.bf16 %v8250_v56, %v8264_v7  ;;  %v5912_v63 = vunpack.i.h.bf16 %v8192_v5  ;;  %v3681_v29 = vsel %vm1568_vm8, %v3649_v17, %v5842_v43  ;;  %v2664_v19 = vsel %vm481_vm3, %v2662_v61, %v2663_v47 }
 0x34b   : > { %v2666_v62 = vsel %vm481_vm3, %v2663_v47, %v2665_v13  ;;  %v3713_v1 = vsel %vm1601_vm9, %v3681_v29, %v5907_v10  ;;  %v3712_v52 = vsel %vm1601_vm9, %v3680_v25, %v5906_v48  ;;  %v2742_v55 = vrot.slane %v8240_v21, 2 }
 0x34c   : > { %v8260_v36 = vpop.permute.xlu0 %5939  ;;  %v8262_v0 = vpop.permute.xlu1 %5934  ;;  %v2531_v6 = vmax.f32 %v2477_v45, 0.0  ;;  %v6243_v8 = vpack.i.bf16 %v2666_v62, %v2664_v19  ;;  %v2746_v27 = vsel %vm562_vm2, %v2743_v33, %v2745_v40  ;;  %v3587_v47 = vsel %vm1469_vm5, %v3555_v28, %v5862_v32 }
 0x34d   : > { %v2744_v35 = vsel %vm562_vm2, %v2742_v55, %v2743_v33  ;;  %v5911_v13 = vunpack.i.l.bf16 %v8192_v5  ;;  %v5902_v48 = vunpack.i.h.bf16 %v8173_v59  ;;  %v5901_v25 = vunpack.i.l.bf16 %v8173_v59 }
 0x34e   : > { %6229 = vrot.lane.b32.xlu0 %v6228_v37, %s6486_s20  ;;  %6224 = vrot.lane.b32.xlu1 %v6228_v37, %s6487_s21  ;;  %v3619_v5 = vsel %vm1502_vm6, %v3587_v47, %v5912_v63  ;;  %v6248_v28 = vpack.i.bf16 %v2746_v27, %v2744_v35  ;;  %v2738_v33 = vrot.slane %v8250_v56, 2  ;;  %v2740_v40 = vrot.slane %v2531_v6, 2 }
 0x34f   : > { %v2660_v55 = vrot.slane %v2531_v6, 1 }
 0x350   : > { %v5950_v4 = vpop.permute.xlu0 %5949  ;;  %v5945_v22 = vpop.permute.xlu1 %5944 }
 0x351   : > { %v5952_v58 = vunpack.i.h.bf16 %v5950_v4  ;;  %v5951_v50 = vunpack.i.l.bf16 %v5950_v4  ;;  %v5947_v43 = vunpack.i.h.bf16 %v5945_v22  ;;  %v5946_v38 = vunpack.i.l.bf16 %v5945_v22 }
 0x352   : > { %6244 = vrot.lane.b32.xlu0 %v6243_v8, %s6490_s28  ;;  %6234 = vrot.lane.b32.xlu1 %v6243_v8, %s6488_s26  ;;  %v2737_v4 = vrot.slane %v8264_v7, 2  ;;  %v2658_v22 = vrot.slane %v8250_v56, 1 }
 0x353   : > { %v3745_v17 = vsel %vm1634_vm10, %v3713_v1, %v5947_v43  ;;  %v3744_v10 = vsel %vm1634_vm10, %v3712_v52, %v5946_v38  ;;  %v3618_v1 = vsel %vm1502_vm6, %v3586_v2, %v5911_v13  ;;  %v2657_v38 = vrot.slane %v8264_v7, 1 }
 0x354   : > { %v5965_v61 = vpop.permute.xlu0 %5964  ;;  %v8293_v45 = vpop.permute.xlu1 %5954  ;;  %v3776_v37 = vsel %vm1667_vm11, %v3744_v10, %v5951_v50  ;;  %v3777_v32 = vsel %vm1667_vm11, %v3745_v17, %v5952_v58  ;;  %v2739_v47 = vsel %vm562_vm2, %v2737_v4, %v2738_v33  ;;  %v2741_v17 = vsel %vm562_vm2, %v2738_v33, %v2740_v40 }
 0x355   : > { %v5967_v29 = vunpack.i.h.bf16 %v5965_v61  ;;  %v5966_v19 = vunpack.i.l.bf16 %v5965_v61  ;;  %v3805_v62 = vpack.c.bf16 %v3777_v32, %v3776_v37  ;;  %v2659_v37 = vsel %vm481_vm3, %v2657_v38, %v2658_v22 }
 0x356   : > { %v4998_v59 = vpop.f32.mrb[28].mxu1  ;;  %6249 = vrot.lane.b32.xlu0 %v6248_v28, %s6491_s29  ;;  %6239 = vrot.lane.b32.xlu1 %v6248_v28, %s6489_s27  ;;  %v2661_v32 = vsel %vm481_vm3, %v2658_v22, %v2660_v55  ;;  %v5932_v40 = vunpack.i.h.bf16 %v8236_v26 }
 0x357   : > { %v2197_v52 = vpop.f32.mrb[29].mxu1  ;;  %v2402_v63 = vadd.f32 %v4998_v59, %v8211_v31  ;;  %5011 = vmatmul.mubr.msk.bf16.gmra.mrb[36].mxu1 %vm1736_vm12, %v3805_v62  ;;  %v3651_v6 = vsel %vm1535_vm7, %v3619_v5, %v5967_v29  ;;  %v3650_v13 = vsel %vm1535_vm7, %v3618_v1, %v5966_v19  ;;  %v5927_v5 = vunpack.i.h.bf16 %v8206_v11 }
 0x358   : > { %v2400_v58 = vadd.f32 %v8218_v46, %v2197_v52  ;;  %v5970_v50 = vpop.permute.xlu0 %5969  ;;  %v5960_v43 = vpop.permute.xlu1 %5959  ;;  %v5926_v29 = vunpack.i.l.bf16 %v8206_v11  ;;  %v5931_v62 = vunpack.i.l.bf16 %v8236_v26  ;;  %v6268_v11 = vpack.i.bf16 %v2741_v17, %v2739_v47 }
 0x359   : > { %v5972_v2 = vunpack.i.h.bf16 %v5970_v50  ;;  %v5971_v35 = vunpack.i.l.bf16 %v5970_v50  ;;  %v4999_v27 = vpop.f32.mrb[30].mxu1  ;;  %2434 = vst.msk [vmem:[#allocation2 + $0x181] sm:$0xff] %vm172_vm0, %v2402_v63  ;;  %v6263_v52 = vpack.i.bf16 %v2661_v32, %v2659_v37  ;;  %v5962_v4 = vunpack.i.h.bf16 %v5960_v43 }
 0x35a   : > { %2432 = vst.msk [vmem:[#allocation2 + $0x169] sm:$0xff] %vm172_vm0, %v2400_v58  ;;  %v2403_v31 = vadd.f32 %v4999_v27, %v8224_v54  ;;  %v2200_v46 = vpop.f32.mrb[31].mxu1  ;;  %6259 = vrot.lane.b32.xlu0 %v6248_v28, %s6484_s18  ;;  %6254 = vrot.lane.b32.xlu1 %v6243_v8, %s6485_s19  ;;  %v5961_v22 = vunpack.i.l.bf16 %v5960_v43  ;;  %v5896_v27 = vunpack.i.l.bf16 %v8175_v39  ;;  %v5916_v17 = vunpack.i.l.bf16 %v8208_v9 }
 0x35b   : > { %v3682_v10 = vsel %vm1568_vm8, %v3650_v13, %v5971_v35  ;;  %v3683_v61 = vsel %vm1568_vm8, %v3651_v6, %v5972_v2  ;;  %v2401_v1 = vadd.f32 %v8227_v42, %v2200_v46  ;;  %v5897_v35 = vunpack.i.h.bf16 %v8175_v39 }
 0x35c   : > { %v3714_v19 = vsel %vm1601_vm9, %v3682_v10, %v5901_v25  ;;  %v3715_v59 = vsel %vm1601_vm9, %v3683_v61, %v5902_v48  ;;  %2435 = vst.msk [vmem:[#allocation2 + $0x189] sm:$0xff] %vm172_vm0, %v2403_v31  ;;  %v8325_v54 = vpop.permute.xlu0 %5979  ;;  %v8327_v33 = vpop.permute.xlu1 %5974  ;;  %v5957_v25 = vunpack.i.h.bf16 %v8293_v45  ;;  %v5956_v48 = vunpack.i.l.bf16 %v8293_v45 }
 0x35d   : > { %v3746_v28 = vsel %vm1634_vm10, %v3714_v19, %v5926_v29  ;;  %2433 = vst.msk [vmem:[#allocation2 + $0x171] sm:$0xff] %vm172_vm0, %v2401_v1  ;;  %v3747_v55 = vsel %vm1634_vm10, %v3715_v59, %v5927_v5  ;;  %v5917_v39 = vunpack.i.h.bf16 %v8208_v9  ;;  %v5922_v37 = vunpack.i.h.bf16 %v8238_v16 }
 0x35e   : > { %v3778_v26 = vsel %vm1667_vm11, %v3746_v28, %v5931_v62  ;;  %6269 = vrot.lane.b32.xlu0 %v6268_v11, %s6491_s29  ;;  %v3779_v63 = vsel %vm1667_vm11, %v3747_v55, %v5932_v40  ;;  %6264 = vrot.lane.b32.xlu1 %v6263_v52, %s6490_s28  ;;  %v3557_v45 = vsel %vm172_vm0, %v7822_v15, %v5957_v25  ;;  %v5937_v59 = vunpack.i.h.bf16 %v8262_v0 }
 0x35f   : > { %v3556_v58 = vsel %vm172_vm0, %v7827_v14, %v5956_v48  ;;  %v3806_v50 = vpack.c.bf16 %v3779_v63, %v3778_v26  ;;  %v3589_v38 = vsel %vm1469_vm5, %v3557_v45, %v5962_v4  ;;  %v5921_v4 = vunpack.i.l.bf16 %v8238_v16 }
 0x360   : > { %v8340_v42 = vpop.permute.xlu0 %5989  ;;  %v5985_v8 = vpop.permute.xlu1 %5984  ;;  %v3588_v43 = vsel %vm1469_vm5, %v3556_v58, %v5961_v22  ;;  %v2484_v14 = vld [vmem:[#allocation2 + $0x180] sm:$0xff]  ;;  %v3621_v31 = vsel %vm1502_vm6, %v3589_v38, %v5897_v35  ;;  %v5942_v26 = vunpack.i.h.bf16 %v8260_v36  ;;  %v5941_v63 = vunpack.i.l.bf16 %v8260_v36 }
 0x361   : > { %5014 = vmatprep.mubr.msk.bf16.mxu1 %vm1736_vm12, %v3806_v50  ;;  %v3620_v13 = vsel %vm1502_vm6, %v3588_v43, %v5896_v27  ;;  %v2538_v29 = vmax.f32 %v2484_v14, 0.0  ;;  %v3653_v62 = vsel %vm1535_vm7, %v3621_v31, %v5917_v39  ;;  %v5987_v1 = vunpack.i.h.bf16 %v5985_v8  ;;  %v2481_v9 = vld [vmem:[#allocation2 + $0x168] sm:$0xff] }
 0x362   : > { %6284 = vrot.lane.b32.xlu0 %v6263_v52, %s6488_s26  ;;  %6274 = vrot.lane.b32.xlu1 %v6263_v52, %s6485_s19  ;;  %v3652_v40 = vsel %vm1535_vm7, %v3620_v13, %v5916_v17  ;;  %v5986_v25 = vunpack.i.l.bf16 %v5985_v8  ;;  %v8387_v8 = vmax.f32 %v2481_v9, 0.0  ;;  %v3559_v50 = vsel %vm172_vm0, %v7818_v20, %v5937_v59 }
 0x363   : > { %v2485_v2 = vld [vmem:[#allocation2 + $0x188] sm:$0xff]  ;;  %v2486_v6 = vld [vmem:[#allocation2 + $0x190] sm:$0x3]  ;;  %v2755_v58 = vrot.slane %v2538_v29, 1  ;;  %v5936_v16 = vunpack.i.l.bf16 %v8262_v0  ;;  %v3684_v43 = vsel %vm1568_vm8, %v3652_v40, %v5921_v4  ;;  %v3685_v38 = vsel %vm1568_vm8, %v3653_v62, %v5922_v37 }
 0x364   : > { %v8354_v47 = vpop.permute.xlu0 %6004  ;;  %v8356_v15 = vpop.permute.xlu1 %5994  ;;  %v8361_v46 = vmax.f32 %v2485_v2, 0.0  ;;  %v2482_v10 = vld [vmem:[#allocation2 + $0x170] sm:$0xff]  ;;  %v2540_v61 = vmax.f32 %v2486_v6, 0.0  ;;  %v2483_v19 = vld [vmem:[#allocation2 + $0x178] sm:$0x3]  ;;  %v3717_v36 = vsel %vm1601_vm9, %v3685_v38, %v5987_v1  ;;  %v3716_v2 = vsel %vm1601_vm9, %v3684_v43, %v5986_v25 }
 0x365   : > { %v8376_v52 = vmax.f32 %v2482_v10, 0.0  ;;  %v2537_v55 = vmax.f32 %v2483_v19, 0.0  ;;  %v2760_v31 = vrot.slane %v2538_v29, 2  ;;  %v2747_v10 = vrot.slane %v8387_v8, 2 }
 0x366   : > { %6289 = vrot.lane.b32.xlu0 %v6268_v11, %s6489_s27  ;;  %6279 = vrot.lane.b32.xlu1 %v6268_v11, %s6484_s18  ;;  %v6298_v48 = vpack.i.bf16 %v8361_v46, %v2538_v29  ;;  %v2756_v28 = vrot.slane %v8361_v46, 1  ;;  %v2758_v22 = vrot.slane %v2540_v61, 1  ;;  %v2761_v39 = vrot.slane %v8361_v46, 2 }
 0x367   : > { %v6308_v35 = vpack.i.bf16 %v8376_v52, %v8387_v8  ;;  %v2748_v20 = vrot.slane %v8376_v52, 2  ;;  %v2750_v0 = vrot.slane %v2537_v55, 2  ;;  %v2763_v17 = vrot.slane %v2540_v61, 2 }
 0x368   : > { %v8367_v32 = vpop.permute.xlu0 %6009  ;;  %v8369_v5 = vpop.permute.xlu1 %5999  ;;  %v2757_v27 = vsel %vm481_vm3, %v2755_v58, %v2756_v28  ;;  %v2759_v6 = vsel %vm481_vm3, %v2756_v28, %v2758_v22  ;;  %v2668_v1 = vrot.slane %v8376_v52, 1  ;;  %v2670_v9 = vrot.slane %v2537_v55, 1 }
 0x369   : > { %v6323_v62 = vpack.i.bf16 %v2759_v6, %v2757_v27  ;;  %v2749_v29 = vsel %vm562_vm2, %v2747_v10, %v2748_v20  ;;  %v2751_v46 = vsel %vm562_vm2, %v2748_v20, %v2750_v0  ;;  %v2762_v4 = vsel %vm562_vm2, %v2760_v31, %v2761_v39 }
 0x36a   : > { %6299 = vrot.lane.b32.xlu0 %v6298_v48, %s6487_s21  ;;  %6294 = vrot.lane.b32.xlu1 %v6298_v48, %s6486_s20  ;;  %v2764_v22 = vsel %vm562_vm2, %v2761_v39, %v2763_v17  ;;  %v3558_v43 = vsel %vm172_vm0, %v7816_v3, %v5936_v16  ;;  %v5992_v38 = vunpack.i.h.bf16 %v8340_v42  ;;  %v6333_v20 = vpack.i.bf16 %v2751_v46, %v2749_v29 }
 0x36b   : > { %v2671_v31 = vsel %vm481_vm3, %v2668_v1, %v2670_v9  ;;  %v5982_v3 = vunpack.i.h.bf16 %v8325_v54  ;;  %v3590_v16 = vsel %vm1469_vm5, %v3558_v43, %v5941_v63 }
 0x36c   : > { %v8383_v45 = vpop.permute.xlu0 %6019  ;;  %v8385_v11 = vpop.permute.xlu1 %6014 }
 0x36e   : > { %6309 = vrot.lane.b32.xlu0 %v6308_v35, %s6486_s20  ;;  %6304 = vrot.lane.b32.xlu1 %v6308_v35, %s6487_s21  ;;  %v2489_v35 = vld [vmem:[#allocation2 + $0x1a8] sm:$0x3]  ;;  %s8810_s20 = scalar_lea.vmem %s8938_s3, %s4776_s17 }
 0x36f   : > { %v2543_v10 = vmax.f32 %v2489_v35, 0.0 }
 0x370   : > { %v6030_v14 = vpop.permute.xlu0 %6029  ;;  %v6025_v13 = vpop.permute.xlu1 %6024 }
 0x371   : > { %v6032_v37 = vunpack.i.h.bf16 %v6030_v14  ;;  %v6031_v19 = vunpack.i.l.bf16 %v6030_v14  ;;  %v6027_v59 = vunpack.i.h.bf16 %v6025_v13  ;;  %v6026_v40 = vunpack.i.l.bf16 %v6025_v13 }
 0x372   : > { %6324 = vrot.lane.b32.xlu0 %v6323_v62, %s6490_s28  ;;  %6314 = vrot.lane.b32.xlu1 %v6323_v62, %s6488_s26  ;;  %v6318_v14 = vpack.i.bf16 %v2764_v22, %v2762_v4  ;;  %v5981_v62 = vunpack.i.l.bf16 %v8325_v54  ;;  %v6012_v4 = vunpack.i.h.bf16 %v8367_v32  ;;  %v6011_v22 = vunpack.i.l.bf16 %v8367_v32 }
 0x373   : > { %v3749_v25 = vsel %vm1634_vm10, %v3717_v36, %v6027_v59  ;;  %v3748_v48 = vsel %vm1634_vm10, %v3716_v2, %v6026_v40  ;;  %v5991_v36 = vunpack.i.l.bf16 %v8340_v42  ;;  %v2667_v2 = vrot.slane %v8387_v8, 1 }
 0x374   : > { %v6045_v61 = vpop.permute.xlu0 %6044  ;;  %v8412_v28 = vpop.permute.xlu1 %6034  ;;  %v3780_v58 = vsel %vm1667_vm11, %v3748_v48, %v6031_v19  ;;  %v3781_v55 = vsel %vm1667_vm11, %v3749_v25, %v6032_v37  ;;  %v3591_v42 = vsel %vm1469_vm5, %v3559_v50, %v5942_v26  ;;  %v6007_v25 = vunpack.i.h.bf16 %v8354_v47 }
 0x375   : > { %v6047_v27 = vunpack.i.h.bf16 %v6045_v61  ;;  %v6046_v6 = vunpack.i.l.bf16 %v6045_v61  ;;  %v3807_v0 = vpack.c.bf16 %v3781_v55, %v3780_v58  ;;  %v2669_v13 = vsel %vm481_vm3, %v2667_v2, %v2668_v1 }
 0x376   : > { %6334 = vrot.lane.b32.xlu0 %v6333_v20, %s6491_s29  ;;  %v3623_v37 = vsel %vm1502_vm6, %v3591_v42, %v5992_v38  ;;  %v3622_v19 = vsel %vm1502_vm6, %v3590_v16, %v5991_v36  ;;  %6319 = vrot.lane.b32.xlu1 %v6318_v14, %s6489_s27  ;;  %v6353_v50 = vpack.i.bf16 %v2671_v31, %v2669_v13  ;;  %v6006_v48 = vunpack.i.l.bf16 %v8354_v47 }
 0x377   : > { %5015 = vmatmul.mubr.msk.bf16.gmra.mrb[40].mxu1 %vm1736_vm12, %v3807_v0  ;;  %v3655_v63 = vsel %vm1535_vm7, %v3623_v37, %v6047_v27  ;;  %v3654_v26 = vsel %vm1535_vm7, %v3622_v19, %v6046_v6  ;;  %v2771_v58 = vrot.slane %v2543_v10, 1  ;;  %v6037_v27 = vunpack.i.h.bf16 %v8412_v28 }
 0x378   : > { %v6050_v39 = vpop.permute.xlu0 %6049  ;;  %v6040_v17 = vpop.permute.xlu1 %6039  ;;  %v6036_v6 = vunpack.i.l.bf16 %v8412_v28  ;;  %v2776_v0 = vrot.slane %v2543_v10, 2  ;;  %v5977_v10 = vunpack.i.h.bf16 %v8327_v33  ;;  %v5976_v37 = vunpack.i.l.bf16 %v8327_v33 }
 0x379   : > { %v6052_v59 = vunpack.i.h.bf16 %v6050_v39  ;;  %v6051_v40 = vunpack.i.l.bf16 %v6050_v39  ;;  %v2772_v32 = vsel %vm481_vm3, %v7348_v18, %v2771_v58  ;;  %v6042_v13 = vunpack.i.h.bf16 %v6040_v17 }
 0x37a   : > { %6354 = vrot.lane.b32.xlu0 %v6353_v50, %s6488_s26  ;;  %6329 = vrot.lane.b32.xlu1 %v6353_v50, %s6490_s28  ;;  %v6041_v31 = vunpack.i.l.bf16 %v6040_v17  ;;  %v6348_v42 = vpack.i.bf16 %v2772_v32, %v7366_v44  ;;  %v3561_v18 = vsel %vm172_vm0, %v7874_v49, %v6037_v27  ;;  %v3560_v28 = vsel %vm172_vm0, %v7879_v57, %v6036_v6 }
 0x37b   : > { %v3686_v1 = vsel %vm1568_vm8, %v3654_v26, %v6051_v40  ;;  %v3687_v9 = vsel %vm1568_vm8, %v3655_v63, %v6052_v59  ;;  %v2777_v39 = vsel %vm562_vm2, %v7398_v51, %v2776_v0  ;;  %v5997_v19 = vunpack.i.h.bf16 %v8356_v15 }
 0x37c   : > { %v3718_v29 = vsel %vm1601_vm9, %v3686_v1, %v5981_v62  ;;  %v3719_v46 = vsel %vm1601_vm9, %v3687_v9, %v5982_v3  ;;  %v8444_v54 = vpop.permute.xlu0 %6059  ;;  %v8446_v61 = vpop.permute.xlu1 %6054  ;;  %v3592_v17 = vsel %vm1469_vm5, %v3560_v28, %v6041_v31  ;;  %v6368_v49 = vpack.i.bf16 %v2777_v39, %v7459_v24 }
 0x37d   : > { %v3750_v55 = vsel %vm1634_vm10, %v3718_v29, %v6006_v48  ;;  %v3751_v47 = vsel %vm1634_vm10, %v3719_v46, %v6007_v25  ;;  %v3624_v57 = vsel %vm1502_vm6, %v3592_v17, %v5976_v37  ;;  %v5996_v59 = vunpack.i.l.bf16 %v8356_v15 }
 0x37e   : > { %v3782_v43 = vsel %vm1667_vm11, %v3750_v55, %v6011_v22  ;;  %v3783_v38 = vsel %vm1667_vm11, %v3751_v47, %v6012_v4  ;;  %6359 = vrot.lane.b32.xlu0 %v6333_v20, %s6489_s27  ;;  %6339 = vrot.lane.b32.xlu1 %v6353_v50, %s6485_s19  ;;  %v6002_v24 = vunpack.i.h.bf16 %v8369_v5  ;;  %v6001_v26 = vunpack.i.l.bf16 %v8369_v5  ;;  %v4756_v4 = vld [vmem:[%s8937_s2 + $0x4] sm:$0xf] }
 0x37f   : > { %v3808_v35 = vpack.c.bf16 %v3783_v38, %v3782_v43  ;;  %v3656_v33 = vsel %vm1535_vm7, %v3624_v57, %v5996_v59  ;;  %v6017_v9 = vunpack.i.h.bf16 %v8385_v11  ;;  %v6016_v15 = vunpack.i.l.bf16 %v8385_v11  ;;  %5075 = vmatprep.subr.msk.bf16.mxu0 %vm2047_vm13, %v4756_v4 }
 0x380   : > { %v8456_v36 = vpop.permute.xlu0 %6069  ;;  %v6065_v2 = vpop.permute.xlu1 %6064  ;;  %v3688_v25 = vsel %vm1568_vm8, %v3656_v33, %v6001_v26  ;;  %v4150_v43 = vsel %vm2047_vm13, %v4756_v4, 0  ;;  %v6021_v32 = vunpack.i.l.bf16 %v8383_v45 }
 0x381   : > { %5018 = vmatprep.mubr.msk.bf16.mxu1 %vm1736_vm12, %v3808_v35  ;;  %v6067_v50 = vunpack.i.h.bf16 %v6065_v2  ;;  %v6066_v1 = vunpack.i.l.bf16 %v6065_v2  ;;  %5039 = vmatpush3.bf16.msra.mxu0 %v4150_v43  ;;  %v6022_v35 = vunpack.i.h.bf16 %v8383_v45  ;;  %v3563_v31 = vsel %vm172_vm0, %v7870_v41, %v6017_v9 }
 0x382   : > { %6364 = vrot.lane.b32.xlu0 %v6318_v14, %s6491_s29  ;;  %6344 = vrot.lane.b32.xlu1 %v6333_v20, %s6484_s18  ;;  %v3593_v14 = vsel %vm1469_vm5, %v3561_v18, %v6042_v13  ;;  %v6072_v18 = vunpack.i.h.bf16 %v8456_v36  ;;  %v6071_v28 = vunpack.i.l.bf16 %v8456_v36  ;;  %v6061_v36 = vunpack.i.l.bf16 %v8444_v54 }
 0x383   : > { %v3625_v51 = vsel %vm1502_vm6, %v3593_v14, %v5977_v10  ;;  %v3720_v11 = vsel %vm1601_vm9, %v3688_v25, %v6066_v1  ;;  %v3595_v10 = vsel %vm1469_vm5, %v3563_v31, %v6022_v35 }
 0x384   : > { %v8465_v3 = vpop.permute.xlu0 %6084  ;;  %v8467_v16 = vpop.permute.xlu1 %6074  ;;  %v3657_v63 = vsel %vm1535_vm7, %v3625_v51, %v5997_v19  ;;  %v3627_v41 = vsel %vm1502_vm6, %v3595_v10, %v6072_v18  ;;  %v6062_v19 = vunpack.i.h.bf16 %v8444_v54 }
 0x385   : > { %v3689_v48 = vsel %vm1568_vm8, %v3657_v63, %v6002_v24  ;;  %v6087_v26 = vunpack.i.h.bf16 %v8465_v3 }
 0x386   : > { %6349 = vrot.lane.b32.xlu1 %v6348_v42, %s6490_s28  ;;  %v3721_v47 = vsel %vm1601_vm9, %v3689_v48, %v6067_v50  ;;  %v3562_v42 = vsel %vm172_vm0, %v7868_v12, %v6016_v15  ;;  %v6086_v50 = vunpack.i.l.bf16 %v8465_v3 }
 0x387   : > { %v3594_v45 = vsel %vm1469_vm5, %v3562_v42, %v6021_v32 }
 0x388   : > { %v8481_v20 = vpop.permute.xlu0 %6089  ;;  %v8483_v44 = vpop.permute.xlu1 %6079  ;;  %v3626_v57 = vsel %vm1502_vm6, %v3594_v45, %v6071_v28 }
 0x389   : > { %v6092_v54 = vunpack.i.h.bf16 %v8481_v20  ;;  %v6091_v48 = vunpack.i.l.bf16 %v8481_v20  ;;  %v6081_v45 = vunpack.i.l.bf16 %v8483_v44 }
 0x38a   : > { %6369 = vrot.lane.b32.xlu1 %v6368_v49, %s6491_s29 }
 0x38c   : > { %v8491_v40 = vpop.permute.xlu0 %6099  ;;  %v8493_v62 = vpop.permute.xlu1 %6094 }
 0x390   : > { %v6110_v29 = vpop.permute.xlu0 %6109  ;;  %v6105_v46 = vpop.permute.xlu1 %6104 }
 0x391   : > { %v6112_v22 = vunpack.i.h.bf16 %v6110_v29  ;;  %v6111_v58 = vunpack.i.l.bf16 %v6110_v29  ;;  %v6107_v55 = vunpack.i.h.bf16 %v6105_v46  ;;  %v6106_v5 = vunpack.i.l.bf16 %v6105_v46 }
 0x393   : > { %v3753_v38 = vsel %vm1634_vm10, %v3721_v47, %v6107_v55  ;;  %v3752_v2 = vsel %vm1634_vm10, %v3720_v11, %v6106_v5 }
 0x394   : > { %v6125_v27 = vpop.permute.xlu0 %6124  ;;  %v6115_v6 = vpop.permute.xlu1 %6114  ;;  %v3784_v0 = vsel %vm1667_vm11, %v3752_v2, %v6111_v58  ;;  %v3785_v13 = vsel %vm1667_vm11, %v3753_v38, %v6112_v22 }
 0x395   : > { %v6127_v39 = vunpack.i.h.bf16 %v6125_v27  ;;  %v6126_v17 = vunpack.i.l.bf16 %v6125_v27  ;;  %v3809_v14 = vpack.c.bf16 %v3785_v13, %v3784_v0  ;;  %v6117_v5 = vunpack.i.h.bf16 %v6115_v6 }
 0x396   : > { %v6116_v47 = vunpack.i.l.bf16 %v6115_v6  ;;  %v6057_v6 = vunpack.i.h.bf16 %v8446_v61  ;;  %v6056_v0 = vunpack.i.l.bf16 %v8446_v61 }
 0x397   : > { %5019 = vmatmul.mubr.msk.bf16.gmra.mrb[44].mxu1 %vm1736_vm12, %v3809_v14  ;;  %v3659_v59 = vsel %vm1535_vm7, %v3627_v41, %v6127_v39  ;;  %v3658_v33 = vsel %vm1535_vm7, %v3626_v57, %v6126_v17  ;;  %v3565_v2 = vsel %vm172_vm0, %v7948_v23, %v6117_v5  ;;  %v6077_v23 = vunpack.i.h.bf16 %v8467_v16 }
 0x398   : > { %v6130_v37 = vpop.permute.xlu0 %6129  ;;  %v6120_v49 = vpop.permute.xlu1 %6119  ;;  %v3564_v35 = vsel %vm172_vm0, %v7959_v34, %v6116_v47  ;;  %v6076_v34 = vunpack.i.l.bf16 %v8467_v16  ;;  %v6082_v14 = vunpack.i.h.bf16 %v8483_v44  ;;  %v6096_v41 = vunpack.i.l.bf16 %v8493_v62 }
 0x399   : > { %v6132_v12 = vunpack.i.h.bf16 %v6130_v37  ;;  %v6131_v51 = vunpack.i.l.bf16 %v6130_v37  ;;  %v6122_v11 = vunpack.i.h.bf16 %v6120_v49  ;;  %v6121_v43 = vunpack.i.l.bf16 %v6120_v49 }
 0x39a   : > { %v6097_v49 = vunpack.i.h.bf16 %v8493_v62  ;;  %v6102_v62 = vunpack.i.h.bf16 %v8491_v40 }
 0x39b   : > { %v3690_v63 = vsel %vm1568_vm8, %v3658_v33, %v6131_v51  ;;  %v3691_v24 = vsel %vm1568_vm8, %v3659_v59, %v6132_v12  ;;  %v3596_v32 = vsel %vm1469_vm5, %v3564_v35, %v6121_v43  ;;  %v3597_v27 = vsel %vm1469_vm5, %v3565_v2, %v6122_v11 }
 0x39c   : > { %v3722_v1 = vsel %vm1601_vm9, %v3690_v63, %v6061_v36  ;;  %v3723_v9 = vsel %vm1601_vm9, %v3691_v24, %v6062_v19  ;;  %v8538_v15 = vpop.permute.xlu0 %6139  ;;  %v8540_v25 = vpop.permute.xlu1 %6134  ;;  %v3628_v42 = vsel %vm1502_vm6, %v3596_v32, %v6056_v0  ;;  %v3629_v18 = vsel %vm1502_vm6, %v3597_v27, %v6057_v6 }
 0x39d   : > { %v3754_v29 = vsel %vm1634_vm10, %v3722_v1, %v6086_v50  ;;  %v3755_v46 = vsel %vm1634_vm10, %v3723_v9, %v6087_v26  ;;  %v3660_v17 = vsel %vm1535_vm7, %v3628_v42, %v6076_v34  ;;  %v3661_v61 = vsel %vm1535_vm7, %v3629_v18, %v6077_v23 }
 0x39e   : > { %v3786_v4 = vsel %vm1667_vm11, %v3754_v29, %v6091_v48  ;;  %v3787_v3 = vsel %vm1667_vm11, %v3755_v46, %v6092_v54  ;;  %v3692_v16 = vsel %vm1568_vm8, %v3660_v17, %v6081_v45  ;;  %v3693_v57 = vsel %vm1568_vm8, %v3661_v61, %v6082_v14  ;;  %v8954_v29 = vld [vmem:[#allocation5_spill] sm:$0xff] }
 0x39f   : > { %v3810_v55 = vpack.c.bf16 %v3787_v3, %v3786_v4  ;;  %v6101_v50 = vunpack.i.l.bf16 %v8491_v40  ;;  %v3567_v46 = vsel %vm172_vm0, %v8954_v29, %v6097_v49  ;;  %v8955_v4 = vld [vmem:[#allocation4_spill] sm:$0xff]  ;;  %v6142_v42 = vunpack.i.h.bf16 %v8538_v15 }
 0x3a0   : > { %v8548_v22 = vpop.permute.xlu0 %6149  ;;  %v6145_v58 = vpop.permute.xlu1 %6144  ;;  %v3566_v3 = vsel %vm172_vm0, %v8955_v4, %v6096_v41  ;;  %v3599_v43 = vsel %vm1469_vm5, %v3567_v46, %v6102_v62  ;;  %v6136_v29 = vunpack.i.l.bf16 %v8540_v25 }
 0x3a1   : > { %5022 = vmatprep.mubr.msk.bf16.mxu1 %vm1736_vm12, %v3810_v55  ;;  %v6147_v10 = vunpack.i.h.bf16 %v6145_v58  ;;  %v6146_v37 = vunpack.i.l.bf16 %v6145_v58  ;;  %v6152_v58 = vunpack.i.h.bf16 %v8548_v22  ;;  %v6151_v55 = vunpack.i.l.bf16 %v8548_v22 }
 0x3a2   : > { %v3598_v40 = vsel %vm1469_vm5, %v3566_v3, %v6101_v50  ;;  %v6141_v22 = vunpack.i.l.bf16 %v8538_v15 }
 0x3a3   : > { %v3725_v63 = vsel %vm1601_vm9, %v3693_v57, %v6147_v10  ;;  %v3724_v44 = vsel %vm1601_vm9, %v3692_v16, %v6146_v37  ;;  %v3631_v32 = vsel %vm1502_vm6, %v3599_v43, %v6152_v58  ;;  %v3630_v27 = vsel %vm1502_vm6, %v3598_v40, %v6151_v55 }
 0x3a4   : > { %v8551_v38 = vpop.permute.xlu0 %6164  ;;  %v8553_v20 = vpop.permute.xlu1 %6154 }
 0x3a5   : > { %v6167_v34 = vunpack.i.h.bf16 %v8551_v38  ;;  %v6166_v17 = vunpack.i.l.bf16 %v8551_v38  ;;  %v6156_v3 = vunpack.i.l.bf16 %v8553_v20 }
 0x3a8   : > { %v8563_v13 = vpop.permute.xlu0 %6169  ;;  %v8565_v31 = vpop.permute.xlu1 %6159 }
 0x3a9   : > { %v6172_v45 = vunpack.i.h.bf16 %v8563_v13  ;;  %v6171_v10 = vunpack.i.l.bf16 %v8563_v13  ;;  %v6161_v40 = vunpack.i.l.bf16 %v8565_v31 }
 0x3ac   : > { %v8571_v28 = vpop.permute.xlu0 %6179  ;;  %v8573_v39 = vpop.permute.xlu1 %6174 }
 0x3ad   : > { %v6177_v43 = vunpack.i.h.bf16 %v8573_v39 }
 0x3b0   : > { %v6190_v12 = vpop.permute.xlu0 %6189  ;;  %v6185_v51 = vpop.permute.xlu1 %6184 }
 0x3b1   : > { %v6192_v19 = vunpack.i.h.bf16 %v6190_v12  ;;  %v6191_v36 = vunpack.i.l.bf16 %v6190_v12  ;;  %v6187_v59 = vunpack.i.h.bf16 %v6185_v51  ;;  %v6186_v33 = vunpack.i.l.bf16 %v6185_v51 }
 0x3b3   : > { %v3757_v24 = vsel %vm1634_vm10, %v3725_v63, %v6187_v59  ;;  %v3756_v26 = vsel %vm1634_vm10, %v3724_v44, %v6186_v33 }
 0x3b4   : > { %v6205_v1 = vpop.permute.xlu0 %6204  ;;  %v6195_v9 = vpop.permute.xlu1 %6194  ;;  %v3788_v54 = vsel %vm1667_vm11, %v3756_v26, %v6191_v36  ;;  %v3789_v48 = vsel %vm1667_vm11, %v3757_v24, %v6192_v19 }
 0x3b5   : > { %v6207_v5 = vunpack.i.h.bf16 %v6205_v1  ;;  %v6206_v47 = vunpack.i.l.bf16 %v6205_v1  ;;  %v3811_v11 = vpack.c.bf16 %v3789_v48, %v3788_v54  ;;  %v6197_v36 = vunpack.i.h.bf16 %v6195_v9 }
 0x3b6   : > { %v6196_v59 = vunpack.i.l.bf16 %v6195_v9  ;;  %v6137_v48 = vunpack.i.h.bf16 %v8540_v25  ;;  %v6162_v25 = vunpack.i.h.bf16 %v8565_v31 }
 0x3b7   : > { %5023 = vmatmul.mubr.msk.bf16.gmra.mrb[48].mxu1 %vm1736_vm12, %v3811_v11  ;;  %v3663_v18 = vsel %vm1535_vm7, %v3631_v32, %v6207_v5  ;;  %v3662_v23 = vsel %vm1535_vm7, %v3630_v27, %v6206_v47  ;;  %v3569_v26 = vsel %vm172_vm0, %v8085_v60, %v6197_v36 }
 0x3b8   : > { %v6210_v2 = vpop.permute.xlu0 %6209  ;;  %v6200_v35 = vpop.permute.xlu1 %6199  ;;  %v3568_v62 = vsel %vm172_vm0, %v8094_v53, %v6196_v59  ;;  %v6157_v53 = vunpack.i.h.bf16 %v8553_v20 }
 0x3b9   : > { %v6212_v6 = vunpack.i.h.bf16 %v6210_v2  ;;  %v6211_v0 = vunpack.i.l.bf16 %v6210_v2  ;;  %v6202_v44 = vunpack.i.h.bf16 %v6200_v35  ;;  %v6201_v24 = vunpack.i.l.bf16 %v6200_v35 }
 0x3ba   : > { %v6176_v2 = vunpack.i.l.bf16 %v8573_v39 }
 0x3bb   : > { %v3694_v61 = vsel %vm1568_vm8, %v3662_v23, %v6211_v0  ;;  %v3695_v14 = vsel %vm1568_vm8, %v3663_v18, %v6212_v6  ;;  %v3600_v54 = vsel %vm1469_vm5, %v3568_v62, %v6201_v24  ;;  %v3601_v9 = vsel %vm1469_vm5, %v3569_v26, %v6202_v44 }
 0x3bc   : > { %v3726_v37 = vsel %vm1601_vm9, %v3694_v61, %v6141_v22  ;;  %v3727_v15 = vsel %vm1601_vm9, %v3695_v14, %v6142_v42  ;;  %v8616_v16 = vpop.permute.xlu0 %6219  ;;  %v8618_v57 = vpop.permute.xlu1 %6214  ;;  %v3632_v46 = vsel %vm1502_vm6, %v3600_v54, %v6136_v29  ;;  %v3633_v4 = vsel %vm1502_vm6, %v3601_v9, %v6137_v48  ;;  %v8957_v61 = vld [vmem:[#allocation6_spill] sm:$0xff] }
 0x3bd   : > { %v3758_v49 = vsel %vm1634_vm10, %v3726_v37, %v6166_v17  ;;  %v3759_v41 = vsel %vm1634_vm10, %v3727_v15, %v6167_v34  ;;  %v3664_v55 = vsel %vm1535_vm7, %v3632_v46, %v6156_v3  ;;  %v3665_v5 = vsel %vm1535_vm7, %v3633_v4, %v6157_v53  ;;  %v8956_v17 = vld [vmem:[#allocation7_spill] sm:$0xff] }
 0x3be   : > { %v3790_v38 = vsel %vm1667_vm11, %v3758_v49, %v6171_v10  ;;  %v3791_v12 = vsel %vm1667_vm11, %v3759_v41, %v6172_v45  ;;  %v3696_v6 = vsel %vm1568_vm8, %v3664_v55, %v6161_v40  ;;  %v3697_v0 = vsel %vm1568_vm8, %v3665_v5, %v6162_v25 }
 0x3bf   : > { %v3812_v51 = vpack.c.bf16 %v3791_v12, %v3790_v38  ;;  %v6182_v18 = vunpack.i.h.bf16 %v8571_v28  ;;  %v6181_v23 = vunpack.i.l.bf16 %v8571_v28  ;;  %v3571_v39 = vsel %vm172_vm0, %v8956_v17, %v6177_v43 }
 0x3c0   : > { %v8622_v19 = vpop.permute.xlu0 %6229  ;;  %v6225_v13 = vpop.permute.xlu1 %6224  ;;  %v3570_v14 = vsel %vm172_vm0, %v8957_v61, %v6176_v2  ;;  %v6222_v9 = vunpack.i.h.bf16 %v8616_v16  ;;  %v6221_v48 = vunpack.i.l.bf16 %v8616_v16  ;;  %v6217_v17 = vunpack.i.h.bf16 %v8618_v57 }
 0x3c1   : > { %5026 = vmatprep.mubr.msk.bf16.mxu1 %vm1736_vm12, %v3812_v51  ;;  %v6227_v47 = vunpack.i.h.bf16 %v6225_v13  ;;  %v6226_v11 = vunpack.i.l.bf16 %v6225_v13  ;;  %v6232_v15 = vunpack.i.h.bf16 %v8622_v19  ;;  %v6231_v49 = vunpack.i.l.bf16 %v8622_v19 }
 0x3c2   : > { %v3602_v36 = vsel %vm1469_vm5, %v3570_v14, %v6181_v23  ;;  %v3603_v59 = vsel %vm1469_vm5, %v3571_v39, %v6182_v18  ;;  %v6216_v39 = vunpack.i.l.bf16 %v8618_v57 }
 0x3c3   : > { %v3729_v31 = vsel %vm1601_vm9, %v3697_v0, %v6227_v47  ;;  %v3728_v34 = vsel %vm1601_vm9, %v3696_v6, %v6226_v11  ;;  %v3635_v24 = vsel %vm1502_vm6, %v3603_v59, %v6232_v15  ;;  %v3634_v26 = vsel %vm1502_vm6, %v3602_v36, %v6231_v49 }
 0x3c4   : > { %v8625_v33 = vpop.permute.xlu0 %6244  ;;  %v8627_v63 = vpop.permute.xlu1 %6234 }
 0x3c5   : > { %v6247_v47 = vunpack.i.h.bf16 %v8625_v33  ;;  %v6246_v11 = vunpack.i.l.bf16 %v8625_v33 }
 0x3c8   : > { %v8633_v50 = vpop.permute.xlu0 %6249  ;;  %v8635_v1 = vpop.permute.xlu1 %6239 }
 0x3c9   : > { %v6252_v16 = vunpack.i.h.bf16 %v8633_v50  ;;  %v6251_v40 = vunpack.i.l.bf16 %v8633_v50 }
 0x3cc   : > { %v8643_v60 = vpop.permute.xlu0 %6259  ;;  %v8647_v58 = vpop.permute.xlu1 %6254 }
 0x3cd   : > { %v6257_v61 = vunpack.i.h.bf16 %v8647_v58  ;;  %v6256_v14 = vunpack.i.l.bf16 %v8647_v58  ;;  %v6262_v15 = vunpack.i.h.bf16 %v8643_v60  ;;  %v6261_v49 = vunpack.i.l.bf16 %v8643_v60 }
 0x3cf   : > { %v3575_v57 = vsel %vm172_vm0, %v8231_v30, %v6257_v61  ;;  %v3574_v58 = vsel %vm172_vm0, %v8240_v21, %v6256_v14 }
 0x3d0   : > { %v6270_v35 = vpop.permute.xlu0 %6269  ;;  %v6265_v20 = vpop.permute.xlu1 %6264  ;;  %v3606_v30 = vsel %vm1469_vm5, %v3574_v58, %v6261_v49 }
 0x3d1   : > { %v6272_v32 = vunpack.i.h.bf16 %v6270_v35  ;;  %v6271_v27 = vunpack.i.l.bf16 %v6270_v35  ;;  %v6267_v42 = vunpack.i.h.bf16 %v6265_v20  ;;  %v6266_v22 = vunpack.i.l.bf16 %v6265_v20 }
 0x3d3   : > { %v3761_v45 = vsel %vm1634_vm10, %v3729_v31, %v6267_v42  ;;  %v3760_v10 = vsel %vm1634_vm10, %v3728_v34, %v6266_v22 }
 0x3d4   : > { %v6285_v37 = vpop.permute.xlu0 %6284  ;;  %v6275_v28 = vpop.permute.xlu1 %6274  ;;  %v3792_v41 = vsel %vm1667_vm11, %v3760_v10, %v6271_v27  ;;  %v3793_v38 = vsel %vm1667_vm11, %v3761_v45, %v6272_v32  ;;  %v6237_v10 = vunpack.i.h.bf16 %v8627_v63 }
 0x3d5   : > { %v6287_v12 = vunpack.i.h.bf16 %v6285_v37  ;;  %v6286_v51 = vunpack.i.l.bf16 %v6285_v37  ;;  %v3813_v13 = vpack.c.bf16 %v3793_v38, %v3792_v41  ;;  %v6277_v43 = vunpack.i.h.bf16 %v6275_v28 }
 0x3d6   : > { %v6276_v2 = vunpack.i.l.bf16 %v6275_v28  ;;  %v6236_v37 = vunpack.i.l.bf16 %v8627_v63  ;;  %v6242_v63 = vunpack.i.h.bf16 %v8635_v1 }
 0x3d7   : > { %5027 = vmatmul.mubr.msk.bf16.gmra.mrb[52].mxu1 %vm1736_vm12, %v3813_v13  ;;  %v3667_v29 = vsel %vm1535_vm7, %v3635_v24, %v6287_v12  ;;  %v3666_v46 = vsel %vm1535_vm7, %v3634_v26, %v6286_v51  ;;  %v3573_v18 = vsel %vm172_vm0, %v8250_v56, %v6277_v43  ;;  %v6241_v13 = vunpack.i.l.bf16 %v8635_v1 }
 0x3d8   : > { %v6290_v44 = vpop.permute.xlu0 %6289  ;;  %v6280_v54 = vpop.permute.xlu1 %6279  ;;  %v3572_v50 = vsel %vm172_vm0, %v8264_v7, %v6276_v2 }
 0x3d9   : > { %v6292_v19 = vunpack.i.h.bf16 %v6290_v44  ;;  %v6291_v62 = vunpack.i.l.bf16 %v6290_v44  ;;  %v6282_v27 = vunpack.i.h.bf16 %v6280_v54  ;;  %v6281_v20 = vunpack.i.l.bf16 %v6280_v54 }
 0x3da   : > { %v3607_v44 = vsel %vm1469_vm5, %v3575_v57, %v6262_v15 }
 0x3db   : > { %v3698_v4 = vsel %vm1568_vm8, %v3666_v46, %v6291_v62  ;;  %v3699_v53 = vsel %vm1568_vm8, %v3667_v29, %v6292_v19  ;;  %v3604_v23 = vsel %vm1469_vm5, %v3572_v50, %v6281_v20  ;;  %v3605_v31 = vsel %vm1469_vm5, %v3573_v18, %v6282_v27 }
 0x3dc   : > { %v3730_v3 = vsel %vm1601_vm9, %v3698_v4, %v6221_v48  ;;  %v3731_v55 = vsel %vm1601_vm9, %v3699_v53, %v6222_v9  ;;  %v8684_v5 = vpop.permute.xlu0 %6299  ;;  %v8688_v25 = vpop.permute.xlu1 %6294  ;;  %v3636_v7 = vsel %vm1502_vm6, %v3604_v23, %v6216_v39  ;;  %v3637_v45 = vsel %vm1502_vm6, %v3605_v31, %v6217_v17 }
 0x3dd   : > { %v3762_v35 = vsel %vm1634_vm10, %v3730_v3, %v6246_v11  ;;  %v3763_v32 = vsel %vm1634_vm10, %v3731_v55, %v6247_v47  ;;  %v3668_v12 = vsel %vm1535_vm7, %v3636_v7, %v6236_v37  ;;  %v3669_v51 = vsel %vm1535_vm7, %v3637_v45, %v6237_v10 }
 0x3de   : > { %v3794_v0 = vsel %vm1667_vm11, %v3762_v35, %v6251_v40  ;;  %v3795_v42 = vsel %vm1667_vm11, %v3763_v32, %v6252_v16  ;;  %v6302_v59 = vunpack.i.h.bf16 %v8684_v5  ;;  %v6301_v26 = vunpack.i.l.bf16 %v8684_v5 }
 0x3df   : > { %v3814_v22 = vpack.c.bf16 %v3795_v42, %v3794_v0  ;;  %v3700_v62 = vsel %vm1568_vm8, %v3668_v12, %v6241_v13  ;;  %v3701_v54 = vsel %vm1568_vm8, %v3669_v51, %v6242_v63  ;;  %v6297_v23 = vunpack.i.h.bf16 %v8688_v25 }
 0x3e0   : > { %v6310_v6 = vpop.permute.xlu0 %6309  ;;  %v6305_v33 = vpop.permute.xlu1 %6304  ;;  %v6296_v10 = vunpack.i.l.bf16 %v8688_v25 }
 0x3e1   : > { %5030 = vmatprep.mubr.msk.bf16.mxu1 %vm1736_vm12, %v3814_v22  ;;  %v6312_v41 = vunpack.i.h.bf16 %v6310_v6  ;;  %v6307_v36 = vunpack.i.h.bf16 %v6305_v33  ;;  %v6306_v60 = vunpack.i.l.bf16 %v6305_v33  ;;  %v6311_v21 = vunpack.i.l.bf16 %v6310_v6 }
 0x3e3   : > { %v3639_v19 = vsel %vm1502_vm6, %v3607_v44, %v6312_v41  ;;  %v3733_v4 = vsel %vm1601_vm9, %v3701_v54, %v6307_v36  ;;  %v3732_v53 = vsel %vm1601_vm9, %v3700_v62, %v6306_v60  ;;  %v3638_v47 = vsel %vm1502_vm6, %v3606_v30, %v6311_v21 }
 0x3e4   : > { %v8703_v34 = vpop.permute.xlu0 %6324  ;;  %v8709_v56 = vpop.permute.xlu1 %6314 }
 0x3e5   : > { %v6327_v5 = vunpack.i.h.bf16 %v8703_v34  ;;  %v6326_v20 = vunpack.i.l.bf16 %v8703_v34  ;;  %v6317_v37 = vunpack.i.h.bf16 %v8709_v56  ;;  %v6316_v12 = vunpack.i.l.bf16 %v8709_v56 }
 0x3e8   : > { %v6335_v28 = vpop.permute.xlu0 %6334  ;;  %v8721_v38 = vpop.permute.xlu1 %6319 }
 0x3e9   : > { %v6337_v3 = vunpack.i.h.bf16 %v6335_v28  ;;  %v6336_v55 = vunpack.i.l.bf16 %v6335_v28  ;;  %v6322_v13 = vunpack.i.h.bf16 %v8721_v38  ;;  %v6321_v36 = vunpack.i.l.bf16 %v8721_v38 }
 0x3ec   : > { %v6355_v24 = vpop.permute.xlu0 %6354  ;;  %v6330_v9 = vpop.permute.xlu1 %6329 }
 0x3ed   : > { %v6357_v1 = vunpack.i.h.bf16 %v6355_v24  ;;  %v6356_v48 = vunpack.i.l.bf16 %v6355_v24  ;;  %v6332_v29 = vunpack.i.h.bf16 %v6330_v9  ;;  %v6331_v46 = vunpack.i.l.bf16 %v6330_v9 }
 0x3ef   : > { %v3765_v11 = vsel %vm1634_vm10, %v3733_v4, %v6332_v29  ;;  %v3764_v16 = vsel %vm1634_vm10, %v3732_v53, %v6331_v46  ;;  %v3671_v6 = vsel %vm1535_vm7, %v3639_v19, %v6357_v1  ;;  %v3670_v0 = vsel %vm1535_vm7, %v3638_v47, %v6356_v48 }
 0x3f0   : > { %v6360_v40 = vpop.permute.xlu0 %6359  ;;  %v6340_v35 = vpop.permute.xlu1 %6339  ;;  %v3796_v32 = vsel %vm1667_vm11, %v3764_v16, %v6336_v55  ;;  %v3797_v27 = vsel %vm1667_vm11, %v3765_v11, %v6337_v3 }
 0x3f1   : > { %v6362_v43 = vunpack.i.h.bf16 %v6360_v40  ;;  %v6361_v2 = vunpack.i.l.bf16 %v6360_v40  ;;  %v3815_v42 = vpack.c.bf16 %v3797_v27, %v3796_v32  ;;  %v6342_v18 = vunpack.i.h.bf16 %v6340_v35 }
 0x3f2   : > { %v6341_v50 = vunpack.i.l.bf16 %v6340_v35 }
 0x3f3   : > { %v3702_v33 = vsel %vm1568_vm8, %v3670_v0, %v6361_v2  ;;  %v3703_v22 = vsel %vm1568_vm8, %v3671_v6, %v6362_v43  ;;  %5031 = vmatmul.mubr.msk.bf16.gmra.mrb[56].mxu1 %vm1736_vm12, %v3815_v42  ;;  %v3577_v28 = vsel %vm172_vm0, %v8376_v52, %v6342_v18 }
 0x3f4   : > { %v3734_v31 = vsel %vm1601_vm9, %v3702_v33, %v6301_v26  ;;  %v3735_v17 = vsel %vm1601_vm9, %v3703_v22, %v6302_v59  ;;  %v6365_v34 = vpop.permute.xlu0 %6364  ;;  %v6345_v45 = vpop.permute.xlu1 %6344  ;;  %v3576_v57 = vsel %vm172_vm0, %v8387_v8, %v6341_v50  ;;  %v8958_v59 = vld [vmem:[#allocation3_spill] sm:$0xff] }
 0x3f5   : > { %v6367_v39 = vunpack.i.h.bf16 %v6365_v34  ;;  %v6366_v61 = vunpack.i.l.bf16 %v6365_v34  ;;  %v3766_v14 = vsel %vm1634_vm10, %v3734_v31, %v6326_v20  ;;  %v3767_v7 = vsel %vm1634_vm10, %v3735_v17, %v6327_v5 }
 0x3f6   : > { %v6347_v15 = vunpack.i.h.bf16 %v6345_v45  ;;  %v6346_v49 = vunpack.i.l.bf16 %v6345_v45  ;;  %v5747_v30 = vunpack.i.h.bf16 %v8958_v59  ;;  %v5746_v44 = vunpack.i.l.bf16 %v8958_v59 }
 0x3f7   : > { %v3798_v58 = vsel %vm1667_vm11, %v3766_v14, %v6366_v61  ;;  %v3799_v41 = vsel %vm1667_vm11, %v3767_v7, %v6367_v39 }
 0x3f8   : > { %v3816_v51 = vpack.c.bf16 %v3799_v41, %v3798_v58  ;;  %v3608_v63 = vsel %vm1469_vm5, %v3576_v57, %v6346_v49  ;;  %v3609_v25 = vsel %vm1469_vm5, %v3577_v28, %v6347_v15  ;;  %v6350_v8 = vpop.permute.xlu1 %6349 }
 0x3f9   : > { %v3640_v52 = vsel %vm1502_vm6, %v3608_v63, %v6296_v10  ;;  %v3641_v60 = vsel %vm1502_vm6, %v3609_v25, %v6297_v23  ;;  %v6352_v24 = vunpack.i.h.bf16 %v6350_v8  ;;  %v6351_v26 = vunpack.i.l.bf16 %v6350_v8 }
 0x3fa   : > { %v3672_v56 = vsel %vm1535_vm7, %v3640_v52, %v6316_v12  ;;  %v3673_v21 = vsel %vm1535_vm7, %v3641_v60, %v6317_v37  ;;  %5034 = vmatprep.mubr.msk.bf16.mxu1 %vm1736_vm12, %v3816_v51 }
 0x3fb   : > { %v3704_v19 = vsel %vm1568_vm8, %v3672_v56, %v6321_v36  ;;  %v3705_v38 = vsel %vm1568_vm8, %v3673_v21, %v6322_v13 }
 0x3fc   : > { %v3736_v62 = vsel %vm1601_vm9, %v3704_v19, %v5746_v44  ;;  %v3737_v54 = vsel %vm1601_vm9, %v3705_v38, %v5747_v30  ;;  %v6370_v9 = vpop.permute.xlu1 %6369 }
 0x3fd   : > { %v6372_v1 = vunpack.i.h.bf16 %v6370_v9  ;;  %v6371_v48 = vunpack.i.l.bf16 %v6370_v9  ;;  %v3768_v29 = vsel %vm1634_vm10, %v3736_v62, %v6351_v26  ;;  %v3769_v46 = vsel %vm1634_vm10, %v3737_v54, %v6352_v24 }
 0x3ff   : > { %v3800_v4 = vsel %vm1667_vm11, %v3768_v29, %v6371_v48  ;;  %v3801_v53 = vsel %vm1667_vm11, %v3769_v46, %v6372_v1 }
 0x400   : > { %v3817_v3 = vpack.c.bf16 %v3801_v53, %v3800_v4 }
 0x402   : > { %5035 = vmatmul.mubr.msk.bf16.gmra.mrb[60].mxu1 %vm1736_vm12, %v3817_v3 }
 0x40a   : > { %v5008_v55 = vpop.f32.mrb[32].mxu1 }
 0x40b   : > { %v3924_v47 = vpop.f32.mrb[33].mxu1  ;;  %v4053_v11 = vmax.f32 %v5008_v55, 0.0 }
 0x40c   : > { %v5009_v5 = vpop.f32.mrb[34].mxu1  ;;  %v4051_v43 = vmax.f32 %v3924_v47, 0.0 }
 0x40d   : > { %v4054_v16 = vmax.f32 %v5009_v5, 0.0  ;;  %v3927_v40 = vpop.f32.mrb[35].mxu1 }
 0x40e   : > { %v4052_v2 = vmax.f32 %v3927_v40, 0.0 }
 0x40f   : > { %v4084_v35 = vpack.c.bf16 %v4054_v16, %v4053_v11 }
 0x410   : > { %v4083_v32 = vpack.c.bf16 %v4052_v2, %v4051_v43 }
 0x412   : > { %5040 = vmatprep.mubr.msk.bf16.mxu0 %vm1469_vm5, %v4083_v32 }
 0x413   : > { %5041 = vmatmul.mubr.msk.bf16.vlgmr.msra.gmra.mrb[32].mxu0 %vm1469_vm5, %v4084_v35 }
 0x42a   : > { %v5012_v27 = vpop.f32.mrb[36].mxu1 }
 0x42b   : > { %v3940_v20 = vpop.f32.mrb[37].mxu1  ;;  %v4057_v0 = vmax.f32 %v5012_v27, 0.0 }
 0x42c   : > { %v5013_v6 = vpop.f32.mrb[38].mxu1  ;;  %v4055_v22 = vmax.f32 %v3940_v20, 0.0 }
 0x42d   : > { %v4058_v42 = vmax.f32 %v5013_v6, 0.0  ;;  %v3943_v33 = vpop.f32.mrb[39].mxu1 }
 0x42e   : > { %v4056_v18 = vmax.f32 %v3943_v33, 0.0 }
 0x42f   : > { %v4086_v50 = vpack.c.bf16 %v4058_v42, %v4057_v0 }
 0x430   : > { %v4085_v23 = vpack.c.bf16 %v4056_v18, %v4055_v22  ;;  %v6427_v22 = vld [vmem:[#allocation2 + $0x38] sm:$0xff] }
 0x431   : > { %v4367_v18 = vrot.slane %v6427_v22, 1  ;;  %v6439_v22 = vld [vmem:[#allocation2 + $0x98] sm:$0xff] }
 0x432   : > { %5044 = vmatprep.mubr.msk.bf16.mxu0 %vm1469_vm5, %v4085_v23 }
 0x433   : > { %5045 = vmatmul.mubr.msk.bf16.gmra.mrb[36].mxu0 %vm1469_vm5, %v4086_v50  ;;  %v6428_v50 = vld [vmem:[#allocation2 + $0x20] sm:$0xff] }
 0x434   : > { %v4362_v23 = vrot.slane %v6428_v50, 1  ;;  %v6440_v50 = vld [vmem:[#allocation2 + $0x80] sm:$0xff] }
 0x44a   : > { %v5016_v31 = vpop.f32.mrb[40].mxu1 }
 0x44b   : > { %v3956_v17 = vpop.f32.mrb[41].mxu1  ;;  %v4061_v39 = vmax.f32 %v5016_v31, 0.0  ;;  %v6429_v31 = vld [vmem:[#allocation2 + $0x30] sm:$0xff] }
 0x44c   : > { %v5017_v34 = vpop.f32.mrb[42].mxu1  ;;  %v4059_v7 = vmax.f32 %v3956_v17, 0.0  ;;  %v4366_v17 = vrot.slane %v6429_v31, 1  ;;  %v6441_v31 = vld [vmem:[#allocation2 + $0x90] sm:$0xff] }
 0x44d   : > { %v4062_v61 = vmax.f32 %v5017_v34, 0.0  ;;  %v3959_v14 = vpop.f32.mrb[43].mxu1  ;;  %v6430_v34 = vld [vmem:[#allocation2 + $0x40] sm:$0x3] }
 0x44e   : > { %v4060_v45 = vmax.f32 %v3959_v14, 0.0 }
 0x44f   : > { %v4088_v10 = vpack.c.bf16 %v4062_v61, %v4061_v39  ;;  %v4369_v39 = vrot.slane %v6430_v34, 1  ;;  %v6431_v61 = vld [vmem:[#allocation2 + $0x18] sm:$0xff]  ;;  %v6442_v34 = vld [vmem:[#allocation2 + $0xa0] sm:$0x3] }
 0x450   : > { %v4087_v37 = vpack.c.bf16 %v4060_v45, %v4059_v7  ;;  %v4361_v14 = vrot.slane %v6431_v61, 1  ;;  %v6432_v7 = vld [vmem:[#allocation2 + $0x28] sm:$0x3]  ;;  %v6443_v61 = vld [vmem:[#allocation2 + $0x78] sm:$0xff] }
 0x451   : > { %v4364_v45 = vrot.slane %v6432_v7, 1  ;;  %v6444_v7 = vld [vmem:[#allocation2 + $0x88] sm:$0x3] }
 0x452   : > { %5048 = vmatprep.mubr.msk.bf16.mxu0 %vm1469_vm5, %v4087_v37  ;;  %v4368_v37 = vsel %vm481_vm3, %v4366_v17, %v4367_v18  ;;  %v4386_v17 = vrot.slane %v6441_v31, 1  ;;  %v6453_v31 = vld [vmem:[#allocation2 + $0xf0] sm:$0xff] }
 0x453   : > { %5049 = vmatmul.mubr.msk.bf16.gmra.mrb[40].mxu0 %vm1469_vm5, %v4088_v10 }
 0x46a   : > { %v5020_v15 = vpop.f32.mrb[44].mxu1 }
 0x46b   : > { %v3972_v49 = vpop.f32.mrb[45].mxu1  ;;  %v4065_v57 = vmax.f32 %v5020_v15, 0.0 }
 0x46c   : > { %v5021_v28 = vpop.f32.mrb[46].mxu1  ;;  %v4063_v12 = vmax.f32 %v3972_v49, 0.0 }
 0x46d   : > { %v4066_v58 = vmax.f32 %v5021_v28, 0.0  ;;  %v3975_v41 = vpop.f32.mrb[47].mxu1  ;;  %v4363_v28 = vsel %vm481_vm3, %v4361_v14, %v4362_v23  ;;  %v4381_v14 = vrot.slane %v6443_v61, 1  ;;  %v6455_v61 = vld [vmem:[#allocation2 + $0xd8] sm:$0xff] }
 0x46e   : > { %v4064_v51 = vmax.f32 %v3975_v41, 0.0  ;;  %v4370_v41 = vsel %vm481_vm3, %v4367_v18, %v4369_v39  ;;  %v4387_v18 = vrot.slane %v6439_v22, 1  ;;  %v4389_v39 = vrot.slane %v6442_v34, 1  ;;  %v6451_v22 = vld [vmem:[#allocation2 + $0xf8] sm:$0xff]  ;;  %v6454_v34 = vld [vmem:[#allocation2 + $0x100] sm:$0x3] }
 0x46f   : > { %v4090_v63 = vpack.c.bf16 %v4066_v58, %v4065_v57 }
 0x470   : > { %v4089_v25 = vpack.c.bf16 %v4064_v51, %v4063_v12 }
 0x472   : > { %5052 = vmatprep.mubr.msk.bf16.mxu0 %vm1469_vm5, %v4089_v25 }
 0x473   : > { %5053 = vmatmul.mubr.msk.bf16.gmra.mrb[44].mxu0 %vm1469_vm5, %v4090_v63  ;;  %v4365_v63 = vsel %vm481_vm3, %v4362_v23, %v4364_v45  ;;  %v4382_v23 = vrot.slane %v6440_v50, 1  ;;  %v4384_v45 = vrot.slane %v6444_v7, 1  ;;  %v6452_v50 = vld [vmem:[#allocation2 + $0xe0] sm:$0xff]  ;;  %v6456_v7 = vld [vmem:[#allocation2 + $0xe8] sm:$0x3] }
 0x48a   : > { %v5024_v13 = vpop.f32.mrb[48].mxu1 }
 0x48b   : > { %v3988_v36 = vpop.f32.mrb[49].mxu1  ;;  %v4069_v60 = vmax.f32 %v5024_v13, 0.0 }
 0x48c   : > { %v5025_v52 = vpop.f32.mrb[50].mxu1  ;;  %v4067_v30 = vmax.f32 %v3988_v36, 0.0 }
 0x48d   : > { %v4070_v8 = vmax.f32 %v5025_v52, 0.0  ;;  %v3991_v59 = vpop.f32.mrb[51].mxu1 }
 0x48e   : > { %v4068_v44 = vmax.f32 %v3991_v59, 0.0 }
 0x48f   : > { %v4092_v56 = vpack.c.bf16 %v4070_v8, %v4069_v60 }
 0x490   : > { %v4091_v21 = vpack.c.bf16 %v4068_v44, %v4067_v30 }
 0x492   : > { %5056 = vmatprep.mubr.msk.bf16.mxu0 %vm1469_vm5, %v4091_v21 }
 0x493   : > { %5057 = vmatmul.mubr.msk.bf16.gmra.mrb[48].mxu0 %vm1469_vm5, %v4092_v56  ;;  %v6433_v56 = vld [vmem:[#allocation2 + $0x68] sm:$0xff] }
 0x494   : > { %v4377_v21 = vrot.slane %v6433_v56, 1  ;;  %v6445_v56 = vld [vmem:[#allocation2 + $0xc8] sm:$0xff] }
 0x4aa   : > { %v5028_v24 = vpop.f32.mrb[52].mxu1 }
 0x4ab   : > { %v4004_v26 = vpop.f32.mrb[53].mxu1  ;;  %v4073_v38 = vmax.f32 %v5028_v24, 0.0  ;;  %v6434_v24 = vld [vmem:[#allocation2 + $0x50] sm:$0xff] }
 0x4ac   : > { %v5029_v19 = vpop.f32.mrb[54].mxu1  ;;  %v4071_v9 = vmax.f32 %v4004_v26, 0.0  ;;  %v4372_v26 = vrot.slane %v6434_v24, 1  ;;  %v6446_v24 = vld [vmem:[#allocation2 + $0xb0] sm:$0xff] }
 0x4ad   : > { %v4074_v62 = vmax.f32 %v5029_v19, 0.0  ;;  %v4007_v54 = vpop.f32.mrb[55].mxu1  ;;  %v6435_v19 = vld [vmem:[#allocation2 + $0x60] sm:$0xff] }
 0x4ae   : > { %v4072_v1 = vmax.f32 %v4007_v54, 0.0 }
 0x4af   : > { %v4094_v48 = vpack.c.bf16 %v4074_v62, %v4073_v38  ;;  %v4376_v38 = vrot.slane %v6435_v19, 1  ;;  %v6436_v62 = vld [vmem:[#allocation2 + $0x70] sm:$0x3]  ;;  %v6447_v19 = vld [vmem:[#allocation2 + $0xc0] sm:$0xff] }
 0x4b0   : > { %v4093_v29 = vpack.c.bf16 %v4072_v1, %v4071_v9  ;;  %v4379_v54 = vrot.slane %v6436_v62, 1  ;;  %v6437_v9 = vld [vmem:[#allocation2 + $0x48] sm:$0xff]  ;;  %v6448_v62 = vld [vmem:[#allocation2 + $0xd0] sm:$0x3] }
 0x4b1   : > { %v4371_v1 = vrot.slane %v6437_v9, 1  ;;  %v6449_v9 = vld [vmem:[#allocation2 + $0xa8] sm:$0xff] }
 0x4b2   : > { %5060 = vmatprep.mubr.msk.bf16.mxu0 %vm1469_vm5, %v4093_v29 }
 0x4b3   : > { %5061 = vmatmul.mubr.msk.bf16.gmra.mrb[52].mxu0 %vm1469_vm5, %v4094_v48  ;;  %v6438_v48 = vld [vmem:[#allocation2 + $0x58] sm:$0x3] }
 0x4b4   : > { %v4374_v29 = vrot.slane %v6438_v48, 1  ;;  %v6450_v48 = vld [vmem:[#allocation2 + $0xb8] sm:$0x3] }
 0x4c6   : > { %v5032_v46 = vpop.f32.mrb[56].mxu1 }
 0x4c7   : > { %v4020_v4 = vpop.f32.mrb[57].mxu1  ;;  %v4077_v3 = vmax.f32 %v5032_v46, 0.0 }
 0x4c8   : > { %v5033_v53 = vpop.f32.mrb[58].mxu1  ;;  %v4075_v5 = vmax.f32 %v4020_v4, 0.0  ;;  %v4378_v4 = vsel %vm481_vm3, %v4376_v38, %v4377_v21  ;;  %v4396_v38 = vrot.slane %v6447_v19, 1  ;;  %v6459_v19 = vld [vmem:[#allocation2 + $0x120] sm:$0xff] }
 0x4c9   : > { %v4078_v55 = vmax.f32 %v5033_v53, 0.0  ;;  %v4023_v47 = vpop.f32.mrb[59].mxu1 }
 0x4ca   : > { %v4076_v11 = vmax.f32 %v4023_v47, 0.0 }
 0x4cb   : > { %v4096_v16 = vpack.c.bf16 %v4078_v55, %v4077_v3  ;;  %v4373_v55 = vsel %vm481_vm3, %v4371_v1, %v4372_v26  ;;  %v4391_v1 = vrot.slane %v6449_v9, 1  ;;  %v6461_v9 = vld [vmem:[#allocation2 + $0x108] sm:$0xff] }
 0x4cc   : > { %v4095_v40 = vpack.c.bf16 %v4076_v11, %v4075_v5  ;;  %v4380_v11 = vsel %vm481_vm3, %v4377_v21, %v4379_v54  ;;  %v4397_v21 = vrot.slane %v6445_v56, 1  ;;  %v4399_v54 = vrot.slane %v6448_v62, 1  ;;  %v6457_v56 = vld [vmem:[#allocation2 + $0x128] sm:$0xff]  ;;  %v6460_v62 = vld [vmem:[#allocation2 + $0x130] sm:$0x3] }
 0x4ce   : > { %5064 = vmatprep.mubr.msk.bf16.mxu0 %vm1469_vm5, %v4095_v40 }
 0x4cf   : > { %5065 = vmatmul.mubr.msk.bf16.gmra.mrb[56].mxu0 %vm1469_vm5, %v4096_v16 }
 0x4d5   : > { %v5036_v43 = vpop.f32.mrb[60].mxu1 }
 0x4d6   : > { %v4036_v2 = vpop.f32.mrb[61].mxu1  ;;  %v4081_v32 = vmax.f32 %v5036_v43, 0.0  ;;  %v4375_v43 = vsel %vm481_vm3, %v4372_v26, %v4374_v29  ;;  %v4392_v26 = vrot.slane %v6446_v24, 1  ;;  %v4394_v29 = vrot.slane %v6450_v48, 1  ;;  %v6458_v24 = vld [vmem:[#allocation2 + $0x110] sm:$0xff] }
 0x4d7   : > { %v5037_v35 = vpop.f32.mrb[62].mxu1  ;;  %v4079_v6 = vmax.f32 %v4036_v2, 0.0  ;;  %v6462_v48 = vld [vmem:[#allocation2 + $0x118] sm:$0x3] }
 0x4d8   : > { %v4082_v27 = vmax.f32 %v5037_v35, 0.0  ;;  %v4039_v20 = vpop.f32.mrb[63].mxu1 }
 0x4d9   : > { %v4080_v0 = vmax.f32 %v4039_v20, 0.0 }
 0x4da   : > { %v4098_v42 = vpack.c.bf16 %v4082_v27, %v4081_v32 }
 0x4db   : > { %v4097_v33 = vpack.c.bf16 %v4080_v0, %v4079_v6 }
 0x4dd   : > { %5068 = vmatprep.mubr.msk.bf16.mxu0 %vm1469_vm5, %v4097_v33 }
 0x4de   : > { %5069 = vmatmul.mubr.msk.bf16.gmra.mrb[60].mxu0 %vm1469_vm5, %v4098_v42 }
 0x4e6   : > { %v5042_v10 = vpop.f32.mrb[32].mxu0 }
 0x4e7   : > { %v4475_v15 = vadd.f32 %v5042_v10, %v4368_v37  ;;  %v4186_v49 = vpop.f32.mrb[33].mxu0  ;;  %v4388_v37 = vsel %vm481_vm3, %v4386_v17, %v4387_v18  ;;  %v4406_v17 = vrot.slane %v6453_v31, 1  ;;  %v6465_v31 = vld [vmem:[#allocation2 + $0x150] sm:$0xff] }
 0x4e8   : > { %v4473_v57 = vadd.f32 %v4363_v28, %v4186_v49  ;;  %v5043_v58 = vpop.f32.mrb[34].mxu0  ;;  %v4383_v28 = vsel %vm481_vm3, %v4381_v14, %v4382_v23  ;;  %v4401_v14 = vrot.slane %v6455_v61, 1  ;;  %v6467_v61 = vld [vmem:[#allocation2 + $0x138] sm:$0xff] }
 0x4e9   : > { %4507 = vst.msk [vmem:[#allocation2 + $0x31] sm:$0xff] %vm172_vm0, %v4475_v15  ;;  %v4476_v12 = vadd.f32 %v5043_v58, %v4370_v41  ;;  %v4189_v51 = vpop.f32.mrb[35].mxu0  ;;  %v4390_v41 = vsel %vm481_vm3, %v4387_v18, %v4389_v39  ;;  %v4407_v18 = vrot.slane %v6451_v22, 1  ;;  %v4409_v39 = vrot.slane %v6454_v34, 1  ;;  %v6463_v22 = vld [vmem:[#allocation2 + $0x158] sm:$0xff] }
 0x4ea   : > { %4505 = vst.msk [vmem:[#allocation2 + $0x19] sm:$0xff] %vm172_vm0, %v4473_v57  ;;  %v4474_v25 = vadd.f32 %v4365_v63, %v4189_v51  ;;  %v4385_v63 = vsel %vm481_vm3, %v4382_v23, %v4384_v45  ;;  %v4402_v23 = vrot.slane %v6452_v50, 1  ;;  %v4404_v45 = vrot.slane %v6456_v7, 1  ;;  %v6464_v50 = vld [vmem:[#allocation2 + $0x140] sm:$0xff]  ;;  %v6468_v7 = vld [vmem:[#allocation2 + $0x148] sm:$0x3] }
 0x4eb   : > { %4508 = vst.msk [vmem:[#allocation2 + $0x39] sm:$0xff] %vm172_vm0, %v4476_v12  ;;  %v6466_v34 = vld [vmem:[#allocation2 + $0x160] sm:$0x3] }
 0x4ec   : > { %4506 = vst.msk [vmem:[#allocation2 + $0x21] sm:$0xff] %vm172_vm0, %v4474_v25 }
 0x4f0   : > { %v4539_v13 = vld [vmem:[#allocation2 + $0x31] sm:$0xff] }
 0x4f1   : > { %v4571_v36 = vmax.f32 %v4539_v13, 0.0  ;;  %v4537_v52 = vld [vmem:[#allocation2 + $0x19] sm:$0xff] }
 0x4f2   : > { %v4569_v60 = vmax.f32 %v4537_v52, 0.0  ;;  %v4540_v8 = vld [vmem:[#allocation2 + $0x39] sm:$0xff] }
 0x4f3   : > { %4603 = vst.msk [vmem:[%s8810_s20 + $0x10] sm:$0xff] %vm172_vm0, %v4571_v36  ;;  %v4572_v59 = vmax.f32 %v4540_v8, 0.0  ;;  %v4538_v30 = vld [vmem:[#allocation2 + $0x21] sm:$0xff] }
 0x4f4   : > { %4601 = vst.msk [vmem:[%s8810_s20] sm:$0xff] %vm172_vm0, %v4569_v60  ;;  %v4570_v44 = vmax.f32 %v4538_v30, 0.0 }
 0x4f5   : > { %4604 = vst.msk [vmem:[%s8810_s20 + $0x18] sm:$0xff] %vm172_vm0, %v4572_v59 }
 0x4f6   : > { %4602 = vst.msk [vmem:[%s8810_s20 + $0x8] sm:$0xff] %vm172_vm0, %v4570_v44 }
 0x506   : > { %v5046_v46 = vpop.f32.mrb[36].mxu0 }
 0x507   : > { %v4479_v53 = vadd.f32 %v5046_v46, %v4378_v4  ;;  %v4202_v3 = vpop.f32.mrb[37].mxu0  ;;  %v4398_v4 = vsel %vm481_vm3, %v4396_v38, %v4397_v21  ;;  %v4416_v38 = vrot.slane %v6459_v19, 1 }
 0x508   : > { %v4477_v47 = vadd.f32 %v4373_v55, %v4202_v3  ;;  %v5047_v5 = vpop.f32.mrb[38].mxu0  ;;  %v4393_v55 = vsel %vm481_vm3, %v4391_v1, %v4392_v26  ;;  %v4411_v1 = vrot.slane %v6461_v9, 1  ;;  %v6473_v9 = vld [vmem:[#allocation2 + $0x168] sm:$0xff] }
 0x509   : > { %4511 = vst.msk [vmem:[#allocation2 + $0x61] sm:$0xff] %vm172_vm0, %v4479_v53  ;;  %v4480_v16 = vadd.f32 %v5047_v5, %v4380_v11  ;;  %v4205_v40 = vpop.f32.mrb[39].mxu0  ;;  %v4400_v11 = vsel %vm481_vm3, %v4397_v21, %v4399_v54  ;;  %v4417_v21 = vrot.slane %v6457_v56, 1  ;;  %v4419_v54 = vrot.slane %v6460_v62, 1 }
 0x50a   : > { %4509 = vst.msk [vmem:[#allocation2 + $0x49] sm:$0xff] %vm172_vm0, %v4477_v47  ;;  %v4478_v2 = vadd.f32 %v4375_v43, %v4205_v40  ;;  %v4395_v43 = vsel %vm481_vm3, %v4392_v26, %v4394_v29  ;;  %v4412_v26 = vrot.slane %v6458_v24, 1  ;;  %v4414_v29 = vrot.slane %v6462_v48, 1  ;;  %v6474_v48 = vld [vmem:[#allocation2 + $0x178] sm:$0x3] }
 0x50b   : > { %4512 = vst.msk [vmem:[#allocation2 + $0x69] sm:$0xff] %vm172_vm0, %v4480_v16 }
 0x50c   : > { %4510 = vst.msk [vmem:[#allocation2 + $0x51] sm:$0xff] %vm172_vm0, %v4478_v2 }
 0x510   : > { %v4543_v35 = vld [vmem:[#allocation2 + $0x61] sm:$0xff] }
 0x511   : > { %v4575_v32 = vmax.f32 %v4543_v35, 0.0  ;;  %v4541_v27 = vld [vmem:[#allocation2 + $0x49] sm:$0xff] }
 0x512   : > { %v4573_v20 = vmax.f32 %v4541_v27, 0.0  ;;  %v4544_v6 = vld [vmem:[#allocation2 + $0x69] sm:$0xff] }
 0x513   : > { %4607 = vst.msk [vmem:[%s8810_s20 + $0x30] sm:$0xff] %vm172_vm0, %v4575_v32  ;;  %v4576_v0 = vmax.f32 %v4544_v6, 0.0  ;;  %v4542_v42 = vld [vmem:[#allocation2 + $0x51] sm:$0xff] }
 0x514   : > { %4605 = vst.msk [vmem:[%s8810_s20 + $0x20] sm:$0xff] %vm172_vm0, %v4573_v20  ;;  %v4574_v33 = vmax.f32 %v4542_v42, 0.0 }
 0x515   : > { %4608 = vst.msk [vmem:[%s8810_s20 + $0x38] sm:$0xff] %vm172_vm0, %v4576_v0 }
 0x516   : > { %4606 = vst.msk [vmem:[%s8810_s20 + $0x28] sm:$0xff] %vm172_vm0, %v4574_v33 }
 0x526   : > { %v5050_v10 = vpop.f32.mrb[40].mxu0 }
 0x527   : > { %v4483_v15 = vadd.f32 %v5050_v10, %v4388_v37  ;;  %v4218_v49 = vpop.f32.mrb[41].mxu0  ;;  %v4408_v37 = vsel %vm481_vm3, %v4406_v17, %v4407_v18  ;;  %v4426_v17 = vrot.slane %v6465_v31, 1 }
 0x528   : > { %v4481_v57 = vadd.f32 %v4383_v28, %v4218_v49  ;;  %v5051_v58 = vpop.f32.mrb[42].mxu0  ;;  %v4403_v28 = vsel %vm481_vm3, %v4401_v14, %v4402_v23  ;;  %v4421_v14 = vrot.slane %v6467_v61, 1 }
 0x529   : > { %4515 = vst.msk [vmem:[#allocation2 + $0x91] sm:$0xff] %vm172_vm0, %v4483_v15  ;;  %v4484_v12 = vadd.f32 %v5051_v58, %v4390_v41  ;;  %v4221_v51 = vpop.f32.mrb[43].mxu0  ;;  %v4410_v41 = vsel %vm481_vm3, %v4407_v18, %v4409_v39  ;;  %v4427_v18 = vrot.slane %v6463_v22, 1  ;;  %v4429_v39 = vrot.slane %v6466_v34, 1 }
 0x52a   : > { %4513 = vst.msk [vmem:[#allocation2 + $0x79] sm:$0xff] %vm172_vm0, %v4481_v57  ;;  %v4482_v25 = vadd.f32 %v4385_v63, %v4221_v51  ;;  %v4405_v63 = vsel %vm481_vm3, %v4402_v23, %v4404_v45  ;;  %v4422_v23 = vrot.slane %v6464_v50, 1  ;;  %v4424_v45 = vrot.slane %v6468_v7, 1 }
 0x52b   : > { %4516 = vst.msk [vmem:[#allocation2 + $0x99] sm:$0xff] %vm172_vm0, %v4484_v12 }
 0x52c   : > { %4514 = vst.msk [vmem:[#allocation2 + $0x81] sm:$0xff] %vm172_vm0, %v4482_v25 }
 0x530   : > { %v4547_v13 = vld [vmem:[#allocation2 + $0x91] sm:$0xff] }
 0x531   : > { %v4579_v36 = vmax.f32 %v4547_v13, 0.0  ;;  %v4545_v52 = vld [vmem:[#allocation2 + $0x79] sm:$0xff] }
 0x532   : > { %v4577_v60 = vmax.f32 %v4545_v52, 0.0  ;;  %v4548_v8 = vld [vmem:[#allocation2 + $0x99] sm:$0xff] }
 0x533   : > { %4611 = vst.msk [vmem:[%s8810_s20 + $0x50] sm:$0xff] %vm172_vm0, %v4579_v36  ;;  %v4580_v59 = vmax.f32 %v4548_v8, 0.0  ;;  %v4546_v30 = vld [vmem:[#allocation2 + $0x81] sm:$0xff] }
 0x534   : > { %4609 = vst.msk [vmem:[%s8810_s20 + $0x40] sm:$0xff] %vm172_vm0, %v4577_v60  ;;  %v4578_v44 = vmax.f32 %v4546_v30, 0.0 }
 0x535   : > { %4612 = vst.msk [vmem:[%s8810_s20 + $0x58] sm:$0xff] %vm172_vm0, %v4580_v59 }
 0x536   : > { %4610 = vst.msk [vmem:[%s8810_s20 + $0x48] sm:$0xff] %vm172_vm0, %v4578_v44 }
 0x546   : > { %v5054_v46 = vpop.f32.mrb[44].mxu0 }
 0x547   : > { %v4487_v53 = vadd.f32 %v5054_v46, %v4398_v4  ;;  %v4234_v3 = vpop.f32.mrb[45].mxu0  ;;  %v4418_v4 = vsel %vm481_vm3, %v4416_v38, %v4417_v21  ;;  %v6472_v38 = vld [vmem:[#allocation2 + $0x190] sm:$0x3] }
 0x548   : > { %v4485_v47 = vadd.f32 %v4393_v55, %v4234_v3  ;;  %v5055_v5 = vpop.f32.mrb[46].mxu0  ;;  %v4413_v55 = vsel %vm481_vm3, %v4411_v1, %v4412_v26  ;;  %v4439_v62 = vrot.slane %v6472_v38, 1  ;;  %v4431_v1 = vrot.slane %v6473_v9, 1 }
 0x549   : > { %4519 = vst.msk [vmem:[#allocation2 + $0xc1] sm:$0xff] %vm172_vm0, %v4487_v53  ;;  %v4488_v16 = vadd.f32 %v5055_v5, %v4400_v11  ;;  %v4237_v40 = vpop.f32.mrb[47].mxu0  ;;  %v4420_v11 = vsel %vm481_vm3, %v4417_v21, %v4419_v54 }
 0x54a   : > { %4517 = vst.msk [vmem:[#allocation2 + $0xa9] sm:$0xff] %vm172_vm0, %v4485_v47  ;;  %v4486_v2 = vadd.f32 %v4395_v43, %v4237_v40  ;;  %v4415_v43 = vsel %vm481_vm3, %v4412_v26, %v4414_v29  ;;  %v6471_v26 = vld [vmem:[#allocation2 + $0x180] sm:$0xff]  ;;  %v4434_v29 = vrot.slane %v6474_v48, 1 }
 0x54b   : > { %4520 = vst.msk [vmem:[#allocation2 + $0xc9] sm:$0xff] %vm172_vm0, %v4488_v16  ;;  %v4436_v19 = vrot.slane %v6471_v26, 1 }
 0x54c   : > { %4518 = vst.msk [vmem:[#allocation2 + $0xb1] sm:$0xff] %vm172_vm0, %v4486_v2 }
 0x550   : > { %v4551_v35 = vld [vmem:[#allocation2 + $0xc1] sm:$0xff] }
 0x551   : > { %v4583_v32 = vmax.f32 %v4551_v35, 0.0  ;;  %v4549_v27 = vld [vmem:[#allocation2 + $0xa9] sm:$0xff] }
 0x552   : > { %v4581_v20 = vmax.f32 %v4549_v27, 0.0  ;;  %v4552_v6 = vld [vmem:[#allocation2 + $0xc9] sm:$0xff] }
 0x553   : > { %4615 = vst.msk [vmem:[%s8810_s20 + $0x70] sm:$0xff] %vm172_vm0, %v4583_v32  ;;  %v4584_v0 = vmax.f32 %v4552_v6, 0.0  ;;  %v4550_v42 = vld [vmem:[#allocation2 + $0xb1] sm:$0xff] }
 0x554   : > { %4613 = vst.msk [vmem:[%s8810_s20 + $0x60] sm:$0xff] %vm172_vm0, %v4581_v20  ;;  %v4582_v33 = vmax.f32 %v4550_v42, 0.0 }
 0x555   : > { %4616 = vst.msk [vmem:[%s8810_s20 + $0x78] sm:$0xff] %vm172_vm0, %v4584_v0 }
 0x556   : > { %4614 = vst.msk [vmem:[%s8810_s20 + $0x68] sm:$0xff] %vm172_vm0, %v4582_v33 }
 0x566   : > { %v5058_v10 = vpop.f32.mrb[48].mxu0 }
 0x567   : > { %v4491_v15 = vadd.f32 %v5058_v10, %v4408_v37  ;;  %v4250_v49 = vpop.f32.mrb[49].mxu0  ;;  %v4428_v37 = vsel %vm481_vm3, %v4426_v17, %v4427_v18 }
 0x568   : > { %v4489_v57 = vadd.f32 %v4403_v28, %v4250_v49  ;;  %v5059_v58 = vpop.f32.mrb[50].mxu0  ;;  %v4423_v28 = vsel %vm481_vm3, %v4421_v14, %v4422_v23 }
 0x569   : > { %4523 = vst.msk [vmem:[#allocation2 + $0xf1] sm:$0xff] %vm172_vm0, %v4491_v15  ;;  %v4492_v12 = vadd.f32 %v5059_v58, %v4410_v41  ;;  %v4253_v51 = vpop.f32.mrb[51].mxu0  ;;  %v4430_v41 = vsel %vm481_vm3, %v4427_v18, %v4429_v39 }
 0x56a   : > { %4521 = vst.msk [vmem:[#allocation2 + $0xd9] sm:$0xff] %vm172_vm0, %v4489_v57  ;;  %v4490_v25 = vadd.f32 %v4405_v63, %v4253_v51  ;;  %v4425_v63 = vsel %vm481_vm3, %v4422_v23, %v4424_v45 }
 0x56b   : > { %4524 = vst.msk [vmem:[#allocation2 + $0xf9] sm:$0xff] %vm172_vm0, %v4492_v12 }
 0x56c   : > { %4522 = vst.msk [vmem:[#allocation2 + $0xe1] sm:$0xff] %vm172_vm0, %v4490_v25 }
 0x570   : > { %v4555_v13 = vld [vmem:[#allocation2 + $0xf1] sm:$0xff] }
 0x571   : > { %v4587_v36 = vmax.f32 %v4555_v13, 0.0  ;;  %v4553_v52 = vld [vmem:[#allocation2 + $0xd9] sm:$0xff] }
 0x572   : > { %v4585_v60 = vmax.f32 %v4553_v52, 0.0  ;;  %v4556_v8 = vld [vmem:[#allocation2 + $0xf9] sm:$0xff] }
 0x573   : > { %4619 = vst.msk [vmem:[%s8810_s20 + $0x90] sm:$0xff] %vm172_vm0, %v4587_v36  ;;  %v4588_v59 = vmax.f32 %v4556_v8, 0.0  ;;  %v4554_v30 = vld [vmem:[#allocation2 + $0xe1] sm:$0xff] }
 0x574   : > { %4617 = vst.msk [vmem:[%s8810_s20 + $0x80] sm:$0xff] %vm172_vm0, %v4585_v60  ;;  %v4586_v44 = vmax.f32 %v4554_v30, 0.0  ;;  %v6469_v60 = vld [vmem:[#allocation2 + $0x188] sm:$0xff] }
 0x575   : > { %4620 = vst.msk [vmem:[%s8810_s20 + $0x98] sm:$0xff] %vm172_vm0, %v4588_v59  ;;  %v4437_v8 = vrot.slane %v6469_v60, 1 }
 0x576   : > { %4618 = vst.msk [vmem:[%s8810_s20 + $0x88] sm:$0xff] %vm172_vm0, %v4586_v44  ;;  %v6470_v44 = vld [vmem:[#allocation2 + $0x170] sm:$0xff] }
 0x577   : > { %v4432_v56 = vrot.slane %v6470_v44, 1 }
 0x586   : > { %v5062_v46 = vpop.f32.mrb[52].mxu0 }
 0x587   : > { %v4495_v53 = vadd.f32 %v5062_v46, %v4418_v4  ;;  %v4266_v3 = vpop.f32.mrb[53].mxu0  ;;  %v4438_v4 = vsel %vm481_vm3, %v4436_v19, %v4437_v8 }
 0x588   : > { %v4493_v47 = vadd.f32 %v4413_v55, %v4266_v3  ;;  %v5063_v5 = vpop.f32.mrb[54].mxu0  ;;  %v4433_v55 = vsel %vm481_vm3, %v4431_v1, %v4432_v56 }
 0x589   : > { %4527 = vst.msk [vmem:[#allocation2 + $0x121] sm:$0xff] %vm172_vm0, %v4495_v53  ;;  %v4496_v16 = vadd.f32 %v5063_v5, %v4420_v11  ;;  %v4269_v40 = vpop.f32.mrb[55].mxu0  ;;  %v4440_v11 = vsel %vm481_vm3, %v4437_v8, %v4439_v62 }
 0x58a   : > { %4525 = vst.msk [vmem:[#allocation2 + $0x109] sm:$0xff] %vm172_vm0, %v4493_v47  ;;  %v4494_v2 = vadd.f32 %v4415_v43, %v4269_v40  ;;  %v4435_v43 = vsel %vm481_vm3, %v4432_v56, %v4434_v29 }
 0x58b   : > { %4528 = vst.msk [vmem:[#allocation2 + $0x129] sm:$0xff] %vm172_vm0, %v4496_v16 }
 0x58c   : > { %4526 = vst.msk [vmem:[#allocation2 + $0x111] sm:$0xff] %vm172_vm0, %v4494_v2 }
 0x590   : > { %v4559_v35 = vld [vmem:[#allocation2 + $0x121] sm:$0xff] }
 0x591   : > { %v4591_v32 = vmax.f32 %v4559_v35, 0.0  ;;  %v4557_v27 = vld [vmem:[#allocation2 + $0x109] sm:$0xff] }
 0x592   : > { %v4589_v20 = vmax.f32 %v4557_v27, 0.0  ;;  %v4560_v6 = vld [vmem:[#allocation2 + $0x129] sm:$0xff] }
 0x593   : > { %4623 = vst.msk [vmem:[%s8810_s20 + $0xb0] sm:$0xff] %vm172_vm0, %v4591_v32  ;;  %v4592_v0 = vmax.f32 %v4560_v6, 0.0  ;;  %v4558_v42 = vld [vmem:[#allocation2 + $0x111] sm:$0xff] }
 0x594   : > { %4621 = vst.msk [vmem:[%s8810_s20 + $0xa0] sm:$0xff] %vm172_vm0, %v4589_v20  ;;  %v4590_v33 = vmax.f32 %v4558_v42, 0.0 }
 0x595   : > { %4624 = vst.msk [vmem:[%s8810_s20 + $0xb8] sm:$0xff] %vm172_vm0, %v4592_v0 }
 0x596   : > { %4622 = vst.msk [vmem:[%s8810_s20 + $0xa8] sm:$0xff] %vm172_vm0, %v4590_v33 }
 0x5a2   : > { %v5066_v10 = vpop.f32.mrb[56].mxu0 }
 0x5a3   : > { %v4499_v15 = vadd.f32 %v5066_v10, %v4428_v37  ;;  %v4282_v49 = vpop.f32.mrb[57].mxu0 }
 0x5a4   : > { %v4497_v57 = vadd.f32 %v4423_v28, %v4282_v49  ;;  %v5067_v58 = vpop.f32.mrb[58].mxu0 }
 0x5a5   : > { %4531 = vst.msk [vmem:[#allocation2 + $0x151] sm:$0xff] %vm172_vm0, %v4499_v15  ;;  %v4500_v12 = vadd.f32 %v5067_v58, %v4430_v41  ;;  %v4285_v51 = vpop.f32.mrb[59].mxu0 }
 0x5a6   : > { %4529 = vst.msk [vmem:[#allocation2 + $0x139] sm:$0xff] %vm172_vm0, %v4497_v57  ;;  %v4498_v25 = vadd.f32 %v4425_v63, %v4285_v51 }
 0x5a7   : > { %4532 = vst.msk [vmem:[#allocation2 + $0x159] sm:$0xff] %vm172_vm0, %v4500_v12 }
 0x5a8   : > { %4530 = vst.msk [vmem:[#allocation2 + $0x141] sm:$0xff] %vm172_vm0, %v4498_v25 }
 0x5ac   : > { %v4563_v13 = vld [vmem:[#allocation2 + $0x151] sm:$0xff] }
 0x5ad   : > { %v4595_v36 = vmax.f32 %v4563_v13, 0.0  ;;  %v4561_v52 = vld [vmem:[#allocation2 + $0x139] sm:$0xff] }
 0x5ae   : > { %v4593_v59 = vmax.f32 %v4561_v52, 0.0  ;;  %v4564_v30 = vld [vmem:[#allocation2 + $0x159] sm:$0xff] }
 0x5af   : > { %4627 = vst.msk [vmem:[%s8810_s20 + $0xd0] sm:$0xff] %vm172_vm0, %v4595_v36  ;;  %v4596_v21 = vmax.f32 %v4564_v30, 0.0  ;;  %v4562_v24 = vld [vmem:[#allocation2 + $0x141] sm:$0xff] }
 0x5b0   : > { %4625 = vst.msk [vmem:[%s8810_s20 + $0xc0] sm:$0xff] %vm172_vm0, %v4593_v59  ;;  %v4594_v54 = vmax.f32 %v4562_v24, 0.0 }
 0x5b1   : > { %4628 = vst.msk [vmem:[%s8810_s20 + $0xd8] sm:$0xff] %vm172_vm0, %v4596_v21  ;;  %v5070_v46 = vpop.f32.mrb[60].mxu0 }
 0x5b2   : > { %4626 = vst.msk [vmem:[%s8810_s20 + $0xc8] sm:$0xff] %vm172_vm0, %v4594_v54  ;;  %v4503_v53 = vadd.f32 %v5070_v46, %v4438_v4  ;;  %v4298_v3 = vpop.f32.mrb[61].mxu0 }
 0x5b3   : > { %v4501_v47 = vadd.f32 %v4433_v55, %v4298_v3  ;;  %v5071_v5 = vpop.f32.mrb[62].mxu0 }
 0x5b4   : > { %4535 = vst.msk [vmem:[#allocation2 + $0x181] sm:$0xff] %vm172_vm0, %v4503_v53  ;;  %v4504_v16 = vadd.f32 %v5071_v5, %v4440_v11  ;;  %v4301_v40 = vpop.f32.mrb[63].mxu0 }
 0x5b5   : > { %4533 = vst.msk [vmem:[#allocation2 + $0x169] sm:$0xff] %vm172_vm0, %v4501_v47  ;;  %v4502_v2 = vadd.f32 %v4435_v43, %v4301_v40 }
 0x5b6   : > { %4536 = vst.msk [vmem:[#allocation2 + $0x189] sm:$0xff] %vm172_vm0, %v4504_v16 }
 0x5b7   : > { %4534 = vst.msk [vmem:[#allocation2 + $0x171] sm:$0xff] %vm172_vm0, %v4502_v2 }
 0x5bb   : > { %v4567_v35 = vld [vmem:[#allocation2 + $0x181] sm:$0xff] }
 0x5bc   : > { %v4599_v32 = vmax.f32 %v4567_v35, 0.0  ;;  %v4565_v27 = vld [vmem:[#allocation2 + $0x169] sm:$0xff] }
 0x5bd   : > { %v4597_v20 = vmax.f32 %v4565_v27, 0.0  ;;  %v4568_v6 = vld [vmem:[#allocation2 + $0x189] sm:$0xff] }
 0x5be   : > { %4631 = vst.msk [vmem:[%s8810_s20 + $0xf0] sm:$0xff] %vm172_vm0, %v4599_v32  ;;  %v4600_v0 = vmax.f32 %v4568_v6, 0.0  ;;  %v4566_v42 = vld [vmem:[#allocation2 + $0x171] sm:$0xff] }
 0x5bf   : > { %4629 = vst.msk [vmem:[%s8810_s20 + $0xe0] sm:$0xff] %vm172_vm0, %v4597_v20  ;;  %v4598_v33 = vmax.f32 %v4566_v42, 0.0 }
 0x5c0   : > { %4632 = vst.msk [vmem:[%s8810_s20 + $0xf8] sm:$0xff] %vm172_vm0, %v4600_v0 }
 0x5c1   : > { %4630 = vst.msk [vmem:[%s8810_s20 + $0xe8] sm:$0xff] %vm172_vm0, %v4598_v33 }
 0x5c2 PF: > { %s13_s12 = sadd.s32 1, %s6481_s12  }
 0x5c3   : > { %p10_p4 = scmp.ge.s32.totalorder %s13_s12, 4  }
 0x5c5   :  { %12 = sbr.rel (!%p10_p4) target bundleno = 1 (0x1), region = 65 }

</bundles_post_ra>
